<compile_context>
chip_gen: v7x
topology: tpu7x:2x2x1
jax: 0.10.0
libtpu: 0.0.40
codegen_flags: <defaults>
</compile_context>

<pallas_src>
import math
import jax
import jax.numpy as jnp
from jax.experimental import pallas as pl
from jax.experimental.pallas import tpu as pltpu

# (in_features, out_features) for every Linear, encoder then decoder.
LAYER_DIMS = [
    (929, 512), (512, 256), (256, 128), (128, 64), (64, 32), (32, 18), (18, 2),   # encoder
    (2, 18), (18, 32), (32, 64), (64, 128), (128, 256), (256, 512), (512, 929),   # decoder
]
N_LAYERS = len(LAYER_DIMS)
ENC_LAST = 6        # Linear(18, 2): no activation (end of encoder Sequential)
DEC_LAST = 13       # Linear(512, 929): Sigmoid


def _round_up(x, m):
    return ((x + m - 1) // m) * m


def _choose_tb(B):
    """Batch tile size.

    - tiles of at most 512 rows (big enough to amortize per-step overhead and MXU
      fill/drain; small enough to fit v7x's 64 MiB VMEM with headroom),
    - at least 2 tiles once B >= 16 so both v7x TensorCores get work,
    - evenly sized tiles (round_up(ceil(B/n), 8)) so padding waste is <= 7 rows/tile.
    """
    b = max(int(B), 1)
    n_tiles = -(-b // 512)                 # ceil(b / 512)
    if b >= 16:
        n_tiles = max(n_tiles, 2)          # keep both v7x TCs busy
    tb = _round_up(-(-b // n_tiles), 8)    # even tiles, minimal padded rows
    return tb


# ---------------------------------------------------------------------------
# Pallas kernel: one batch tile per grid step, all weights resident in VMEM.
# ---------------------------------------------------------------------------
def ae_kernel(*refs):
    x_ref = refs[0]                        # (TB, 1024) bf16 batch tile
    out_ref = refs[-1]                     # (TB, 1024) bf16 output tile
    param_refs = refs[1:-1]                # w0, b0, w1, b1, ..., w13, b13

    h = x_ref[...]                         # bf16
    for i in range(N_LAYERS):
        w = param_refs[2 * i][...]         # bf16 (in_pad, out_pad)
        b = param_refs[2 * i + 1][...]     # f32  (1, out_pad)
        acc = jnp.dot(h, w, preferred_element_type=jnp.float32) + b
        if i == DEC_LAST:                  # final layer: Sigmoid -> write out (bf16)
            out_ref[...] = jax.nn.sigmoid(acc).astype(out_ref.dtype)
        elif i == ENC_LAST:                # bottleneck Linear(18, 2): no activation
            h = acc.astype(jnp.bfloat16)
        else:                              # ReLU
            h = jnp.maximum(acc, 0.0).astype(jnp.bfloat16)


# ---------------------------------------------------------------------------
# Parameter init (deterministic, PyTorch-Linear-style U(-1/sqrt(in), 1/sqrt(in)))
# ---------------------------------------------------------------------------
def init_params(key):
    params = []
    for fan_in, fan_out in LAYER_DIMS:
        key, kw, kb = jax.random.split(key, 3)
        bound = 1.0 / math.sqrt(fan_in)
        w = jax.random.uniform(kw, (fan_in, fan_out), jnp.float32, -bound, bound)
        b = jax.random.uniform(kb, (fan_out,), jnp.float32, -bound, bound)
        params.append((w, b))
    return params


def _pad_params(params):
    """Zero-pad feature dims to multiples of 128; weights -> bf16, biases -> f32."""
    padded = []
    for w, b in params:
        fi, fo = w.shape
        fip, fop = _round_up(fi, 128), _round_up(fo, 128)
        wp = jnp.zeros((fip, fop), jnp.bfloat16).at[:fi, :fo].set(
            w.astype(jnp.bfloat16))
        bp = jnp.zeros((1, fop), jnp.float32).at[0, :fo].set(
            b.astype(jnp.float32))
        padded.append((wp, bp))
    return padded


# ---------------------------------------------------------------------------
# Wrapper: pad + cast (fused under jit), tiled pallas_call, un-pad + f32 cast.
# ---------------------------------------------------------------------------
def ae_forward(x, params):
    B, D = x.shape
    assert D == LAYER_DIMS[0][0]

    TB = _choose_tb(B)
    Bp = _round_up(B, TB)
    Dp = _round_up(D, 128)
    out_d = LAYER_DIMS[-1][1]
    out_dp = _round_up(out_d, 128)

    # Pad + cast to bf16 (single fused XLA op under jit).
    xp = jnp.zeros((Bp, Dp), jnp.bfloat16).at[:B, :D].set(x.astype(jnp.bfloat16))

    flat = []
    for w, b in _pad_params(params):
        flat += [w, b]

    # Constant weights/biases: untiled, single resident copy in VMEM
    # (no per-grid-step double-buffering of ~2.9 MiB of weights).
    weight_spec = pl.BlockSpec(memory_space=pltpu.MemorySpace.VMEM)
    in_specs = [pl.BlockSpec((TB, Dp), lambda i: (i, 0))]
    in_specs += [weight_spec for _ in flat]

    flops = 2 * Bp * sum(fi * fo for fi, fo in LAYER_DIMS)
    weight_bytes = sum(int(a.size) * a.dtype.itemsize for a in flat)
    bytes_accessed = Bp * Dp * 2 + weight_bytes + Bp * out_dp * 2
    cost = pl.CostEstimate(flops=flops,
                           transcendentals=Bp * out_d,
                           bytes_accessed=bytes_accessed)

    out = pl.pallas_call(
        ae_kernel,
        grid=(Bp // TB,),
        out_shape=jax.ShapeDtypeStruct((Bp, out_dp), jnp.bfloat16),
        in_specs=in_specs,
        out_specs=pl.BlockSpec((TB, out_dp), lambda i: (i, 0)),
        compiler_params=pltpu.CompilerParams(
            dimension_semantics=("parallel",),      # shard batch tiles across TCs
            vmem_limit_bytes=32 << 20,              # covers TB=512 (~13 MiB real use)
        ),
        cost_estimate=cost,
    )(xp, *flat)
    # Slice off padding and return f32 to match the PyTorch module's output dtype.
    return out[:B, :out_d].astype(jnp.float32)


# Pure-JAX reference (f32 math, weights rounded to bf16 like the kernel stores).
def ae_reference(x, params):
    h = x.astype(jnp.float32)
    for i, (w, b) in enumerate(params):
        wq = w.astype(jnp.bfloat16).astype(jnp.float32)
        h = h @ wq + b.astype(jnp.float32)
        if i == DEC_LAST:
            h = jax.nn.sigmoid(h)
        elif i == ENC_LAST:
            pass
        else:
            h = jnp.maximum(h, 0.0)
    return h


if __name__ == "__main__":
    key = jax.random.PRNGKey(0)
    key, kx = jax.random.split(key)
    batch = 4
    x = jax.random.normal(kx, (batch, 929), jnp.float32)

    params = init_params(key)

    fwd = jax.jit(ae_forward)
    out = jax.block_until_ready(fwd(x, params))
    assert out.shape == (batch, 929)

    ref = ae_reference(x, params)
    err = float(jnp.max(jnp.abs(out - ref)))
    # bf16 weights/activations/output vs f32 reference (same bf16-rounded weights):
    # differences are only activation/output rounding -> comfortably under 2e-2.
    assert err < 2e-2, f"mismatch vs reference: max abs err = {err}"

    print("KERNEL_OK")
</pallas_src>

<mosaic_0001>
module attributes {stable_mosaic.version = 11 : i64} {
  func.func @ae_kernel(%arg0: i32, %arg1: memref<8x1024xbf16, #tpu.memory_space<vmem>>, %arg2: memref<1024x512xbf16, #tpu.memory_space<vmem>>, %arg3: memref<1x512xf32, #tpu.memory_space<vmem>>, %arg4: memref<512x256xbf16, #tpu.memory_space<vmem>>, %arg5: memref<1x256xf32, #tpu.memory_space<vmem>>, %arg6: memref<256x128xbf16, #tpu.memory_space<vmem>>, %arg7: memref<1x128xf32, #tpu.memory_space<vmem>>, %arg8: memref<128x128xbf16, #tpu.memory_space<vmem>>, %arg9: memref<1x128xf32, #tpu.memory_space<vmem>>, %arg10: memref<128x128xbf16, #tpu.memory_space<vmem>>, %arg11: memref<1x128xf32, #tpu.memory_space<vmem>>, %arg12: memref<128x128xbf16, #tpu.memory_space<vmem>>, %arg13: memref<1x128xf32, #tpu.memory_space<vmem>>, %arg14: memref<128x128xbf16, #tpu.memory_space<vmem>>, %arg15: memref<1x128xf32, #tpu.memory_space<vmem>>, %arg16: memref<128x128xbf16, #tpu.memory_space<vmem>>, %arg17: memref<1x128xf32, #tpu.memory_space<vmem>>, %arg18: memref<128x128xbf16, #tpu.memory_space<vmem>>, %arg19: memref<1x128xf32, #tpu.memory_space<vmem>>, %arg20: memref<128x128xbf16, #tpu.memory_space<vmem>>, %arg21: memref<1x128xf32, #tpu.memory_space<vmem>>, %arg22: memref<128x128xbf16, #tpu.memory_space<vmem>>, %arg23: memref<1x128xf32, #tpu.memory_space<vmem>>, %arg24: memref<128x256xbf16, #tpu.memory_space<vmem>>, %arg25: memref<1x256xf32, #tpu.memory_space<vmem>>, %arg26: memref<256x512xbf16, #tpu.memory_space<vmem>>, %arg27: memref<1x512xf32, #tpu.memory_space<vmem>>, %arg28: memref<512x1024xbf16, #tpu.memory_space<vmem>>, %arg29: memref<1x1024xf32, #tpu.memory_space<vmem>>, %arg30: memref<8x1024xbf16, #tpu.memory_space<vmem>>) attributes {dimension_semantics = [#tpu.dimension_semantics<parallel>], iteration_bounds = array<i64: 1>, scalar_prefetch = 0 : i64, scratch_operands = 0 : i64, tpu.core_type = #tpu.core_type<tc>, window_params = [{transform_indices = @transform_0, window_bounds = array<i64: 8, 1024>}, {pipeline_mode = #tpu.pipeline_mode<synchronous>, transform_indices = @transform_1, window_bounds = array<i64: 1024, 512>}, {pipeline_mode = #tpu.pipeline_mode<synchronous>, transform_indices = @transform_2, window_bounds = array<i64: 1, 512>}, {pipeline_mode = #tpu.pipeline_mode<synchronous>, transform_indices = @transform_3, window_bounds = array<i64: 512, 256>}, {pipeline_mode = #tpu.pipeline_mode<synchronous>, transform_indices = @transform_4, window_bounds = array<i64: 1, 256>}, {pipeline_mode = #tpu.pipeline_mode<synchronous>, transform_indices = @transform_5, window_bounds = array<i64: 256, 128>}, {pipeline_mode = #tpu.pipeline_mode<synchronous>, transform_indices = @transform_6, window_bounds = array<i64: 1, 128>}, {pipeline_mode = #tpu.pipeline_mode<synchronous>, transform_indices = @transform_7, window_bounds = array<i64: 128, 128>}, {pipeline_mode = #tpu.pipeline_mode<synchronous>, transform_indices = @transform_8, window_bounds = array<i64: 1, 128>}, {pipeline_mode = #tpu.pipeline_mode<synchronous>, transform_indices = @transform_9, window_bounds = array<i64: 128, 128>}, {pipeline_mode = #tpu.pipeline_mode<synchronous>, transform_indices = @transform_10, window_bounds = array<i64: 1, 128>}, {pipeline_mode = #tpu.pipeline_mode<synchronous>, transform_indices = @transform_11, window_bounds = array<i64: 128, 128>}, {pipeline_mode = #tpu.pipeline_mode<synchronous>, transform_indices = @transform_12, window_bounds = array<i64: 1, 128>}, {pipeline_mode = #tpu.pipeline_mode<synchronous>, transform_indices = @transform_13, window_bounds = array<i64: 128, 128>}, {pipeline_mode = #tpu.pipeline_mode<synchronous>, transform_indices = @transform_14, window_bounds = array<i64: 1, 128>}, {pipeline_mode = #tpu.pipeline_mode<synchronous>, transform_indices = @transform_15, window_bounds = array<i64: 128, 128>}, {pipeline_mode = #tpu.pipeline_mode<synchronous>, transform_indices = @transform_16, window_bounds = array<i64: 1, 128>}, {pipeline_mode = #tpu.pipeline_mode<synchronous>, transform_indices = @transform_17, window_bounds = array<i64: 128, 128>}, {pipeline_mode = #tpu.pipeline_mode<synchronous>, transform_indices = @transform_18, window_bounds = array<i64: 1, 128>}, {pipeline_mode = #tpu.pipeline_mode<synchronous>, transform_indices = @transform_19, window_bounds = array<i64: 128, 128>}, {pipeline_mode = #tpu.pipeline_mode<synchronous>, transform_indices = @transform_20, window_bounds = array<i64: 1, 128>}, {pipeline_mode = #tpu.pipeline_mode<synchronous>, transform_indices = @transform_21, window_bounds = array<i64: 128, 128>}, {pipeline_mode = #tpu.pipeline_mode<synchronous>, transform_indices = @transform_22, window_bounds = array<i64: 1, 128>}, {pipeline_mode = #tpu.pipeline_mode<synchronous>, transform_indices = @transform_23, window_bounds = array<i64: 128, 256>}, {pipeline_mode = #tpu.pipeline_mode<synchronous>, transform_indices = @transform_24, window_bounds = array<i64: 1, 256>}, {pipeline_mode = #tpu.pipeline_mode<synchronous>, transform_indices = @transform_25, window_bounds = array<i64: 256, 512>}, {pipeline_mode = #tpu.pipeline_mode<synchronous>, transform_indices = @transform_26, window_bounds = array<i64: 1, 512>}, {pipeline_mode = #tpu.pipeline_mode<synchronous>, transform_indices = @transform_27, window_bounds = array<i64: 512, 1024>}, {pipeline_mode = #tpu.pipeline_mode<synchronous>, transform_indices = @transform_28, window_bounds = array<i64: 1, 1024>}, {transform_indices = @transform_29, window_bounds = array<i64: 8, 1024>}]} {
    %c0 = arith.constant 0 : index
    %c0_0 = arith.constant 0 : index
    %0 = vector.load %arg1[%c0, %c0_0] : memref<8x1024xbf16, #tpu.memory_space<vmem>>, vector<8x1024xbf16>
    %c0_1 = arith.constant 0 : index
    %c0_2 = arith.constant 0 : index
    %1 = vector.load %arg2[%c0_1, %c0_2] : memref<1024x512xbf16, #tpu.memory_space<vmem>>, vector<1024x512xbf16>
    %c0_3 = arith.constant 0 : index
    %c0_4 = arith.constant 0 : index
    %2 = vector.load %arg3[%c0_3, %c0_4] : memref<1x512xf32, #tpu.memory_space<vmem>>, vector<1x512xf32>
    %cst = arith.constant dense<0.000000e+00> : vector<8x512xf32>
    %3 = tpu.matmul %0, %1, %cst {dimension_numbers = #tpu.dot_dimension_numbers<[1], [0], [0], [1], [0, 0, 1, 1], [], []>} : vector<8x1024xbf16>, vector<1024x512xbf16>, vector<8x512xf32> -> vector<8x512xf32>
    %4 = vector.broadcast %2 : vector<1x512xf32> to vector<8x512xf32>
    %5 = arith.addf %3, %4 : vector<8x512xf32>
    %cst_5 = arith.constant 0.000000e+00 : f32
    %6 = vector.broadcast %cst_5 : f32 to vector<8x512xf32>
    %7 = arith.maximumf %5, %6 : vector<8x512xf32>
    %8 = arith.truncf %7 : vector<8x512xf32> to vector<8x512xbf16>
    %c0_6 = arith.constant 0 : index
    %c0_7 = arith.constant 0 : index
    %9 = vector.load %arg4[%c0_6, %c0_7] : memref<512x256xbf16, #tpu.memory_space<vmem>>, vector<512x256xbf16>
    %c0_8 = arith.constant 0 : index
    %c0_9 = arith.constant 0 : index
    %10 = vector.load %arg5[%c0_8, %c0_9] : memref<1x256xf32, #tpu.memory_space<vmem>>, vector<1x256xf32>
    %cst_10 = arith.constant dense<0.000000e+00> : vector<8x256xf32>
    %11 = tpu.matmul %8, %9, %cst_10 {dimension_numbers = #tpu.dot_dimension_numbers<[1], [0], [0], [1], [0, 0, 1, 1], [], []>} : vector<8x512xbf16>, vector<512x256xbf16>, vector<8x256xf32> -> vector<8x256xf32>
    %12 = vector.broadcast %10 : vector<1x256xf32> to vector<8x256xf32>
    %13 = arith.addf %11, %12 : vector<8x256xf32>
    %cst_11 = arith.constant 0.000000e+00 : f32
    %14 = vector.broadcast %cst_11 : f32 to vector<8x256xf32>
    %15 = arith.maximumf %13, %14 : vector<8x256xf32>
    %16 = arith.truncf %15 : vector<8x256xf32> to vector<8x256xbf16>
    %c0_12 = arith.constant 0 : index
    %c0_13 = arith.constant 0 : index
    %17 = vector.load %arg6[%c0_12, %c0_13] : memref<256x128xbf16, #tpu.memory_space<vmem>>, vector<256x128xbf16>
    %c0_14 = arith.constant 0 : index
    %c0_15 = arith.constant 0 : index
    %18 = vector.load %arg7[%c0_14, %c0_15] : memref<1x128xf32, #tpu.memory_space<vmem>>, vector<1x128xf32>
    %cst_16 = arith.constant dense<0.000000e+00> : vector<8x128xf32>
    %19 = tpu.matmul %16, %17, %cst_16 {dimension_numbers = #tpu.dot_dimension_numbers<[1], [0], [0], [1], [0, 0, 1, 1], [], []>} : vector<8x256xbf16>, vector<256x128xbf16>, vector<8x128xf32> -> vector<8x128xf32>
    %20 = vector.broadcast %18 : vector<1x128xf32> to vector<8x128xf32>
    %21 = arith.addf %19, %20 : vector<8x128xf32>
    %cst_17 = arith.constant 0.000000e+00 : f32
    %22 = vector.broadcast %cst_17 : f32 to vector<8x128xf32>
    %23 = arith.maximumf %21, %22 : vector<8x128xf32>
    %24 = arith.truncf %23 : vector<8x128xf32> to vector<8x128xbf16>
    %c0_18 = arith.constant 0 : index
    %c0_19 = arith.constant 0 : index
    %25 = vector.load %arg8[%c0_18, %c0_19] : memref<128x128xbf16, #tpu.memory_space<vmem>>, vector<128x128xbf16>
    %c0_20 = arith.constant 0 : index
    %c0_21 = arith.constant 0 : index
    %26 = vector.load %arg9[%c0_20, %c0_21] : memref<1x128xf32, #tpu.memory_space<vmem>>, vector<1x128xf32>
    %cst_22 = arith.constant dense<0.000000e+00> : vector<8x128xf32>
    %27 = tpu.matmul %24, %25, %cst_22 {dimension_numbers = #tpu.dot_dimension_numbers<[1], [0], [0], [1], [0, 0, 1, 1], [], []>} : vector<8x128xbf16>, vector<128x128xbf16>, vector<8x128xf32> -> vector<8x128xf32>
    %28 = vector.broadcast %26 : vector<1x128xf32> to vector<8x128xf32>
    %29 = arith.addf %27, %28 : vector<8x128xf32>
    %cst_23 = arith.constant 0.000000e+00 : f32
    %30 = vector.broadcast %cst_23 : f32 to vector<8x128xf32>
    %31 = arith.maximumf %29, %30 : vector<8x128xf32>
    %32 = arith.truncf %31 : vector<8x128xf32> to vector<8x128xbf16>
    %c0_24 = arith.constant 0 : index
    %c0_25 = arith.constant 0 : index
    %33 = vector.load %arg10[%c0_24, %c0_25] : memref<128x128xbf16, #tpu.memory_space<vmem>>, vector<128x128xbf16>
    %c0_26 = arith.constant 0 : index
    %c0_27 = arith.constant 0 : index
    %34 = vector.load %arg11[%c0_26, %c0_27] : memref<1x128xf32, #tpu.memory_space<vmem>>, vector<1x128xf32>
    %cst_28 = arith.constant dense<0.000000e+00> : vector<8x128xf32>
    %35 = tpu.matmul %32, %33, %cst_28 {dimension_numbers = #tpu.dot_dimension_numbers<[1], [0], [0], [1], [0, 0, 1, 1], [], []>} : vector<8x128xbf16>, vector<128x128xbf16>, vector<8x128xf32> -> vector<8x128xf32>
    %36 = vector.broadcast %34 : vector<1x128xf32> to vector<8x128xf32>
    %37 = arith.addf %35, %36 : vector<8x128xf32>
    %cst_29 = arith.constant 0.000000e+00 : f32
    %38 = vector.broadcast %cst_29 : f32 to vector<8x128xf32>
    %39 = arith.maximumf %37, %38 : vector<8x128xf32>
    %40 = arith.truncf %39 : vector<8x128xf32> to vector<8x128xbf16>
    %c0_30 = arith.constant 0 : index
    %c0_31 = arith.constant 0 : index
    %41 = vector.load %arg12[%c0_30, %c0_31] : memref<128x128xbf16, #tpu.memory_space<vmem>>, vector<128x128xbf16>
    %c0_32 = arith.constant 0 : index
    %c0_33 = arith.constant 0 : index
    %42 = vector.load %arg13[%c0_32, %c0_33] : memref<1x128xf32, #tpu.memory_space<vmem>>, vector<1x128xf32>
    %cst_34 = arith.constant dense<0.000000e+00> : vector<8x128xf32>
    %43 = tpu.matmul %40, %41, %cst_34 {dimension_numbers = #tpu.dot_dimension_numbers<[1], [0], [0], [1], [0, 0, 1, 1], [], []>} : vector<8x128xbf16>, vector<128x128xbf16>, vector<8x128xf32> -> vector<8x128xf32>
    %44 = vector.broadcast %42 : vector<1x128xf32> to vector<8x128xf32>
    %45 = arith.addf %43, %44 : vector<8x128xf32>
    %cst_35 = arith.constant 0.000000e+00 : f32
    %46 = vector.broadcast %cst_35 : f32 to vector<8x128xf32>
    %47 = arith.maximumf %45, %46 : vector<8x128xf32>
    %48 = arith.truncf %47 : vector<8x128xf32> to vector<8x128xbf16>
    %c0_36 = arith.constant 0 : index
    %c0_37 = arith.constant 0 : index
    %49 = vector.load %arg14[%c0_36, %c0_37] : memref<128x128xbf16, #tpu.memory_space<vmem>>, vector<128x128xbf16>
    %c0_38 = arith.constant 0 : index
    %c0_39 = arith.constant 0 : index
    %50 = vector.load %arg15[%c0_38, %c0_39] : memref<1x128xf32, #tpu.memory_space<vmem>>, vector<1x128xf32>
    %cst_40 = arith.constant dense<0.000000e+00> : vector<8x128xf32>
    %51 = tpu.matmul %48, %49, %cst_40 {dimension_numbers = #tpu.dot_dimension_numbers<[1], [0], [0], [1], [0, 0, 1, 1], [], []>} : vector<8x128xbf16>, vector<128x128xbf16>, vector<8x128xf32> -> vector<8x128xf32>
    %52 = vector.broadcast %50 : vector<1x128xf32> to vector<8x128xf32>
    %53 = arith.addf %51, %52 : vector<8x128xf32>
    %54 = arith.truncf %53 : vector<8x128xf32> to vector<8x128xbf16>
    %c0_41 = arith.constant 0 : index
    %c0_42 = arith.constant 0 : index
    %55 = vector.load %arg16[%c0_41, %c0_42] : memref<128x128xbf16, #tpu.memory_space<vmem>>, vector<128x128xbf16>
    %c0_43 = arith.constant 0 : index
    %c0_44 = arith.constant 0 : index
    %56 = vector.load %arg17[%c0_43, %c0_44] : memref<1x128xf32, #tpu.memory_space<vmem>>, vector<1x128xf32>
    %cst_45 = arith.constant dense<0.000000e+00> : vector<8x128xf32>
    %57 = tpu.matmul %54, %55, %cst_45 {dimension_numbers = #tpu.dot_dimension_numbers<[1], [0], [0], [1], [0, 0, 1, 1], [], []>} : vector<8x128xbf16>, vector<128x128xbf16>, vector<8x128xf32> -> vector<8x128xf32>
    %58 = vector.broadcast %56 : vector<1x128xf32> to vector<8x128xf32>
    %59 = arith.addf %57, %58 : vector<8x128xf32>
    %cst_46 = arith.constant 0.000000e+00 : f32
    %60 = vector.broadcast %cst_46 : f32 to vector<8x128xf32>
    %61 = arith.maximumf %59, %60 : vector<8x128xf32>
    %62 = arith.truncf %61 : vector<8x128xf32> to vector<8x128xbf16>
    %c0_47 = arith.constant 0 : index
    %c0_48 = arith.constant 0 : index
    %63 = vector.load %arg18[%c0_47, %c0_48] : memref<128x128xbf16, #tpu.memory_space<vmem>>, vector<128x128xbf16>
    %c0_49 = arith.constant 0 : index
    %c0_50 = arith.constant 0 : index
    %64 = vector.load %arg19[%c0_49, %c0_50] : memref<1x128xf32, #tpu.memory_space<vmem>>, vector<1x128xf32>
    %cst_51 = arith.constant dense<0.000000e+00> : vector<8x128xf32>
    %65 = tpu.matmul %62, %63, %cst_51 {dimension_numbers = #tpu.dot_dimension_numbers<[1], [0], [0], [1], [0, 0, 1, 1], [], []>} : vector<8x128xbf16>, vector<128x128xbf16>, vector<8x128xf32> -> vector<8x128xf32>
    %66 = vector.broadcast %64 : vector<1x128xf32> to vector<8x128xf32>
    %67 = arith.addf %65, %66 : vector<8x128xf32>
    %cst_52 = arith.constant 0.000000e+00 : f32
    %68 = vector.broadcast %cst_52 : f32 to vector<8x128xf32>
    %69 = arith.maximumf %67, %68 : vector<8x128xf32>
    %70 = arith.truncf %69 : vector<8x128xf32> to vector<8x128xbf16>
    %c0_53 = arith.constant 0 : index
    %c0_54 = arith.constant 0 : index
    %71 = vector.load %arg20[%c0_53, %c0_54] : memref<128x128xbf16, #tpu.memory_space<vmem>>, vector<128x128xbf16>
    %c0_55 = arith.constant 0 : index
    %c0_56 = arith.constant 0 : index
    %72 = vector.load %arg21[%c0_55, %c0_56] : memref<1x128xf32, #tpu.memory_space<vmem>>, vector<1x128xf32>
    %cst_57 = arith.constant dense<0.000000e+00> : vector<8x128xf32>
    %73 = tpu.matmul %70, %71, %cst_57 {dimension_numbers = #tpu.dot_dimension_numbers<[1], [0], [0], [1], [0, 0, 1, 1], [], []>} : vector<8x128xbf16>, vector<128x128xbf16>, vector<8x128xf32> -> vector<8x128xf32>
    %74 = vector.broadcast %72 : vector<1x128xf32> to vector<8x128xf32>
    %75 = arith.addf %73, %74 : vector<8x128xf32>
    %cst_58 = arith.constant 0.000000e+00 : f32
    %76 = vector.broadcast %cst_58 : f32 to vector<8x128xf32>
    %77 = arith.maximumf %75, %76 : vector<8x128xf32>
    %78 = arith.truncf %77 : vector<8x128xf32> to vector<8x128xbf16>
    %c0_59 = arith.constant 0 : index
    %c0_60 = arith.constant 0 : index
    %79 = vector.load %arg22[%c0_59, %c0_60] : memref<128x128xbf16, #tpu.memory_space<vmem>>, vector<128x128xbf16>
    %c0_61 = arith.constant 0 : index
    %c0_62 = arith.constant 0 : index
    %80 = vector.load %arg23[%c0_61, %c0_62] : memref<1x128xf32, #tpu.memory_space<vmem>>, vector<1x128xf32>
    %cst_63 = arith.constant dense<0.000000e+00> : vector<8x128xf32>
    %81 = tpu.matmul %78, %79, %cst_63 {dimension_numbers = #tpu.dot_dimension_numbers<[1], [0], [0], [1], [0, 0, 1, 1], [], []>} : vector<8x128xbf16>, vector<128x128xbf16>, vector<8x128xf32> -> vector<8x128xf32>
    %82 = vector.broadcast %80 : vector<1x128xf32> to vector<8x128xf32>
    %83 = arith.addf %81, %82 : vector<8x128xf32>
    %cst_64 = arith.constant 0.000000e+00 : f32
    %84 = vector.broadcast %cst_64 : f32 to vector<8x128xf32>
    %85 = arith.maximumf %83, %84 : vector<8x128xf32>
    %86 = arith.truncf %85 : vector<8x128xf32> to vector<8x128xbf16>
    %c0_65 = arith.constant 0 : index
    %c0_66 = arith.constant 0 : index
    %87 = vector.load %arg24[%c0_65, %c0_66] : memref<128x256xbf16, #tpu.memory_space<vmem>>, vector<128x256xbf16>
    %c0_67 = arith.constant 0 : index
    %c0_68 = arith.constant 0 : index
    %88 = vector.load %arg25[%c0_67, %c0_68] : memref<1x256xf32, #tpu.memory_space<vmem>>, vector<1x256xf32>
    %cst_69 = arith.constant dense<0.000000e+00> : vector<8x256xf32>
    %89 = tpu.matmul %86, %87, %cst_69 {dimension_numbers = #tpu.dot_dimension_numbers<[1], [0], [0], [1], [0, 0, 1, 1], [], []>} : vector<8x128xbf16>, vector<128x256xbf16>, vector<8x256xf32> -> vector<8x256xf32>
    %90 = vector.broadcast %88 : vector<1x256xf32> to vector<8x256xf32>
    %91 = arith.addf %89, %90 : vector<8x256xf32>
    %cst_70 = arith.constant 0.000000e+00 : f32
    %92 = vector.broadcast %cst_70 : f32 to vector<8x256xf32>
    %93 = arith.maximumf %91, %92 : vector<8x256xf32>
    %94 = arith.truncf %93 : vector<8x256xf32> to vector<8x256xbf16>
    %c0_71 = arith.constant 0 : index
    %c0_72 = arith.constant 0 : index
    %95 = vector.load %arg26[%c0_71, %c0_72] : memref<256x512xbf16, #tpu.memory_space<vmem>>, vector<256x512xbf16>
    %c0_73 = arith.constant 0 : index
    %c0_74 = arith.constant 0 : index
    %96 = vector.load %arg27[%c0_73, %c0_74] : memref<1x512xf32, #tpu.memory_space<vmem>>, vector<1x512xf32>
    %cst_75 = arith.constant dense<0.000000e+00> : vector<8x512xf32>
    %97 = tpu.matmul %94, %95, %cst_75 {dimension_numbers = #tpu.dot_dimension_numbers<[1], [0], [0], [1], [0, 0, 1, 1], [], []>} : vector<8x256xbf16>, vector<256x512xbf16>, vector<8x512xf32> -> vector<8x512xf32>
    %98 = vector.broadcast %96 : vector<1x512xf32> to vector<8x512xf32>
    %99 = arith.addf %97, %98 : vector<8x512xf32>
    %cst_76 = arith.constant 0.000000e+00 : f32
    %100 = vector.broadcast %cst_76 : f32 to vector<8x512xf32>
    %101 = arith.maximumf %99, %100 : vector<8x512xf32>
    %102 = arith.truncf %101 : vector<8x512xf32> to vector<8x512xbf16>
    %c0_77 = arith.constant 0 : index
    %c0_78 = arith.constant 0 : index
    %103 = vector.load %arg28[%c0_77, %c0_78] : memref<512x1024xbf16, #tpu.memory_space<vmem>>, vector<512x1024xbf16>
    %c0_79 = arith.constant 0 : index
    %c0_80 = arith.constant 0 : index
    %104 = vector.load %arg29[%c0_79, %c0_80] : memref<1x1024xf32, #tpu.memory_space<vmem>>, vector<1x1024xf32>
    %cst_81 = arith.constant dense<0.000000e+00> : vector<8x1024xf32>
    %105 = tpu.matmul %102, %103, %cst_81 {dimension_numbers = #tpu.dot_dimension_numbers<[1], [0], [0], [1], [0, 0, 1, 1], [], []>} : vector<8x512xbf16>, vector<512x1024xbf16>, vector<8x1024xf32> -> vector<8x1024xf32>
    %106 = vector.broadcast %104 : vector<1x1024xf32> to vector<8x1024xf32>
    %107 = arith.addf %105, %106 : vector<8x1024xf32>
    %108 = arith.negf %107 : vector<8x1024xf32>
    %109 = math.exp %108 : vector<8x1024xf32>
    %cst_82 = arith.constant 1.000000e+00 : f32
    %110 = vector.broadcast %cst_82 : f32 to vector<8x1024xf32>
    %111 = arith.addf %110, %109 : vector<8x1024xf32>
    %112 = arith.divf %110, %111 : vector<8x1024xf32>
    %113 = arith.truncf %112 : vector<8x1024xf32> to vector<8x1024xbf16>
    %c0_83 = arith.constant 0 : index
    %c0_84 = arith.constant 0 : index
    %114 = vector.load %arg30[%c0_83, %c0_84] : memref<8x1024xbf16, #tpu.memory_space<vmem>>, vector<8x1024xbf16>
    tpu.vector_store %arg30[%c0_83, %c0_84], %113 {strides = array<i32>} : memref<8x1024xbf16, #tpu.memory_space<vmem>>, vector<8x1024xbf16>,
    return
  }
  func.func @transform_0(%arg0: i32) -> (i32, i32) {
    %c0_i32 = arith.constant 0 : i32
    %c0_i32_0 = arith.constant 0 : i32
    return %arg0, %c0_i32 : i32, i32
  }
  func.func @transform_1(%arg0: i32) -> (i32, i32) {
    %c0_i32 = arith.constant 0 : i32
    %c0_i32_0 = arith.constant 0 : i32
    %c0_i32_1 = arith.constant 0 : i32
    return %c0_i32, %c0_i32_0 : i32, i32
  }
  func.func @transform_2(%arg0: i32) -> (i32, i32) {
    %c0_i32 = arith.constant 0 : i32
    %c0_i32_0 = arith.constant 0 : i32
    %c0_i32_1 = arith.constant 0 : i32
    return %c0_i32, %c0_i32_0 : i32, i32
  }
  func.func @transform_3(%arg0: i32) -> (i32, i32) {
    %c0_i32 = arith.constant 0 : i32
    %c0_i32_0 = arith.constant 0 : i32
    %c0_i32_1 = arith.constant 0 : i32
    return %c0_i32, %c0_i32_0 : i32, i32
  }
  func.func @transform_4(%arg0: i32) -> (i32, i32) {
    %c0_i32 = arith.constant 0 : i32
    %c0_i32_0 = arith.constant 0 : i32
    %c0_i32_1 = arith.constant 0 : i32
    return %c0_i32, %c0_i32_0 : i32, i32
  }
  func.func @transform_5(%arg0: i32) -> (i32, i32) {
    %c0_i32 = arith.constant 0 : i32
    %c0_i32_0 = arith.constant 0 : i32
    %c0_i32_1 = arith.constant 0 : i32
    return %c0_i32, %c0_i32_0 : i32, i32
  }
  func.func @transform_6(%arg0: i32) -> (i32, i32) {
    %c0_i32 = arith.constant 0 : i32
    %c0_i32_0 = arith.constant 0 : i32
    %c0_i32_1 = arith.constant 0 : i32
    return %c0_i32, %c0_i32_0 : i32, i32
  }
  func.func @transform_7(%arg0: i32) -> (i32, i32) {
    %c0_i32 = arith.constant 0 : i32
    %c0_i32_0 = arith.constant 0 : i32
    %c0_i32_1 = arith.constant 0 : i32
    return %c0_i32, %c0_i32_0 : i32, i32
  }
  func.func @transform_8(%arg0: i32) -> (i32, i32) {
    %c0_i32 = arith.constant 0 : i32
    %c0_i32_0 = arith.constant 0 : i32
    %c0_i32_1 = arith.constant 0 : i32
    return %c0_i32, %c0_i32_0 : i32, i32
  }
  func.func @transform_9(%arg0: i32) -> (i32, i32) {
    %c0_i32 = arith.constant 0 : i32
    %c0_i32_0 = arith.constant 0 : i32
    %c0_i32_1 = arith.constant 0 : i32
    return %c0_i32, %c0_i32_0 : i32, i32
  }
  func.func @transform_10(%arg0: i32) -> (i32, i32) {
    %c0_i32 = arith.constant 0 : i32
    %c0_i32_0 = arith.constant 0 : i32
    %c0_i32_1 = arith.constant 0 : i32
    return %c0_i32, %c0_i32_0 : i32, i32
  }
  func.func @transform_11(%arg0: i32) -> (i32, i32) {
    %c0_i32 = arith.constant 0 : i32
    %c0_i32_0 = arith.constant 0 : i32
    %c0_i32_1 = arith.constant 0 : i32
    return %c0_i32, %c0_i32_0 : i32, i32
  }
  func.func @transform_12(%arg0: i32) -> (i32, i32) {
    %c0_i32 = arith.constant 0 : i32
    %c0_i32_0 = arith.constant 0 : i32
    %c0_i32_1 = arith.constant 0 : i32
    return %c0_i32, %c0_i32_0 : i32, i32
  }
  func.func @transform_13(%arg0: i32) -> (i32, i32) {
    %c0_i32 = arith.constant 0 : i32
    %c0_i32_0 = arith.constant 0 : i32
    %c0_i32_1 = arith.constant 0 : i32
    return %c0_i32, %c0_i32_0 : i32, i32
  }
  func.func @transform_14(%arg0: i32) -> (i32, i32) {
    %c0_i32 = arith.constant 0 : i32
    %c0_i32_0 = arith.constant 0 : i32
    %c0_i32_1 = arith.constant 0 : i32
    return %c0_i32, %c0_i32_0 : i32, i32
  }
  func.func @transform_15(%arg0: i32) -> (i32, i32) {
    %c0_i32 = arith.constant 0 : i32
    %c0_i32_0 = arith.constant 0 : i32
    %c0_i32_1 = arith.constant 0 : i32
    return %c0_i32, %c0_i32_0 : i32, i32
  }
  func.func @transform_16(%arg0: i32) -> (i32, i32) {
    %c0_i32 = arith.constant 0 : i32
    %c0_i32_0 = arith.constant 0 : i32
    %c0_i32_1 = arith.constant 0 : i32
    return %c0_i32, %c0_i32_0 : i32, i32
  }
  func.func @transform_17(%arg0: i32) -> (i32, i32) {
    %c0_i32 = arith.constant 0 : i32
    %c0_i32_0 = arith.constant 0 : i32
    %c0_i32_1 = arith.constant 0 : i32
    return %c0_i32, %c0_i32_0 : i32, i32
  }
  func.func @transform_18(%arg0: i32) -> (i32, i32) {
    %c0_i32 = arith.constant 0 : i32
    %c0_i32_0 = arith.constant 0 : i32
    %c0_i32_1 = arith.constant 0 : i32
    return %c0_i32, %c0_i32_0 : i32, i32
  }
  func.func @transform_19(%arg0: i32) -> (i32, i32) {
    %c0_i32 = arith.constant 0 : i32
    %c0_i32_0 = arith.constant 0 : i32
    %c0_i32_1 = arith.constant 0 : i32
    return %c0_i32, %c0_i32_0 : i32, i32
  }
  func.func @transform_20(%arg0: i32) -> (i32, i32) {
    %c0_i32 = arith.constant 0 : i32
    %c0_i32_0 = arith.constant 0 : i32
    %c0_i32_1 = arith.constant 0 : i32
    return %c0_i32, %c0_i32_0 : i32, i32
  }
  func.func @transform_21(%arg0: i32) -> (i32, i32) {
    %c0_i32 = arith.constant 0 : i32
    %c0_i32_0 = arith.constant 0 : i32
    %c0_i32_1 = arith.constant 0 : i32
    return %c0_i32, %c0_i32_0 : i32, i32
  }
  func.func @transform_22(%arg0: i32) -> (i32, i32) {
    %c0_i32 = arith.constant 0 : i32
    %c0_i32_0 = arith.constant 0 : i32
    %c0_i32_1 = arith.constant 0 : i32
    return %c0_i32, %c0_i32_0 : i32, i32
  }
  func.func @transform_23(%arg0: i32) -> (i32, i32) {
    %c0_i32 = arith.constant 0 : i32
    %c0_i32_0 = arith.constant 0 : i32
    %c0_i32_1 = arith.constant 0 : i32
    return %c0_i32, %c0_i32_0 : i32, i32
  }
  func.func @transform_24(%arg0: i32) -> (i32, i32) {
    %c0_i32 = arith.constant 0 : i32
    %c0_i32_0 = arith.constant 0 : i32
    %c0_i32_1 = arith.constant 0 : i32
    return %c0_i32, %c0_i32_0 : i32, i32
  }
  func.func @transform_25(%arg0: i32) -> (i32, i32) {
    %c0_i32 = arith.constant 0 : i32
    %c0_i32_0 = arith.constant 0 : i32
    %c0_i32_1 = arith.constant 0 : i32
    return %c0_i32, %c0_i32_0 : i32, i32
  }
  func.func @transform_26(%arg0: i32) -> (i32, i32) {
    %c0_i32 = arith.constant 0 : i32
    %c0_i32_0 = arith.constant 0 : i32
    %c0_i32_1 = arith.constant 0 : i32
    return %c0_i32, %c0_i32_0 : i32, i32
  }
  func.func @transform_27(%arg0: i32) -> (i32, i32) {
    %c0_i32 = arith.constant 0 : i32
    %c0_i32_0 = arith.constant 0 : i32
    %c0_i32_1 = arith.constant 0 : i32
    return %c0_i32, %c0_i32_0 : i32, i32
  }
  func.func @transform_28(%arg0: i32) -> (i32, i32) {
    %c0_i32 = arith.constant 0 : i32
    %c0_i32_0 = arith.constant 0 : i32
    %c0_i32_1 = arith.constant 0 : i32
    return %c0_i32, %c0_i32_0 : i32, i32
  }
  func.func @transform_29(%arg0: i32) -> (i32, i32) {
    %c0_i32 = arith.constant 0 : i32
    %c0_i32_0 = arith.constant 0 : i32
    return %arg0, %c0_i32 : i32, i32
  }
}

</mosaic_0001>

<bundles_post_ra>
// kernel: ae_forward.1
= control target key start
LH: loop header
LB: loop body
LE: loop exit
PB: predicated region body
PF: predicated region fallthrough
CT: control target
= control target key end

     0   :  { %s8116_s3 = smov 1   ;;  %s8117_s10 = smov 3   ;;  %vm8123_vm0 = vmmov 0   ;;  %s9193_s0 = inlined_call_operand.smem [shape: u32[30], index: -1, kind: input, shape index: {}] }
   0x1   :  { %s8156_s6 = sld [smem:[%s9193_s0 + %s8116_s3]]   ;;  %s8118_s14 = smov 5  }
   0x2   :  { %s8199_s9 = sld [smem:[%s9193_s0]]   ;;  %s8119_s18 = smov 2  }
   0x3   :  { %s8349_s13 = sld [smem:[%s9193_s0 + %s8117_s10]]   ;;  %s8121_s22 = smov 7  }
   0x4   :  { %s8482_s17 = sld [smem:[%s9193_s0 + %s8118_s14]]   ;;  %s8122_s26 = smov 4  }
   0x5   :  { %s6255_s21 = sld [smem:[%s9193_s0 + %s8119_s18]]   ;;  %s8124_s30 = smov 9  }
   0x6   :  { %s8565_s25 = sld [smem:[%s9193_s0 + %s8121_s22]]   ;;  %s8125_s4 = smov 6  }
   0x7   :  { %v7396_v0 = vld [vmem:[%s8156_s6 + $0x4] ss:$16 sps:$4 sm:$0xff]   ;;  %v7398_v1 = vld [vmem:[%s8156_s6 + $0xc] ss:$16 sps:$4 sm:$0xff]   ;;  %v7400_v2 = vld [vmem:[%s8156_s6] ss:$16 sps:$4 sm:$0xff]   ;;  %s6257_s29 = sld [smem:[%s9193_s0 + %s8122_s26]]  }
   0x8   :  { %1713 = vmatprep.subr.bf16.mxu0 %v7396_v0  ;;  %v7401_v3 = vld [vmem:[%s8156_s6 + $0x8] ss:$16 sps:$4 sm:$0xff]   ;;  %1877 = vmatprep.subr.bf16.mxu1 %v7398_v1  ;;  %v7402_v4 = vld [vmem:[%s8156_s6 + $0x24] ss:$16 sps:$4 sm:$0xff]   ;;  %v7404_v5 = vld [vmem:[%s8156_s6 + $0x2c] ss:$16 sps:$4 sm:$0xff]   ;;  %s8596_s3 = sld [smem:[%s9193_s0 + %s8124_s30]]  }
   0x9   :  { %1714 = vmatpush1.bf16.msra.mxu0 %v7400_v2  ;;  %1878 = vmatpush1.bf16.msra.mxu1 %v7401_v3  ;;  %v7406_v6 = vld [vmem:[%s8156_s6 + $0x20] ss:$16 sps:$4 sm:$0xff]   ;;  %v7407_v7 = vld [vmem:[%s8156_s6 + $0x28] ss:$16 sps:$4 sm:$0xff]   ;;  %v7408_v8 = vld [vmem:[%s8156_s6 + $0x44] ss:$16 sps:$4 sm:$0xff]   ;;  %s6259_s7 = sld [smem:[%s9193_s0 + %s8125_s4]]  }
   0xa   :  { %1715 = vmatprep.subr.bf16.mxu0 %v7402_v4  ;;  %1879 = vmatprep.subr.bf16.mxu1 %v7404_v5  ;;  %v7410_v9 = vld [vmem:[%s8156_s6 + $0x4c] ss:$16 sps:$4 sm:$0xff]   ;;  %v7412_v10 = vld [vmem:[%s8156_s6 + $0x40] ss:$16 sps:$4 sm:$0xff]   ;;  %v7413_v11 = vld [vmem:[%s8156_s6 + $0x48] ss:$16 sps:$4 sm:$0xff]  }
   0xb   :  { %v7414_v12 = vld [vmem:[%s8156_s6 + $0x64] ss:$16 sps:$4 sm:$0xff]   ;;  %v7416_v13 = vld [vmem:[%s8156_s6 + $0x6c] ss:$16 sps:$4 sm:$0xff]   ;;  %v7418_v14 = vld [vmem:[%s8156_s6 + $0x60] ss:$16 sps:$4 sm:$0xff]  }
   0xc   :  { %v7419_v15 = vld [vmem:[%s8156_s6 + $0x68] ss:$16 sps:$4 sm:$0xff]   ;;  %v7420_v16 = vld [vmem:[%s8156_s6 + $0x84] ss:$16 sps:$4 sm:$0xff]   ;;  %v7422_v17 = vld [vmem:[%s8156_s6 + $0x8c] ss:$16 sps:$4 sm:$0xff]  }
   0xd   :  { %1716 = vmatpush1.bf16.msra.mxu0 %v7406_v6  ;;  %1880 = vmatpush1.bf16.msra.mxu1 %v7407_v7  ;;  %v7424_v18 = vld [vmem:[%s8156_s6 + $0x80] ss:$16 sps:$4 sm:$0xff]   ;;  %v7425_v19 = vld [vmem:[%s8156_s6 + $0x88] ss:$16 sps:$4 sm:$0xff]   ;;  %v7426_v20 = vld [vmem:[%s8156_s6 + $0xa4] ss:$16 sps:$4 sm:$0xff]  }
   0xe   :  { %1717 = vmatprep.subr.bf16.mxu0 %v7408_v8  ;;  %1881 = vmatprep.subr.bf16.mxu1 %v7410_v9  ;;  %v7428_v21 = vld [vmem:[%s8156_s6 + $0xac] ss:$16 sps:$4 sm:$0xff]   ;;  %v7430_v22 = vld [vmem:[%s8156_s6 + $0xa0] ss:$16 sps:$4 sm:$0xff]   ;;  %v7431_v23 = vld [vmem:[%s8156_s6 + $0xa8] ss:$16 sps:$4 sm:$0xff]  }
   0xf   :  { %v7432_v24 = vld [vmem:[%s8156_s6 + $0xc4] ss:$16 sps:$4 sm:$0xff]   ;;  %v7434_v25 = vld [vmem:[%s8156_s6 + $0xcc] ss:$16 sps:$4 sm:$0xff]   ;;  %v7436_v26 = vld [vmem:[%s8156_s6 + $0xc0] ss:$16 sps:$4 sm:$0xff]  }
  0x10   :  { %v7437_v27 = vld [vmem:[%s8156_s6 + $0xc8] ss:$16 sps:$4 sm:$0xff]   ;;  %v7438_v28 = vld [vmem:[%s8156_s6 + $0xe4] ss:$16 sps:$4 sm:$0xff]   ;;  %v7440_v29 = vld [vmem:[%s8156_s6 + $0xec] ss:$16 sps:$4 sm:$0xff]  }
  0x11   :  { %1718 = vmatpush1.bf16.msra.mxu0 %v7412_v10  ;;  %1882 = vmatpush1.bf16.msra.mxu1 %v7413_v11  ;;  %v7442_v30 = vld [vmem:[%s8156_s6 + $0xe0] ss:$16 sps:$4 sm:$0xff]   ;;  %v7443_v31 = vld [vmem:[%s8156_s6 + $0xe8] ss:$16 sps:$4 sm:$0xff]   ;;  %v7444_v32 = vld [vmem:[%s8156_s6 + $0x104] ss:$16 sps:$4 sm:$0xff]  }
  0x12   :  { %1719 = vmatprep.subr.bf16.mxu0 %v7414_v12  ;;  %1883 = vmatprep.subr.bf16.mxu1 %v7416_v13  ;;  %v7446_v33 = vld [vmem:[%s8156_s6 + $0x10c] ss:$16 sps:$4 sm:$0xff]   ;;  %v7448_v34 = vld [vmem:[%s8156_s6 + $0x100] ss:$16 sps:$4 sm:$0xff]   ;;  %v7449_v35 = vld [vmem:[%s8156_s6 + $0x108] ss:$16 sps:$4 sm:$0xff]  }
  0x13   :  { %v7450_v36 = vld [vmem:[%s8156_s6 + $0x124] ss:$16 sps:$4 sm:$0xff]   ;;  %v7452_v37 = vld [vmem:[%s8156_s6 + $0x12c] ss:$16 sps:$4 sm:$0xff]   ;;  %v7454_v38 = vld [vmem:[%s8156_s6 + $0x120] ss:$16 sps:$4 sm:$0xff]  }
  0x14   :  { %v7455_v39 = vld [vmem:[%s8156_s6 + $0x128] ss:$16 sps:$4 sm:$0xff]   ;;  %v7456_v40 = vld [vmem:[%s8156_s6 + $0x144] ss:$16 sps:$4 sm:$0xff]   ;;  %v7458_v41 = vld [vmem:[%s8156_s6 + $0x14c] ss:$16 sps:$4 sm:$0xff]  }
  0x15   :  { %1720 = vmatpush1.bf16.msra.mxu0 %v7418_v14  ;;  %1884 = vmatpush1.bf16.msra.mxu1 %v7419_v15  ;;  %v7460_v42 = vld [vmem:[%s8156_s6 + $0x140] ss:$16 sps:$4 sm:$0xff]   ;;  %v7461_v43 = vld [vmem:[%s8156_s6 + $0x148] ss:$16 sps:$4 sm:$0xff]   ;;  %v7462_v44 = vld [vmem:[%s8156_s6 + $0x164] ss:$16 sps:$4 sm:$0xff]  }
  0x16   :  { %1721 = vmatprep.subr.bf16.mxu0 %v7420_v16  ;;  %1885 = vmatprep.subr.bf16.mxu1 %v7422_v17  ;;  %v7464_v45 = vld [vmem:[%s8156_s6 + $0x16c] ss:$16 sps:$4 sm:$0xff]   ;;  %v123_v46 = vld [vmem:[%s8199_s9] sm:$0xff]  ;;  %v7467_v49 = vld [vmem:[%s8156_s6 + $0x168] ss:$16 sps:$4 sm:$0xff]   ;;  %s8126_s8 = smov 11  }
  0x17   :  { %v7466_v47 = vld [vmem:[%s8156_s6 + $0x160] ss:$16 sps:$4 sm:$0xff]   ;;  %v6284_v48 = vcombine.high %v123_v46, %v123_v46  ;;  %v7468_v50 = vld [vmem:[%s8156_s6 + $0x184] ss:$16 sps:$4 sm:$0xff]   ;;  %v7470_v51 = vld [vmem:[%s8156_s6 + $0x18c] ss:$16 sps:$4 sm:$0xff]   ;;  %v6283_v4 = vcombine.low %v123_v46, %v123_v46  ;;  %s8622_s11 = sld [smem:[%s9193_s0 + %s8126_s8]]  }
  0x18   :  { %v7472_v52 = vld [vmem:[%s8156_s6 + $0x180] ss:$16 sps:$4 sm:$0xff]   ;;  %v7473_v53 = vld [vmem:[%s8156_s6 + $0x188] ss:$16 sps:$4 sm:$0xff]   ;;  %v7474_v54 = vld [vmem:[%s8156_s6 + $0x1a4] ss:$16 sps:$4 sm:$0xff]  }
  0x19   :  { %1722 = vmatpush1.bf16.msra.mxu0 %v7424_v18  ;;  %1886 = vmatpush1.bf16.msra.mxu1 %v7425_v19  ;;  %v7476_v55 = vld [vmem:[%s8156_s6 + $0x1ac] ss:$16 sps:$4 sm:$0xff]   ;;  %v7478_v56 = vld [vmem:[%s8156_s6 + $0x1a0] ss:$16 sps:$4 sm:$0xff]   ;;  %v7479_v57 = vld [vmem:[%s8156_s6 + $0x1a8] ss:$16 sps:$4 sm:$0xff]  }
  0x1a   :  { %1723 = vmatprep.subr.bf16.mxu0 %v7426_v20  ;;  %1887 = vmatprep.subr.bf16.mxu1 %v7428_v21  ;;  %v7480_v58 = vld [vmem:[%s8156_s6 + $0x1c4] ss:$16 sps:$4 sm:$0xff]   ;;  %v7482_v59 = vld [vmem:[%s8156_s6 + $0x1cc] ss:$16 sps:$4 sm:$0xff]   ;;  %v7484_v60 = vld [vmem:[%s8156_s6 + $0x1c0] ss:$16 sps:$4 sm:$0xff]  }
  0x1b   :  { %1745 = vmatprep.mubr.bf16.mxu0 %v6284_v48  ;;  %1909 = vmatprep.mubr.bf16.mxu1 %v6284_v48  ;;  %v7485_v61 = vld [vmem:[%s8156_s6 + $0x1c8] ss:$16 sps:$4 sm:$0xff]   ;;  %v7486_v62 = vld [vmem:[%s8156_s6 + $0x1e4] ss:$16 sps:$4 sm:$0xff]   ;;  %v7488_v63 = vld [vmem:[%s8156_s6 + $0x1ec] ss:$16 sps:$4 sm:$0xff]  }
  0x1c   :  { %v7490_v0 = vld [vmem:[%s8156_s6 + $0x1e0] ss:$16 sps:$4 sm:$0xff]   ;;  %v7491_v1 = vld [vmem:[%s8156_s6 + $0x1e8] ss:$16 sps:$4 sm:$0xff]   ;;  %v7496_v2 = vld [vmem:[%s8156_s6 + $0x204] ss:$16 sps:$4 sm:$0xff]  }
  0x1d   :  { %1724 = vmatpush1.bf16.msra.mxu0 %v7430_v22  ;;  %1888 = vmatpush1.bf16.msra.mxu1 %v7431_v23  ;;  %v7499_v3 = vld [vmem:[%s8156_s6 + $0x20c] ss:$16 sps:$4 sm:$0xff]   ;;  %v7494_v5 = vld [vmem:[%s8156_s6 + $0x200] ss:$16 sps:$4 sm:$0xff]   ;;  %v7497_v6 = vld [vmem:[%s8156_s6 + $0x208] ss:$16 sps:$4 sm:$0xff]  }
  0x1e   :  { %1725 = vmatprep.subr.bf16.mxu0 %v7432_v24  ;;  %1889 = vmatprep.subr.bf16.mxu1 %v7434_v25  ;;  %v7502_v7 = vld [vmem:[%s8156_s6 + $0x224] ss:$16 sps:$4 sm:$0xff]   ;;  %v7505_v8 = vld [vmem:[%s8156_s6 + $0x22c] ss:$16 sps:$4 sm:$0xff]   ;;  %v7500_v9 = vld [vmem:[%s8156_s6 + $0x220] ss:$16 sps:$4 sm:$0xff]  }
  0x1f   :  { %v7503_v10 = vld [vmem:[%s8156_s6 + $0x228] ss:$16 sps:$4 sm:$0xff]   ;;  %v7508_v11 = vld [vmem:[%s8156_s6 + $0x244] ss:$16 sps:$4 sm:$0xff]   ;;  %v7511_v12 = vld [vmem:[%s8156_s6 + $0x24c] ss:$16 sps:$4 sm:$0xff]  }
  0x20   :  { %v7506_v13 = vld [vmem:[%s8156_s6 + $0x240] ss:$16 sps:$4 sm:$0xff]   ;;  %v7509_v14 = vld [vmem:[%s8156_s6 + $0x248] ss:$16 sps:$4 sm:$0xff]   ;;  %v7514_v15 = vld [vmem:[%s8156_s6 + $0x264] ss:$16 sps:$4 sm:$0xff]  }
  0x21   :  { %1726 = vmatpush1.bf16.msra.mxu0 %v7436_v26  ;;  %1890 = vmatpush1.bf16.msra.mxu1 %v7437_v27  ;;  %v7517_v16 = vld [vmem:[%s8156_s6 + $0x26c] ss:$16 sps:$4 sm:$0xff]   ;;  %v7512_v17 = vld [vmem:[%s8156_s6 + $0x260] ss:$16 sps:$4 sm:$0xff]   ;;  %v7515_v18 = vld [vmem:[%s8156_s6 + $0x268] ss:$16 sps:$4 sm:$0xff]  }
  0x22   :  { %1727 = vmatprep.subr.bf16.mxu0 %v7438_v28  ;;  %1891 = vmatprep.subr.bf16.mxu1 %v7440_v29  ;;  %v7520_v19 = vld [vmem:[%s8156_s6 + $0x284] ss:$16 sps:$4 sm:$0xff]   ;;  %v7523_v20 = vld [vmem:[%s8156_s6 + $0x28c] ss:$16 sps:$4 sm:$0xff]   ;;  %v7518_v21 = vld [vmem:[%s8156_s6 + $0x280] ss:$16 sps:$4 sm:$0xff]  }
  0x23   :  { %v7521_v22 = vld [vmem:[%s8156_s6 + $0x288] ss:$16 sps:$4 sm:$0xff]   ;;  %v7526_v23 = vld [vmem:[%s8156_s6 + $0x2a4] ss:$16 sps:$4 sm:$0xff]   ;;  %v7529_v24 = vld [vmem:[%s8156_s6 + $0x2ac] ss:$16 sps:$4 sm:$0xff]  }
  0x24   :  { %v7524_v25 = vld [vmem:[%s8156_s6 + $0x2a0] ss:$16 sps:$4 sm:$0xff]   ;;  %v7527_v26 = vld [vmem:[%s8156_s6 + $0x2a8] ss:$16 sps:$4 sm:$0xff]   ;;  %v7532_v27 = vld [vmem:[%s8156_s6 + $0x2c4] ss:$16 sps:$4 sm:$0xff]  }
  0x25   :  { %1728 = vmatpush1.bf16.msra.mxu0 %v7442_v30  ;;  %1892 = vmatpush1.bf16.msra.mxu1 %v7443_v31  ;;  %v7535_v28 = vld [vmem:[%s8156_s6 + $0x2cc] ss:$16 sps:$4 sm:$0xff]   ;;  %v7530_v31 = vld [vmem:[%s8156_s6 + $0x2c0] ss:$16 sps:$4 sm:$0xff]   ;;  %v7557_v48 = vld [vmem:[%s8156_s6 + $0x348] ss:$16 sps:$4 sm:$0xff]  }
  0x26   :  { %1729 = vmatprep.subr.bf16.mxu0 %v7444_v32  ;;  %1893 = vmatprep.subr.bf16.mxu1 %v7446_v33  ;;  %v8255_v29 = vld [vmem:[%s8199_s9 + $0x8] sm:$0xff]  ;;  %v7538_v33 = vld [vmem:[%s8156_s6 + $0x2e4] ss:$16 sps:$4 sm:$0xff]   ;;  %s8127_s12 = smov 8   ;;  %s8128_s16 = smov 13  }
  0x27   :  { %v6286_v30 = vcombine.high %v8255_v29, %v8255_v29  ;;  %v7533_v32 = vld [vmem:[%s8156_s6 + $0x2c8] ss:$16 sps:$4 sm:$0xff]   ;;  %v7559_v46 = vld [vmem:[%s8156_s6 + $0x34c] ss:$16 sps:$4 sm:$0xff]   ;;  %s6261_s15 = sld [smem:[%s9193_s0 + %s8127_s12]]   ;;  %s8129_s20 = smov 10  }
  0x28   :  { %s8648_s19 = sld [smem:[%s9193_s0 + %s8128_s16]]   ;;  %s8130_s24 = smov 15  }
  0x29   :  { %1730 = vmatpush1.bf16.msra.mxu0 %v7448_v34  ;;  %1894 = vmatpush1.bf16.msra.mxu1 %v7449_v35  ;;  %v7541_v34 = vld [vmem:[%s8156_s6 + $0x2ec] ss:$16 sps:$4 sm:$0xff]   ;;  %v7536_v35 = vld [vmem:[%s8156_s6 + $0x2e0] ss:$16 sps:$4 sm:$0xff]   ;;  %s6263_s23 = sld [smem:[%s9193_s0 + %s8129_s20]]   ;;  %s8131_s28 = smov 12  }
  0x2a   :  { %1731 = vmatprep.subr.bf16.mxu0 %v7450_v36  ;;  %1895 = vmatprep.subr.bf16.mxu1 %v7452_v37  ;;  %v7539_v36 = vld [vmem:[%s8156_s6 + $0x2e8] ss:$16 sps:$4 sm:$0xff]   ;;  %v7544_v37 = vld [vmem:[%s8156_s6 + $0x304] ss:$16 sps:$4 sm:$0xff]   ;;  %s8674_s27 = sld [smem:[%s9193_s0 + %s8130_s24]]   ;;  %s8132_s2 = smov 17  }
  0x2b   :  { %s6265_s1 = sld [smem:[%s9193_s0 + %s8131_s28]]   ;;  %s8134_s10 = smov 19  }
  0x2c   :  { %s8700_s5 = sld [smem:[%s9193_s0 + %s8132_s2]]   ;;  %s8135_s14 = smov 16  }
  0x2d   :  { %1732 = vmatpush1.bf16.msra.mxu0 %v7454_v38  ;;  %1896 = vmatpush1.bf16.msra.mxu1 %v7455_v39  ;;  %v7547_v38 = vld [vmem:[%s8156_s6 + $0x30c] ss:$16 sps:$4 sm:$0xff]   ;;  %v7542_v39 = vld [vmem:[%s8156_s6 + $0x300] ss:$16 sps:$4 sm:$0xff]   ;;  %s8136_s18 = smov 21   ;;  %s8137_s22 = smov 18  }
  0x2e   :  { %1733 = vmatprep.subr.bf16.mxu0 %v7456_v40  ;;  %1897 = vmatprep.subr.bf16.mxu1 %v7458_v41  ;;  %v7545_v40 = vld [vmem:[%s8156_s6 + $0x308] ss:$16 sps:$4 sm:$0xff]   ;;  %v7550_v41 = vld [vmem:[%s8156_s6 + $0x324] ss:$16 sps:$4 sm:$0xff]   ;;  %s8138_s26 = smov 23   ;;  %s8139_s30 = smov 20  }
  0x2f   :  { %s8141_s4 = smov 25   ;;  %s8142_s8 = smov 22  }
  0x30   :  { %s8143_s12 = smov 27   ;;  %s8144_s16 = smov 24  }
  0x31   :  { %1734 = vmatpush1.bf16.msra.mxu0 %v7460_v42  ;;  %1898 = vmatpush1.bf16.msra.mxu1 %v7461_v43  ;;  %v7553_v42 = vld [vmem:[%s8156_s6 + $0x32c] ss:$16 sps:$4 sm:$0xff]   ;;  %v7548_v43 = vld [vmem:[%s8156_s6 + $0x320] ss:$16 sps:$4 sm:$0xff]   ;;  %s8145_s20 = smov 26   ;;  %s8146_s24 = smov 28  }
  0x32   :  { %1735 = vmatprep.subr.bf16.mxu0 %v7462_v44  ;;  %1899 = vmatprep.subr.bf16.mxu1 %v7464_v45  ;;  %v7551_v44 = vld [vmem:[%s8156_s6 + $0x328] ss:$16 sps:$4 sm:$0xff]   ;;  %v7556_v45 = vld [vmem:[%s8156_s6 + $0x344] ss:$16 sps:$4 sm:$0xff]   ;;  %s8147_s28 = smov 29  }
  0x35   :  { %1736 = vmatpush1.bf16.msra.mxu0 %v7466_v47  ;;  %1900 = vmatpush1.bf16.msra.mxu1 %v7467_v49  ;;  %v7554_v47 = vld [vmem:[%s8156_s6 + $0x340] ss:$16 sps:$4 sm:$0xff]   ;;  %v7562_v49 = vld [vmem:[%s8156_s6 + $0x364] ss:$16 sps:$4 sm:$0xff]  }
  0x36   :  { %1737 = vmatprep.subr.bf16.mxu0 %v7468_v50  ;;  %1901 = vmatprep.subr.bf16.mxu1 %v7470_v51  ;;  %v7565_v50 = vld [vmem:[%s8156_s6 + $0x36c] ss:$16 sps:$4 sm:$0xff]   ;;  %v7560_v51 = vld [vmem:[%s8156_s6 + $0x360] ss:$16 sps:$4 sm:$0xff]  }
  0x39   :  { %1738 = vmatpush1.bf16.msra.mxu0 %v7472_v52  ;;  %1902 = vmatpush1.bf16.msra.mxu1 %v7473_v53  ;;  %v7563_v52 = vld [vmem:[%s8156_s6 + $0x368] ss:$16 sps:$4 sm:$0xff]   ;;  %v7568_v53 = vld [vmem:[%s8156_s6 + $0x384] ss:$16 sps:$4 sm:$0xff]  }
  0x3a   :  { %1739 = vmatprep.subr.bf16.mxu0 %v7474_v54  ;;  %1903 = vmatprep.subr.bf16.mxu1 %v7476_v55  ;;  %v7571_v54 = vld [vmem:[%s8156_s6 + $0x38c] ss:$16 sps:$4 sm:$0xff]   ;;  %v7566_v55 = vld [vmem:[%s8156_s6 + $0x380] ss:$16 sps:$4 sm:$0xff]  }
  0x3d   :  { %1740 = vmatpush1.bf16.msra.mxu0 %v7478_v56  ;;  %1904 = vmatpush1.bf16.msra.mxu1 %v7479_v57  ;;  %v7569_v56 = vld [vmem:[%s8156_s6 + $0x388] ss:$16 sps:$4 sm:$0xff]   ;;  %v7574_v57 = vld [vmem:[%s8156_s6 + $0x3a4] ss:$16 sps:$4 sm:$0xff]  }
  0x3e   :  { %1741 = vmatprep.subr.bf16.mxu0 %v7480_v58  ;;  %1905 = vmatprep.subr.bf16.mxu1 %v7482_v59  ;;  %v7577_v58 = vld [vmem:[%s8156_s6 + $0x3ac] ss:$16 sps:$4 sm:$0xff]   ;;  %v7572_v59 = vld [vmem:[%s8156_s6 + $0x3a0] ss:$16 sps:$4 sm:$0xff]  }
  0x41   :  { %1742 = vmatpush1.bf16.msra.mxu0 %v7484_v60  ;;  %1906 = vmatpush1.bf16.msra.mxu1 %v7485_v61  ;;  %v7575_v60 = vld [vmem:[%s8156_s6 + $0x3a8] ss:$16 sps:$4 sm:$0xff]   ;;  %v7580_v61 = vld [vmem:[%s8156_s6 + $0x3c4] ss:$16 sps:$4 sm:$0xff]  }
  0x42   :  { %1743 = vmatprep.subr.bf16.mxu0 %v7486_v62  ;;  %1907 = vmatprep.subr.bf16.mxu1 %v7488_v63  ;;  %v7583_v62 = vld [vmem:[%s8156_s6 + $0x3cc] ss:$16 sps:$4 sm:$0xff]   ;;  %v7578_v63 = vld [vmem:[%s8156_s6 + $0x3c0] ss:$16 sps:$4 sm:$0xff]  }
  0x45   :  { %1744 = vmatpush1.bf16.msra.mxu0 %v7490_v0  ;;  %1908 = vmatpush1.bf16.msra.mxu1 %v7491_v1  ;;  %v7581_v0 = vld [vmem:[%s8156_s6 + $0x3c8] ss:$16 sps:$4 sm:$0xff]   ;;  %v7586_v1 = vld [vmem:[%s8156_s6 + $0x3e4] ss:$16 sps:$4 sm:$0xff]  }
  0x46   :  { %1754 = vmatprep.subr.bf16.mxu0 %v7496_v2  ;;  %1918 = vmatprep.subr.bf16.mxu1 %v7499_v3  ;;  %v7589_v2 = vld [vmem:[%s8156_s6 + $0x3ec] ss:$16 sps:$4 sm:$0xff]   ;;  %v7584_v3 = vld [vmem:[%s8156_s6 + $0x3e0] ss:$16 sps:$4 sm:$0xff]  }
  0x48   :  { %1746 = vmatmul.mubr.bf16.vlgmr.msra.gmra.mrb[0].mxu0 %v6283_v4  ;;  %1910 = vmatmul.mubr.bf16.vlgmr.msra.gmra.mrb[0].mxu1 %v6283_v4  ;;  %v7587_v4 = vld [vmem:[%s8156_s6 + $0x3e8] ss:$16 sps:$4 sm:$0xff]  }
  0x49   :  { %1755 = vmatpush1.bf16.msra.mxu0 %v7494_v5  ;;  %1919 = vmatpush1.bf16.msra.mxu1 %v7497_v6  ;;  %v7594_v5 = vld [vmem:[%s8156_s6 + $0x404] ss:$16 sps:$4 sm:$0xff]   ;;  %v7597_v6 = vld [vmem:[%s8156_s6 + $0x40c] ss:$16 sps:$4 sm:$0xff]  }
  0x4a   :  { %1756 = vmatprep.subr.bf16.mxu0 %v7502_v7  ;;  %1920 = vmatprep.subr.bf16.mxu1 %v7505_v8  ;;  %v6285_v7 = vcombine.low %v8255_v29, %v8255_v29  ;;  %v7592_v8 = vld [vmem:[%s8156_s6 + $0x400] ss:$16 sps:$4 sm:$0xff]   ;;  %v7627_v29 = vld [vmem:[%s8156_s6 + $0x4ac] ss:$16 sps:$4 sm:$0xff]  }
  0x4b   :  { %1786 = vmatprep.mubr.bf16.mxu0 %v6286_v30  ;;  %1950 = vmatprep.mubr.bf16.mxu1 %v6286_v30  ;;  %v7622_v30 = vld [vmem:[%s8156_s6 + $0x4a0] ss:$16 sps:$4 sm:$0xff]  }
  0x4d   :  { %1757 = vmatpush1.bf16.msra.mxu0 %v7500_v9  ;;  %1921 = vmatpush1.bf16.msra.mxu1 %v7503_v10  ;;  %v7595_v9 = vld [vmem:[%s8156_s6 + $0x408] ss:$16 sps:$4 sm:$0xff]   ;;  %v7600_v10 = vld [vmem:[%s8156_s6 + $0x424] ss:$16 sps:$4 sm:$0xff]  }
  0x4e   :  { %1758 = vmatprep.subr.bf16.mxu0 %v7508_v11  ;;  %1922 = vmatprep.subr.bf16.mxu1 %v7511_v12  ;;  %v8305_v11 = vld [vmem:[%s8199_s9 + $0x10] sm:$0xff]  ;;  %v7603_v12 = vld [vmem:[%s8156_s6 + $0x42c] ss:$16 sps:$4 sm:$0xff]  }
  0x51   :  { %1759 = vmatpush1.bf16.msra.mxu0 %v7506_v13  ;;  %1923 = vmatpush1.bf16.msra.mxu1 %v7509_v14  ;;  %v6288_v13 = vcombine.high %v8305_v11, %v8305_v11  ;;  %v7598_v14 = vld [vmem:[%s8156_s6 + $0x420] ss:$16 sps:$4 sm:$0xff]  }
  0x52   :  { %1760 = vmatprep.subr.bf16.mxu0 %v7514_v15  ;;  %1924 = vmatprep.subr.bf16.mxu1 %v7517_v16  ;;  %v7601_v15 = vld [vmem:[%s8156_s6 + $0x428] ss:$16 sps:$4 sm:$0xff]   ;;  %v7606_v16 = vld [vmem:[%s8156_s6 + $0x444] ss:$16 sps:$4 sm:$0xff]  }
  0x55   :  { %1761 = vmatpush1.bf16.msra.mxu0 %v7512_v17  ;;  %1925 = vmatpush1.bf16.msra.mxu1 %v7515_v18  ;;  %v7609_v17 = vld [vmem:[%s8156_s6 + $0x44c] ss:$16 sps:$4 sm:$0xff]   ;;  %v7604_v18 = vld [vmem:[%s8156_s6 + $0x440] ss:$16 sps:$4 sm:$0xff]  }
  0x56   :  { %1762 = vmatprep.subr.bf16.mxu0 %v7520_v19  ;;  %1926 = vmatprep.subr.bf16.mxu1 %v7523_v20  ;;  %v7607_v19 = vld [vmem:[%s8156_s6 + $0x448] ss:$16 sps:$4 sm:$0xff]   ;;  %v7612_v20 = vld [vmem:[%s8156_s6 + $0x464] ss:$16 sps:$4 sm:$0xff]  }
  0x59   :  { %1763 = vmatpush1.bf16.msra.mxu0 %v7518_v21  ;;  %1927 = vmatpush1.bf16.msra.mxu1 %v7521_v22  ;;  %v7615_v21 = vld [vmem:[%s8156_s6 + $0x46c] ss:$16 sps:$4 sm:$0xff]   ;;  %v7610_v22 = vld [vmem:[%s8156_s6 + $0x460] ss:$16 sps:$4 sm:$0xff]  }
  0x5a   :  { %1764 = vmatprep.subr.bf16.mxu0 %v7526_v23  ;;  %1928 = vmatprep.subr.bf16.mxu1 %v7529_v24  ;;  %v7613_v23 = vld [vmem:[%s8156_s6 + $0x468] ss:$16 sps:$4 sm:$0xff]   ;;  %v7618_v24 = vld [vmem:[%s8156_s6 + $0x484] ss:$16 sps:$4 sm:$0xff]  }
  0x5d   :  { %1765 = vmatpush1.bf16.msra.mxu0 %v7524_v25  ;;  %1929 = vmatpush1.bf16.msra.mxu1 %v7527_v26  ;;  %v7621_v25 = vld [vmem:[%s8156_s6 + $0x48c] ss:$16 sps:$4 sm:$0xff]   ;;  %v7616_v26 = vld [vmem:[%s8156_s6 + $0x480] ss:$16 sps:$4 sm:$0xff]  }
  0x5e   :  { %1766 = vmatprep.subr.bf16.mxu0 %v7532_v27  ;;  %1930 = vmatprep.subr.bf16.mxu1 %v7535_v28  ;;  %v7619_v27 = vld [vmem:[%s8156_s6 + $0x488] ss:$16 sps:$4 sm:$0xff]   ;;  %v7624_v28 = vld [vmem:[%s8156_s6 + $0x4a4] ss:$16 sps:$4 sm:$0xff]  }
  0x61   :  { %1767 = vmatpush1.bf16.msra.mxu0 %v7530_v31  ;;  %1931 = vmatpush1.bf16.msra.mxu1 %v7533_v32  ;;  %v7625_v31 = vld [vmem:[%s8156_s6 + $0x4a8] ss:$16 sps:$4 sm:$0xff]   ;;  %v7630_v32 = vld [vmem:[%s8156_s6 + $0x4c4] ss:$16 sps:$4 sm:$0xff]  }
  0x62   :  { %1768 = vmatprep.subr.bf16.mxu0 %v7538_v33  ;;  %1932 = vmatprep.subr.bf16.mxu1 %v7541_v34  ;;  %v7633_v33 = vld [vmem:[%s8156_s6 + $0x4cc] ss:$16 sps:$4 sm:$0xff]   ;;  %v7628_v34 = vld [vmem:[%s8156_s6 + $0x4c0] ss:$16 sps:$4 sm:$0xff]  }
  0x65   :  { %1769 = vmatpush1.bf16.msra.mxu0 %v7536_v35  ;;  %1933 = vmatpush1.bf16.msra.mxu1 %v7539_v36  ;;  %v7631_v35 = vld [vmem:[%s8156_s6 + $0x4c8] ss:$16 sps:$4 sm:$0xff]   ;;  %v7636_v36 = vld [vmem:[%s8156_s6 + $0x4e4] ss:$16 sps:$4 sm:$0xff]  }
  0x66   :  { %1770 = vmatprep.subr.bf16.mxu0 %v7544_v37  ;;  %1934 = vmatprep.subr.bf16.mxu1 %v7547_v38  ;;  %v7639_v37 = vld [vmem:[%s8156_s6 + $0x4ec] ss:$16 sps:$4 sm:$0xff]   ;;  %v7634_v38 = vld [vmem:[%s8156_s6 + $0x4e0] ss:$16 sps:$4 sm:$0xff]  }
  0x69   :  { %1771 = vmatpush1.bf16.msra.mxu0 %v7542_v39  ;;  %1935 = vmatpush1.bf16.msra.mxu1 %v7545_v40  ;;  %v7637_v39 = vld [vmem:[%s8156_s6 + $0x4e8] ss:$16 sps:$4 sm:$0xff]   ;;  %v7642_v40 = vld [vmem:[%s8156_s6 + $0x504] ss:$16 sps:$4 sm:$0xff]  }
  0x6a   :  { %1772 = vmatprep.subr.bf16.mxu0 %v7550_v41  ;;  %1936 = vmatprep.subr.bf16.mxu1 %v7553_v42  ;;  %v7645_v41 = vld [vmem:[%s8156_s6 + $0x50c] ss:$16 sps:$4 sm:$0xff]   ;;  %v7640_v42 = vld [vmem:[%s8156_s6 + $0x500] ss:$16 sps:$4 sm:$0xff]  }
  0x6d   :  { %1773 = vmatpush1.bf16.msra.mxu0 %v7548_v43  ;;  %1937 = vmatpush1.bf16.msra.mxu1 %v7551_v44  ;;  %v7643_v43 = vld [vmem:[%s8156_s6 + $0x508] ss:$16 sps:$4 sm:$0xff]   ;;  %v7648_v44 = vld [vmem:[%s8156_s6 + $0x524] ss:$16 sps:$4 sm:$0xff]  }
  0x6e   :  { %1774 = vmatprep.subr.bf16.mxu0 %v7556_v45  ;;  %1938 = vmatprep.subr.bf16.mxu1 %v7559_v46  ;;  %v7651_v45 = vld [vmem:[%s8156_s6 + $0x52c] ss:$16 sps:$4 sm:$0xff]   ;;  %v7646_v46 = vld [vmem:[%s8156_s6 + $0x520] ss:$16 sps:$4 sm:$0xff]  }
  0x71   :  { %1775 = vmatpush1.bf16.msra.mxu0 %v7554_v47  ;;  %1939 = vmatpush1.bf16.msra.mxu1 %v7557_v48  ;;  %v7649_v47 = vld [vmem:[%s8156_s6 + $0x528] ss:$16 sps:$4 sm:$0xff]   ;;  %v7654_v48 = vld [vmem:[%s8156_s6 + $0x544] ss:$16 sps:$4 sm:$0xff]  }
  0x72   :  { %1776 = vmatprep.subr.bf16.mxu0 %v7562_v49  ;;  %1940 = vmatprep.subr.bf16.mxu1 %v7565_v50  ;;  %v7657_v49 = vld [vmem:[%s8156_s6 + $0x54c] ss:$16 sps:$4 sm:$0xff]   ;;  %v7652_v50 = vld [vmem:[%s8156_s6 + $0x540] ss:$16 sps:$4 sm:$0xff]  }
  0x75   :  { %1777 = vmatpush1.bf16.msra.mxu0 %v7560_v51  ;;  %1941 = vmatpush1.bf16.msra.mxu1 %v7563_v52  ;;  %v7655_v51 = vld [vmem:[%s8156_s6 + $0x548] ss:$16 sps:$4 sm:$0xff]   ;;  %v7660_v52 = vld [vmem:[%s8156_s6 + $0x564] ss:$16 sps:$4 sm:$0xff]  }
  0x76   :  { %1778 = vmatprep.subr.bf16.mxu0 %v7568_v53  ;;  %1942 = vmatprep.subr.bf16.mxu1 %v7571_v54  ;;  %v7663_v53 = vld [vmem:[%s8156_s6 + $0x56c] ss:$16 sps:$4 sm:$0xff]   ;;  %v7658_v54 = vld [vmem:[%s8156_s6 + $0x560] ss:$16 sps:$4 sm:$0xff]  }
  0x79   :  { %1779 = vmatpush1.bf16.msra.mxu0 %v7566_v55  ;;  %1943 = vmatpush1.bf16.msra.mxu1 %v7569_v56  ;;  %v7661_v55 = vld [vmem:[%s8156_s6 + $0x568] ss:$16 sps:$4 sm:$0xff]   ;;  %v7666_v56 = vld [vmem:[%s8156_s6 + $0x584] ss:$16 sps:$4 sm:$0xff]  }
  0x7a   :  { %1780 = vmatprep.subr.bf16.mxu0 %v7574_v57  ;;  %1944 = vmatprep.subr.bf16.mxu1 %v7577_v58  ;;  %v7669_v57 = vld [vmem:[%s8156_s6 + $0x58c] ss:$16 sps:$4 sm:$0xff]   ;;  %v7664_v58 = vld [vmem:[%s8156_s6 + $0x580] ss:$16 sps:$4 sm:$0xff]  }
  0x7d   :  { %1781 = vmatpush1.bf16.msra.mxu0 %v7572_v59  ;;  %1945 = vmatpush1.bf16.msra.mxu1 %v7575_v60  ;;  %v7667_v59 = vld [vmem:[%s8156_s6 + $0x588] ss:$16 sps:$4 sm:$0xff]   ;;  %v7672_v60 = vld [vmem:[%s8156_s6 + $0x5a4] ss:$16 sps:$4 sm:$0xff]  }
  0x7e   :  { %1782 = vmatprep.subr.bf16.mxu0 %v7580_v61  ;;  %1946 = vmatprep.subr.bf16.mxu1 %v7583_v62  ;;  %v7675_v61 = vld [vmem:[%s8156_s6 + $0x5ac] ss:$16 sps:$4 sm:$0xff]   ;;  %v7670_v62 = vld [vmem:[%s8156_s6 + $0x5a0] ss:$16 sps:$4 sm:$0xff]  }
  0x81   :  { %1783 = vmatpush1.bf16.msra.mxu0 %v7578_v63  ;;  %1947 = vmatpush1.bf16.msra.mxu1 %v7581_v0  ;;  %v7673_v63 = vld [vmem:[%s8156_s6 + $0x5a8] ss:$16 sps:$4 sm:$0xff]   ;;  %v7678_v0 = vld [vmem:[%s8156_s6 + $0x5c4] ss:$16 sps:$4 sm:$0xff]  }
  0x82   :  { %1784 = vmatprep.subr.bf16.mxu0 %v7586_v1  ;;  %1948 = vmatprep.subr.bf16.mxu1 %v7589_v2  ;;  %v7681_v1 = vld [vmem:[%s8156_s6 + $0x5cc] ss:$16 sps:$4 sm:$0xff]   ;;  %v7676_v2 = vld [vmem:[%s8156_s6 + $0x5c0] ss:$16 sps:$4 sm:$0xff]  }
  0x85   :  { %1785 = vmatpush1.bf16.msra.mxu0 %v7584_v3  ;;  %1949 = vmatpush1.bf16.msra.mxu1 %v7587_v4  ;;  %v7679_v3 = vld [vmem:[%s8156_s6 + $0x5c8] ss:$16 sps:$4 sm:$0xff]   ;;  %v7684_v4 = vld [vmem:[%s8156_s6 + $0x5e4] ss:$16 sps:$4 sm:$0xff]  }
  0x86   :  { %1795 = vmatprep.subr.bf16.mxu0 %v7594_v5  ;;  %1959 = vmatprep.subr.bf16.mxu1 %v7597_v6  ;;  %v7687_v5 = vld [vmem:[%s8156_s6 + $0x5ec] ss:$16 sps:$4 sm:$0xff]   ;;  %v7682_v6 = vld [vmem:[%s8156_s6 + $0x5e0] ss:$16 sps:$4 sm:$0xff]  }
  0x88   :  { %1787 = vmatmul.mubr.bf16.vlgmr.msra.gmra.mrb[0].mxu0 %v6285_v7  ;;  %1951 = vmatmul.mubr.bf16.vlgmr.msra.gmra.mrb[0].mxu1 %v6285_v7  ;;  %v7685_v7 = vld [vmem:[%s8156_s6 + $0x5e8] ss:$16 sps:$4 sm:$0xff]  }
  0x89   :  { %1796 = vmatpush1.bf16.msra.mxu0 %v7592_v8  ;;  %1960 = vmatpush1.bf16.msra.mxu1 %v7595_v9  ;;  %v7692_v8 = vld [vmem:[%s8156_s6 + $0x604] ss:$16 sps:$4 sm:$0xff]   ;;  %v7695_v9 = vld [vmem:[%s8156_s6 + $0x60c] ss:$16 sps:$4 sm:$0xff]  }
  0x8a   :  { %1797 = vmatprep.subr.bf16.mxu0 %v7600_v10  ;;  %1961 = vmatprep.subr.bf16.mxu1 %v7603_v12  ;;  %v7690_v10 = vld [vmem:[%s8156_s6 + $0x600] ss:$16 sps:$4 sm:$0xff]   ;;  %v7693_v12 = vld [vmem:[%s8156_s6 + $0x608] ss:$16 sps:$4 sm:$0xff]  }
  0x8b   :  { %1827 = vmatprep.mubr.bf16.mxu0 %v6288_v13  ;;  %1991 = vmatprep.mubr.bf16.mxu1 %v6288_v13  ;;  %v6287_v13 = vcombine.low %v8305_v11, %v8305_v11  ;;  %v7704_v11 = vld [vmem:[%s8156_s6 + $0x644] ss:$16 sps:$4 sm:$0xff]  }
  0x8d   :  { %1798 = vmatpush1.bf16.msra.mxu0 %v7598_v14  ;;  %1962 = vmatpush1.bf16.msra.mxu1 %v7601_v15  ;;  %v7698_v14 = vld [vmem:[%s8156_s6 + $0x624] ss:$16 sps:$4 sm:$0xff]   ;;  %v7701_v15 = vld [vmem:[%s8156_s6 + $0x62c] ss:$16 sps:$4 sm:$0xff]  }
  0x8e   :  { %1799 = vmatprep.subr.bf16.mxu0 %v7606_v16  ;;  %1963 = vmatprep.subr.bf16.mxu1 %v7609_v17  ;;  %v8382_v16 = vld [vmem:[%s8199_s9 + $0x18] sm:$0xff]  ;;  %v7696_v17 = vld [vmem:[%s8156_s6 + $0x620] ss:$16 sps:$4 sm:$0xff]  }
  0x91   :  { %1800 = vmatpush1.bf16.msra.mxu0 %v7604_v18  ;;  %1964 = vmatpush1.bf16.msra.mxu1 %v7607_v19  ;;  %v7699_v18 = vld [vmem:[%s8156_s6 + $0x628] ss:$16 sps:$4 sm:$0xff]   ;;  %v6290_v19 = vcombine.high %v8382_v16, %v8382_v16 }
  0x92   :  { %1801 = vmatprep.subr.bf16.mxu0 %v7612_v20  ;;  %1965 = vmatprep.subr.bf16.mxu1 %v7615_v21  ;;  %v7707_v20 = vld [vmem:[%s8156_s6 + $0x64c] ss:$16 sps:$4 sm:$0xff]   ;;  %v7702_v21 = vld [vmem:[%s8156_s6 + $0x640] ss:$16 sps:$4 sm:$0xff]  }
  0x95   :  { %1802 = vmatpush1.bf16.msra.mxu0 %v7610_v22  ;;  %1966 = vmatpush1.bf16.msra.mxu1 %v7613_v23  ;;  %v7705_v22 = vld [vmem:[%s8156_s6 + $0x648] ss:$16 sps:$4 sm:$0xff]   ;;  %v7710_v23 = vld [vmem:[%s8156_s6 + $0x664] ss:$16 sps:$4 sm:$0xff]  }
  0x96   :  { %1803 = vmatprep.subr.bf16.mxu0 %v7618_v24  ;;  %1967 = vmatprep.subr.bf16.mxu1 %v7621_v25  ;;  %v7713_v24 = vld [vmem:[%s8156_s6 + $0x66c] ss:$16 sps:$4 sm:$0xff]   ;;  %v7708_v25 = vld [vmem:[%s8156_s6 + $0x660] ss:$16 sps:$4 sm:$0xff]  }
  0x99   :  { %1804 = vmatpush1.bf16.msra.mxu0 %v7616_v26  ;;  %1968 = vmatpush1.bf16.msra.mxu1 %v7619_v27  ;;  %v7711_v26 = vld [vmem:[%s8156_s6 + $0x668] ss:$16 sps:$4 sm:$0xff]   ;;  %v7716_v27 = vld [vmem:[%s8156_s6 + $0x684] ss:$16 sps:$4 sm:$0xff]  }
  0x9a   :  { %1805 = vmatprep.subr.bf16.mxu0 %v7624_v28  ;;  %1969 = vmatprep.subr.bf16.mxu1 %v7627_v29  ;;  %v7719_v28 = vld [vmem:[%s8156_s6 + $0x68c] ss:$16 sps:$4 sm:$0xff]   ;;  %v7714_v29 = vld [vmem:[%s8156_s6 + $0x680] ss:$16 sps:$4 sm:$0xff]  }
  0x9d   :  { %1806 = vmatpush1.bf16.msra.mxu0 %v7622_v30  ;;  %1970 = vmatpush1.bf16.msra.mxu1 %v7625_v31  ;;  %v7717_v30 = vld [vmem:[%s8156_s6 + $0x688] ss:$16 sps:$4 sm:$0xff]   ;;  %v7722_v31 = vld [vmem:[%s8156_s6 + $0x6a4] ss:$16 sps:$4 sm:$0xff]  }
  0x9e   :  { %1807 = vmatprep.subr.bf16.mxu0 %v7630_v32  ;;  %1971 = vmatprep.subr.bf16.mxu1 %v7633_v33  ;;  %v7725_v32 = vld [vmem:[%s8156_s6 + $0x6ac] ss:$16 sps:$4 sm:$0xff]   ;;  %v7720_v33 = vld [vmem:[%s8156_s6 + $0x6a0] ss:$16 sps:$4 sm:$0xff]  }
  0xa1   :  { %1808 = vmatpush1.bf16.msra.mxu0 %v7628_v34  ;;  %1972 = vmatpush1.bf16.msra.mxu1 %v7631_v35  ;;  %v7723_v34 = vld [vmem:[%s8156_s6 + $0x6a8] ss:$16 sps:$4 sm:$0xff]   ;;  %v7728_v35 = vld [vmem:[%s8156_s6 + $0x6c4] ss:$16 sps:$4 sm:$0xff]  }
  0xa2   :  { %1809 = vmatprep.subr.bf16.mxu0 %v7636_v36  ;;  %1973 = vmatprep.subr.bf16.mxu1 %v7639_v37  ;;  %v7731_v36 = vld [vmem:[%s8156_s6 + $0x6cc] ss:$16 sps:$4 sm:$0xff]   ;;  %v7726_v37 = vld [vmem:[%s8156_s6 + $0x6c0] ss:$16 sps:$4 sm:$0xff]  }
  0xa5   :  { %1810 = vmatpush1.bf16.msra.mxu0 %v7634_v38  ;;  %1974 = vmatpush1.bf16.msra.mxu1 %v7637_v39  ;;  %v7729_v38 = vld [vmem:[%s8156_s6 + $0x6c8] ss:$16 sps:$4 sm:$0xff]   ;;  %v7734_v39 = vld [vmem:[%s8156_s6 + $0x6e4] ss:$16 sps:$4 sm:$0xff]  }
  0xa6   :  { %1811 = vmatprep.subr.bf16.mxu0 %v7642_v40  ;;  %1975 = vmatprep.subr.bf16.mxu1 %v7645_v41  ;;  %v7737_v40 = vld [vmem:[%s8156_s6 + $0x6ec] ss:$16 sps:$4 sm:$0xff]   ;;  %v7732_v41 = vld [vmem:[%s8156_s6 + $0x6e0] ss:$16 sps:$4 sm:$0xff]  }
  0xa9   :  { %1812 = vmatpush1.bf16.msra.mxu0 %v7640_v42  ;;  %1976 = vmatpush1.bf16.msra.mxu1 %v7643_v43  ;;  %v7735_v42 = vld [vmem:[%s8156_s6 + $0x6e8] ss:$16 sps:$4 sm:$0xff]   ;;  %v7740_v43 = vld [vmem:[%s8156_s6 + $0x704] ss:$16 sps:$4 sm:$0xff]  }
  0xaa   :  { %1813 = vmatprep.subr.bf16.mxu0 %v7648_v44  ;;  %1977 = vmatprep.subr.bf16.mxu1 %v7651_v45  ;;  %v7743_v44 = vld [vmem:[%s8156_s6 + $0x70c] ss:$16 sps:$4 sm:$0xff]   ;;  %v7738_v45 = vld [vmem:[%s8156_s6 + $0x700] ss:$16 sps:$4 sm:$0xff]  }
  0xad   :  { %1814 = vmatpush1.bf16.msra.mxu0 %v7646_v46  ;;  %1978 = vmatpush1.bf16.msra.mxu1 %v7649_v47  ;;  %v7741_v46 = vld [vmem:[%s8156_s6 + $0x708] ss:$16 sps:$4 sm:$0xff]   ;;  %v7746_v47 = vld [vmem:[%s8156_s6 + $0x724] ss:$16 sps:$4 sm:$0xff]  }
  0xae   :  { %1815 = vmatprep.subr.bf16.mxu0 %v7654_v48  ;;  %1979 = vmatprep.subr.bf16.mxu1 %v7657_v49  ;;  %v7749_v48 = vld [vmem:[%s8156_s6 + $0x72c] ss:$16 sps:$4 sm:$0xff]   ;;  %v7744_v49 = vld [vmem:[%s8156_s6 + $0x720] ss:$16 sps:$4 sm:$0xff]  }
  0xb1   :  { %1816 = vmatpush1.bf16.msra.mxu0 %v7652_v50  ;;  %1980 = vmatpush1.bf16.msra.mxu1 %v7655_v51  ;;  %v7747_v50 = vld [vmem:[%s8156_s6 + $0x728] ss:$16 sps:$4 sm:$0xff]   ;;  %v7752_v51 = vld [vmem:[%s8156_s6 + $0x744] ss:$16 sps:$4 sm:$0xff]  }
  0xb2   :  { %1817 = vmatprep.subr.bf16.mxu0 %v7660_v52  ;;  %1981 = vmatprep.subr.bf16.mxu1 %v7663_v53  ;;  %v7755_v52 = vld [vmem:[%s8156_s6 + $0x74c] ss:$16 sps:$4 sm:$0xff]   ;;  %v7750_v53 = vld [vmem:[%s8156_s6 + $0x740] ss:$16 sps:$4 sm:$0xff]  }
  0xb5   :  { %1818 = vmatpush1.bf16.msra.mxu0 %v7658_v54  ;;  %1982 = vmatpush1.bf16.msra.mxu1 %v7661_v55  ;;  %v7753_v54 = vld [vmem:[%s8156_s6 + $0x748] ss:$16 sps:$4 sm:$0xff]   ;;  %v7758_v55 = vld [vmem:[%s8156_s6 + $0x764] ss:$16 sps:$4 sm:$0xff]  }
  0xb6   :  { %1819 = vmatprep.subr.bf16.mxu0 %v7666_v56  ;;  %1983 = vmatprep.subr.bf16.mxu1 %v7669_v57  ;;  %v7761_v56 = vld [vmem:[%s8156_s6 + $0x76c] ss:$16 sps:$4 sm:$0xff]   ;;  %v7756_v57 = vld [vmem:[%s8156_s6 + $0x760] ss:$16 sps:$4 sm:$0xff]  }
  0xb9   :  { %1820 = vmatpush1.bf16.msra.mxu0 %v7664_v58  ;;  %1984 = vmatpush1.bf16.msra.mxu1 %v7667_v59  ;;  %v7759_v58 = vld [vmem:[%s8156_s6 + $0x768] ss:$16 sps:$4 sm:$0xff]   ;;  %v7764_v59 = vld [vmem:[%s8156_s6 + $0x784] ss:$16 sps:$4 sm:$0xff]  }
  0xba   :  { %1821 = vmatprep.subr.bf16.mxu0 %v7672_v60  ;;  %1985 = vmatprep.subr.bf16.mxu1 %v7675_v61  ;;  %v7767_v60 = vld [vmem:[%s8156_s6 + $0x78c] ss:$16 sps:$4 sm:$0xff]   ;;  %v7762_v61 = vld [vmem:[%s8156_s6 + $0x780] ss:$16 sps:$4 sm:$0xff]  }
  0xbd   :  { %1822 = vmatpush1.bf16.msra.mxu0 %v7670_v62  ;;  %1986 = vmatpush1.bf16.msra.mxu1 %v7673_v63  ;;  %v7765_v62 = vld [vmem:[%s8156_s6 + $0x788] ss:$16 sps:$4 sm:$0xff]   ;;  %v7770_v63 = vld [vmem:[%s8156_s6 + $0x7a4] ss:$16 sps:$4 sm:$0xff]  }
  0xbe   :  { %1823 = vmatprep.subr.bf16.mxu0 %v7678_v0  ;;  %1987 = vmatprep.subr.bf16.mxu1 %v7681_v1  ;;  %v7773_v0 = vld [vmem:[%s8156_s6 + $0x7ac] ss:$16 sps:$4 sm:$0xff]   ;;  %v7768_v1 = vld [vmem:[%s8156_s6 + $0x7a0] ss:$16 sps:$4 sm:$0xff]  }
  0xc1   :  { %1824 = vmatpush1.bf16.msra.mxu0 %v7676_v2  ;;  %1988 = vmatpush1.bf16.msra.mxu1 %v7679_v3  ;;  %v7771_v2 = vld [vmem:[%s8156_s6 + $0x7a8] ss:$16 sps:$4 sm:$0xff]   ;;  %v7776_v3 = vld [vmem:[%s8156_s6 + $0x7c4] ss:$16 sps:$4 sm:$0xff]  }
  0xc2   :  { %1825 = vmatprep.subr.bf16.mxu0 %v7684_v4  ;;  %1989 = vmatprep.subr.bf16.mxu1 %v7687_v5  ;;  %v7779_v4 = vld [vmem:[%s8156_s6 + $0x7cc] ss:$16 sps:$4 sm:$0xff]   ;;  %v7774_v5 = vld [vmem:[%s8156_s6 + $0x7c0] ss:$16 sps:$4 sm:$0xff]  }
  0xc5   :  { %1826 = vmatpush1.bf16.msra.mxu0 %v7682_v6  ;;  %1990 = vmatpush1.bf16.msra.mxu1 %v7685_v7  ;;  %v7777_v6 = vld [vmem:[%s8156_s6 + $0x7c8] ss:$16 sps:$4 sm:$0xff]   ;;  %v7782_v7 = vld [vmem:[%s8156_s6 + $0x7e4] ss:$16 sps:$4 sm:$0xff]  }
  0xc6   :  { %1836 = vmatprep.subr.bf16.mxu0 %v7692_v8  ;;  %2000 = vmatprep.subr.bf16.mxu1 %v7695_v9  ;;  %v7785_v8 = vld [vmem:[%s8156_s6 + $0x7ec] ss:$16 sps:$4 sm:$0xff]   ;;  %v7780_v9 = vld [vmem:[%s8156_s6 + $0x7e0] ss:$16 sps:$4 sm:$0xff]  }
  0xc8   :  { %1828 = vmatmul.mubr.bf16.vlgmr.msra.gmra.mrb[0].mxu0 %v6287_v13  ;;  %1992 = vmatmul.mubr.bf16.vlgmr.msra.gmra.mrb[0].mxu1 %v6287_v13  ;;  %v6289_v13 = vcombine.low %v8382_v16, %v8382_v16  ;;  %v7799_v16 = vld [vmem:[%s8349_s13 + $0x34] ss:$8 sps:$4 sm:$0xff]  }
  0xc9   :  { %1837 = vmatpush1.bf16.msra.mxu0 %v7690_v10  ;;  %2001 = vmatpush1.bf16.msra.mxu1 %v7693_v12  ;;  %v7783_v10 = vld [vmem:[%s8156_s6 + $0x7e8] ss:$16 sps:$4 sm:$0xff]   ;;  %v7790_v12 = vld [vmem:[%s8349_s13 + $0x4] ss:$8 sps:$4 sm:$0xff]   ;;  %s8133_s6 = smov 14  }
  0xca   :  { %1838 = vmatprep.subr.bf16.mxu0 %v7698_v14  ;;  %2002 = vmatprep.subr.bf16.mxu1 %v7701_v15  ;;  %v7788_v14 = vld [vmem:[%s8349_s13] ss:$8 sps:$4 sm:$0xff]   ;;  %v7793_v15 = vld [vmem:[%s8349_s13 + $0x14] ss:$8 sps:$4 sm:$0xff]   ;;  %s6267_s9 = sld [smem:[%s9193_s0 + %s8133_s6]]  }
  0xcb   :  { %1868 = vmatprep.mubr.bf16.mxu0 %v6290_v19  ;;  %2032 = vmatprep.mubr.bf16.mxu1 %v6290_v19  ;;  %v7794_v19 = vld [vmem:[%s8349_s13 + $0x20] ss:$8 sps:$4 sm:$0xff]  }
  0xcd   :  { %1839 = vmatpush1.bf16.msra.mxu0 %v7696_v17  ;;  %2003 = vmatpush1.bf16.msra.mxu1 %v7699_v18  ;;  %v7791_v17 = vld [vmem:[%s8349_s13 + $0x10] ss:$8 sps:$4 sm:$0xff]   ;;  %v7796_v18 = vld [vmem:[%s8349_s13 + $0x24] ss:$8 sps:$4 sm:$0xff]  }
  0xce   :  { %1840 = vmatprep.subr.bf16.mxu0 %v7704_v11  ;;  %2004 = vmatprep.subr.bf16.mxu1 %v7707_v20  ;;  %v7797_v11 = vld [vmem:[%s8349_s13 + $0x30] ss:$8 sps:$4 sm:$0xff]   ;;  %v7802_v20 = vld [vmem:[%s8349_s13 + $0x44] ss:$8 sps:$4 sm:$0xff]  }
  0xd1   :  { %1841 = vmatpush1.bf16.msra.mxu0 %v7702_v21  ;;  %2005 = vmatpush1.bf16.msra.mxu1 %v7705_v22  ;;  %v7800_v21 = vld [vmem:[%s8349_s13 + $0x40] ss:$8 sps:$4 sm:$0xff]   ;;  %v7805_v22 = vld [vmem:[%s8349_s13 + $0x54] ss:$8 sps:$4 sm:$0xff]  }
  0xd2   :  { %1842 = vmatprep.subr.bf16.mxu0 %v7710_v23  ;;  %2006 = vmatprep.subr.bf16.mxu1 %v7713_v24  ;;  %v7803_v23 = vld [vmem:[%s8349_s13 + $0x50] ss:$8 sps:$4 sm:$0xff]   ;;  %v7808_v24 = vld [vmem:[%s8349_s13 + $0x64] ss:$8 sps:$4 sm:$0xff]  }
  0xd5   :  { %1843 = vmatpush1.bf16.msra.mxu0 %v7708_v25  ;;  %2007 = vmatpush1.bf16.msra.mxu1 %v7711_v26  ;;  %v7806_v25 = vld [vmem:[%s8349_s13 + $0x60] ss:$8 sps:$4 sm:$0xff]   ;;  %v7811_v26 = vld [vmem:[%s8349_s13 + $0x74] ss:$8 sps:$4 sm:$0xff]  }
  0xd6   :  { %1844 = vmatprep.subr.bf16.mxu0 %v7716_v27  ;;  %2008 = vmatprep.subr.bf16.mxu1 %v7719_v28  ;;  %v7809_v27 = vld [vmem:[%s8349_s13 + $0x70] ss:$8 sps:$4 sm:$0xff]   ;;  %v7814_v28 = vld [vmem:[%s8349_s13 + $0x84] ss:$8 sps:$4 sm:$0xff]  }
  0xd9   :  { %1845 = vmatpush1.bf16.msra.mxu0 %v7714_v29  ;;  %2009 = vmatpush1.bf16.msra.mxu1 %v7717_v30  ;;  %v7812_v29 = vld [vmem:[%s8349_s13 + $0x80] ss:$8 sps:$4 sm:$0xff]   ;;  %v7817_v30 = vld [vmem:[%s8349_s13 + $0x94] ss:$8 sps:$4 sm:$0xff]  }
  0xda   :  { %1846 = vmatprep.subr.bf16.mxu0 %v7722_v31  ;;  %2010 = vmatprep.subr.bf16.mxu1 %v7725_v32  ;;  %v7815_v31 = vld [vmem:[%s8349_s13 + $0x90] ss:$8 sps:$4 sm:$0xff]   ;;  %v7820_v32 = vld [vmem:[%s8349_s13 + $0xa4] ss:$8 sps:$4 sm:$0xff]  }
  0xdd   :  { %1847 = vmatpush1.bf16.msra.mxu0 %v7720_v33  ;;  %2011 = vmatpush1.bf16.msra.mxu1 %v7723_v34  ;;  %v7818_v33 = vld [vmem:[%s8349_s13 + $0xa0] ss:$8 sps:$4 sm:$0xff]   ;;  %v7823_v34 = vld [vmem:[%s8349_s13 + $0xb4] ss:$8 sps:$4 sm:$0xff]  }
  0xde   :  { %1848 = vmatprep.subr.bf16.mxu0 %v7728_v35  ;;  %2012 = vmatprep.subr.bf16.mxu1 %v7731_v36  ;;  %v7821_v35 = vld [vmem:[%s8349_s13 + $0xb0] ss:$8 sps:$4 sm:$0xff]   ;;  %v7826_v36 = vld [vmem:[%s8349_s13 + $0xc4] ss:$8 sps:$4 sm:$0xff]  }
  0xe1   :  { %1849 = vmatpush1.bf16.msra.mxu0 %v7726_v37  ;;  %2013 = vmatpush1.bf16.msra.mxu1 %v7729_v38  ;;  %v7824_v37 = vld [vmem:[%s8349_s13 + $0xc0] ss:$8 sps:$4 sm:$0xff]   ;;  %v7829_v38 = vld [vmem:[%s8349_s13 + $0xd4] ss:$8 sps:$4 sm:$0xff]  }
  0xe2   :  { %1850 = vmatprep.subr.bf16.mxu0 %v7734_v39  ;;  %2014 = vmatprep.subr.bf16.mxu1 %v7737_v40  ;;  %v7827_v39 = vld [vmem:[%s8349_s13 + $0xd0] ss:$8 sps:$4 sm:$0xff]   ;;  %v7832_v40 = vld [vmem:[%s8349_s13 + $0xe4] ss:$8 sps:$4 sm:$0xff]  }
  0xe5   :  { %1851 = vmatpush1.bf16.msra.mxu0 %v7732_v41  ;;  %2015 = vmatpush1.bf16.msra.mxu1 %v7735_v42  ;;  %v7830_v41 = vld [vmem:[%s8349_s13 + $0xe0] ss:$8 sps:$4 sm:$0xff]   ;;  %v7835_v42 = vld [vmem:[%s8349_s13 + $0xf4] ss:$8 sps:$4 sm:$0xff]  }
  0xe6   :  { %1852 = vmatprep.subr.bf16.mxu0 %v7740_v43  ;;  %2016 = vmatprep.subr.bf16.mxu1 %v7743_v44  ;;  %v7833_v43 = vld [vmem:[%s8349_s13 + $0xf0] ss:$8 sps:$4 sm:$0xff]   ;;  %v7838_v44 = vld [vmem:[%s8349_s13 + $0x104] ss:$8 sps:$4 sm:$0xff]  }
  0xe9   :  { %1853 = vmatpush1.bf16.msra.mxu0 %v7738_v45  ;;  %2017 = vmatpush1.bf16.msra.mxu1 %v7741_v46  ;;  %v7884_v45 = vld [vmem:[%s8482_s17 + $0x40] sm:$0xff]  }
  0xea   :  { %1854 = vmatprep.subr.bf16.mxu0 %v7746_v47  ;;  %2018 = vmatprep.subr.bf16.mxu1 %v7749_v48  ;;  %v7885_v46 = vld [vmem:[%s8482_s17] sm:$0xff]   ;;  %v7886_v47 = vld [vmem:[%s8482_s17 + $0x48] sm:$0xff]  }
  0xeb   :  { %v7887_v48 = vld [vmem:[%s8482_s17 + $0x8] sm:$0xff]  }
  0xed   :  { %1855 = vmatpush1.bf16.msra.mxu0 %v7744_v49  ;;  %2019 = vmatpush1.bf16.msra.mxu1 %v7747_v50  ;;  %v7888_v49 = vld [vmem:[%s8482_s17 + $0x50] sm:$0xff]  }
  0xee   :  { %1856 = vmatprep.subr.bf16.mxu0 %v7752_v51  ;;  %2020 = vmatprep.subr.bf16.mxu1 %v7755_v52  ;;  %v7889_v50 = vld [vmem:[%s8482_s17 + $0x10] sm:$0xff]   ;;  %v7890_v51 = vld [vmem:[%s8482_s17 + $0x58] sm:$0xff]  }
  0xef   :  { %v7891_v52 = vld [vmem:[%s8482_s17 + $0x18] sm:$0xff]  }
  0xf1   :  { %1857 = vmatpush1.bf16.msra.mxu0 %v7750_v53  ;;  %2021 = vmatpush1.bf16.msra.mxu1 %v7753_v54  ;;  %v7892_v53 = vld [vmem:[%s8482_s17 + $0x60] sm:$0xff]  }
  0xf2   :  { %1858 = vmatprep.subr.bf16.mxu0 %v7758_v55  ;;  %2022 = vmatprep.subr.bf16.mxu1 %v7761_v56  ;;  %v7893_v54 = vld [vmem:[%s8482_s17 + $0x20] sm:$0xff]   ;;  %v7894_v55 = vld [vmem:[%s8482_s17 + $0x68] sm:$0xff]  }
  0xf3   :  { %v7895_v56 = vld [vmem:[%s8482_s17 + $0x28] sm:$0xff]  }
  0xf5   :  { %1859 = vmatpush1.bf16.msra.mxu0 %v7756_v57  ;;  %2023 = vmatpush1.bf16.msra.mxu1 %v7759_v58  ;;  %v385_v57 = vlaneseq }
  0xf6   :  { %1860 = vmatprep.subr.bf16.mxu0 %v7764_v59  ;;  %2024 = vmatprep.subr.bf16.mxu1 %v7767_v60  ;;  %v8504_v60 = vld [vmem:[%s6255_s21] sm:$0xf]  ;;  %s8751_s21 = sld [smem:[%s9193_s0 + %s8136_s18]]  }
  0xf7   :  { %v8499_v58 = vshrl.u32 %v385_v57, 7  ;;  %v7898_v57 = vld [vmem:[%s8482_s17 + $0x78] sm:$0xff]  }
  0xf9   :  { %1861 = vmatpush1.bf16.msra.mxu0 %v7762_v61  ;;  %2025 = vmatpush1.bf16.msra.mxu1 %v7765_v62  ;;  %v8502_v59 = vsub.s32 0, %v8499_v58  ;;  %v8507_v61 = vsub.s32 1, %v8499_v58  ;;  %v8510_v62 = vsub.s32 3, %v8499_v58 }
  0xfa   :  { %1862 = vmatprep.subr.bf16.mxu0 %v7770_v63  ;;  %2026 = vmatprep.subr.bf16.mxu1 %v7773_v0 }
  0xfb   :  { %v388_v63 = vrot.slane %v8504_v60, %v8502_v59  ;;  %v392_v0 = vrot.slane %v8504_v60, %v8507_v61 }
  0xfd   :  { %1863 = vmatpush1.bf16.msra.mxu0 %v7768_v1  ;;  %2027 = vmatpush1.bf16.msra.mxu1 %v7771_v2  ;;  %v400_v1 = vrot.slane %v8504_v60, %v8510_v62 }
  0xfe   :  { %1864 = vmatprep.subr.bf16.mxu0 %v7776_v3  ;;  %2028 = vmatprep.subr.bf16.mxu1 %v7779_v4 }
 0x101   :  { %1865 = vmatpush1.bf16.msra.mxu0 %v7774_v5  ;;  %2029 = vmatpush1.bf16.msra.mxu1 %v7777_v6 }
 0x102   :  { %1866 = vmatprep.subr.bf16.mxu0 %v7782_v7  ;;  %2030 = vmatprep.subr.bf16.mxu1 %v7785_v8 }
 0x105   :  { %1867 = vmatpush1.bf16.msra.mxu0 %v7780_v9  ;;  %2031 = vmatpush1.bf16.msra.mxu1 %v7783_v10 }
 0x106   :  { %2445 = vmatprep.subr.bf16.mxu0 %v7790_v12  ;;  %7052 = vmatprep.subr.bf16.mxu1 %v7884_v45  ;;  %v7877_v45 = vld [vmem:[%s8349_s13 + $0x1d4] ss:$8 sps:$4 sm:$0xff]  }
 0x108   :  { %1869 = vmatmul.mubr.bf16.vlgmr.msra.gmra.mrb[0].mxu0 %v6289_v13  ;;  %2033 = vmatmul.mubr.bf16.vlgmr.msra.gmra.mrb[0].mxu1 %v6289_v13 }
 0x109   :  { %2446 = vmatpush1.bf16.msra.mxu0 %v7788_v14  ;;  %7053 = vmatpush3.bf16.msra.mxu1 %v7885_v46  ;;  %v7875_v46 = vld [vmem:[%s8349_s13 + $0x1d0] ss:$8 sps:$4 sm:$0xff]  }
 0x10a   :  { %2447 = vmatprep.subr.bf16.mxu0 %v7793_v15  ;;  %7054 = vmatprep.subr.bf16.mxu1 %v7886_v47 }
 0x10d   :  { %2448 = vmatpush1.bf16.msra.mxu0 %v7791_v17  ;;  %7055 = vmatpush3.bf16.msra.mxu1 %v7887_v48  ;;  %v7880_v48 = vld [vmem:[%s8349_s13 + $0x1e4] ss:$8 sps:$4 sm:$0xff]  }
 0x10e   :  { %2449 = vmatprep.subr.bf16.mxu0 %v7796_v18  ;;  %7056 = vmatprep.subr.bf16.mxu1 %v7888_v49  ;;  %v7878_v49 = vld [vmem:[%s8349_s13 + $0x1e0] ss:$8 sps:$4 sm:$0xff]  }
 0x111   :  { %2450 = vmatpush1.bf16.msra.mxu0 %v7794_v19  ;;  %7057 = vmatpush3.bf16.msra.mxu1 %v7889_v50  ;;  %v7836_v19 = vld [vmem:[%s8349_s13 + $0x100] ss:$8 sps:$4 sm:$0xff]  }
 0x112   :  { %2451 = vmatprep.subr.bf16.mxu0 %v7799_v16  ;;  %7058 = vmatprep.subr.bf16.mxu1 %v7890_v51  ;;  %v7883_v51 = vld [vmem:[%s8349_s13 + $0x1f4] ss:$8 sps:$4 sm:$0xff]  }
 0x115   :  { %2452 = vmatpush1.bf16.msra.mxu0 %v7797_v11  ;;  %7059 = vmatpush3.bf16.msra.mxu1 %v7891_v52  ;;  %v7841_v11 = vld [vmem:[%s8349_s13 + $0x114] ss:$8 sps:$4 sm:$0xff]   ;;  %v7881_v52 = vld [vmem:[%s8349_s13 + $0x1f0] ss:$8 sps:$4 sm:$0xff]  }
 0x116   :  { %2453 = vmatprep.subr.bf16.mxu0 %v7802_v20  ;;  %7060 = vmatprep.subr.bf16.mxu1 %v7892_v53 }
 0x119   :  { %2454 = vmatpush1.bf16.msra.mxu0 %v7800_v21  ;;  %7061 = vmatpush3.bf16.msra.mxu1 %v7893_v54  ;;  %v7839_v21 = vld [vmem:[%s8349_s13 + $0x110] ss:$8 sps:$4 sm:$0xff]  }
 0x11a   :  { %2455 = vmatprep.subr.bf16.mxu0 %v7805_v22  ;;  %7062 = vmatprep.subr.bf16.mxu1 %v7894_v55  ;;  %v7844_v22 = vld [vmem:[%s8349_s13 + $0x124] ss:$8 sps:$4 sm:$0xff]   ;;  %v7896_v55 = vld [vmem:[%s8482_s17 + $0x70] sm:$0xff]  }
 0x11d   :  { %2456 = vmatpush1.bf16.msra.mxu0 %v7803_v23  ;;  %7063 = vmatpush3.bf16.msra.mxu1 %v7895_v56  ;;  %v7842_v23 = vld [vmem:[%s8349_s13 + $0x120] ss:$8 sps:$4 sm:$0xff]   ;;  %v7897_v56 = vld [vmem:[%s8482_s17 + $0x30] sm:$0xff]  }
 0x11e   :  { %2457 = vmatprep.subr.bf16.mxu0 %v7808_v24  ;;  %v7847_v24 = vld [vmem:[%s8349_s13 + $0x134] ss:$8 sps:$4 sm:$0xff]   ;;  %7064 = vmatprep.subr.bf16.mxu1 %v7896_v55  ;;  %v7924_v55 = vld [vmem:[%s8648_s19] sm:$0xff]  }
 0x121   :  { %2458 = vmatpush1.bf16.msra.mxu0 %v7806_v25  ;;  %v7845_v25 = vld [vmem:[%s8349_s13 + $0x130] ss:$8 sps:$4 sm:$0xff]   ;;  %7065 = vmatpush3.bf16.msra.mxu1 %v7897_v56  ;;  %v7925_v56 = vld [vmem:[%s8648_s19 + $0x8] sm:$0xff]  }
 0x122   :  { %2459 = vmatprep.subr.bf16.mxu0 %v7811_v26  ;;  %v7850_v26 = vld [vmem:[%s8349_s13 + $0x144] ss:$8 sps:$4 sm:$0xff]   ;;  %7066 = vmatprep.subr.bf16.mxu1 %v7898_v57  ;;  %v7926_v57 = vld [vmem:[%s8648_s19 + $0x10] sm:$0xff]  }
 0x125   :  { %2460 = vmatpush1.bf16.msra.mxu0 %v7809_v27  ;;  %v7848_v27 = vld [vmem:[%s8349_s13 + $0x140] ss:$8 sps:$4 sm:$0xff]  }
 0x126   :  { %2461 = vmatprep.subr.bf16.mxu0 %v7814_v28  ;;  %v7853_v28 = vld [vmem:[%s8349_s13 + $0x154] ss:$8 sps:$4 sm:$0xff]  }
 0x129   :  { %2462 = vmatpush1.bf16.msra.mxu0 %v7812_v29  ;;  %v7851_v29 = vld [vmem:[%s8349_s13 + $0x150] ss:$8 sps:$4 sm:$0xff]  }
 0x12a   :  { %2463 = vmatprep.subr.bf16.mxu0 %v7817_v30  ;;  %v7856_v30 = vld [vmem:[%s8349_s13 + $0x164] ss:$8 sps:$4 sm:$0xff]  }
 0x12d   :  { %2464 = vmatpush1.bf16.msra.mxu0 %v7815_v31  ;;  %v7854_v31 = vld [vmem:[%s8349_s13 + $0x160] ss:$8 sps:$4 sm:$0xff]  }
 0x12e   :  { %2465 = vmatprep.subr.bf16.mxu0 %v7820_v32  ;;  %v7859_v32 = vld [vmem:[%s8349_s13 + $0x174] ss:$8 sps:$4 sm:$0xff]  }
 0x131   :  { %2466 = vmatpush1.bf16.msra.mxu0 %v7818_v33  ;;  %v7857_v33 = vld [vmem:[%s8349_s13 + $0x170] ss:$8 sps:$4 sm:$0xff]  }
 0x132   :  { %2467 = vmatprep.subr.bf16.mxu0 %v7823_v34  ;;  %v7862_v34 = vld [vmem:[%s8349_s13 + $0x184] ss:$8 sps:$4 sm:$0xff]  }
 0x135   :  { %2468 = vmatpush1.bf16.msra.mxu0 %v7821_v35  ;;  %v7860_v35 = vld [vmem:[%s8349_s13 + $0x180] ss:$8 sps:$4 sm:$0xff]  }
 0x136   :  { %2469 = vmatprep.subr.bf16.mxu0 %v7826_v36  ;;  %v7865_v36 = vld [vmem:[%s8349_s13 + $0x194] ss:$8 sps:$4 sm:$0xff]  }
 0x139   :  { %2470 = vmatpush1.bf16.msra.mxu0 %v7824_v37  ;;  %v7863_v37 = vld [vmem:[%s8349_s13 + $0x190] ss:$8 sps:$4 sm:$0xff]  }
 0x13a   :  { %2471 = vmatprep.subr.bf16.mxu0 %v7829_v38  ;;  %v7868_v38 = vld [vmem:[%s8349_s13 + $0x1a4] ss:$8 sps:$4 sm:$0xff]  }
 0x13d   :  { %2472 = vmatpush1.bf16.msra.mxu0 %v7827_v39  ;;  %v7866_v39 = vld [vmem:[%s8349_s13 + $0x1a0] ss:$8 sps:$4 sm:$0xff]  }
 0x13e   :  { %2473 = vmatprep.subr.bf16.mxu0 %v7832_v40  ;;  %v7871_v40 = vld [vmem:[%s8349_s13 + $0x1b4] ss:$8 sps:$4 sm:$0xff]  }
 0x141   :  { %2474 = vmatpush1.bf16.msra.mxu0 %v7830_v41  ;;  %v7869_v41 = vld [vmem:[%s8349_s13 + $0x1b0] ss:$8 sps:$4 sm:$0xff]  }
 0x142   :  { %2475 = vmatprep.subr.bf16.mxu0 %v7835_v42  ;;  %v7874_v42 = vld [vmem:[%s8349_s13 + $0x1c4] ss:$8 sps:$4 sm:$0xff]  }
 0x145   :  { %2476 = vmatpush1.bf16.msra.mxu0 %v7833_v43  ;;  %v7872_v43 = vld [vmem:[%s8349_s13 + $0x1c0] ss:$8 sps:$4 sm:$0xff]   ;;  %s8726_s13 = sld [smem:[%s9193_s0 + %s8134_s10]]  }
 0x146   :  { %2486 = vmatprep.subr.bf16.mxu0 %v7838_v44  ;;  %v8546_v44 = vsub.s32 2, %v8499_v58 }
 0x148   :  { %v396_v47 = vrot.slane %v8504_v60, %v8546_v44  ;;  %v7899_v60 = vld [vmem:[%s8482_s17 + $0x38] sm:$0xff]   ;;  %s6269_s17 = sld [smem:[%s9193_s0 + %s8135_s14]]  }
 0x149   :  { %7067 = vmatpush3.bf16.msra.mxu1 %v7899_v60  ;;  %v7927_v60 = vld [vmem:[%s8648_s19 + $0x18] sm:$0xff]  }
 0x1db   :  { %v1870_v2 = vpop.f32.mrb[0].mxu0  ;;  %v8518_v3 = vpop.f32.mrb[0].mxu1 }
 0x1dc   :  { %v7306_v4 = vadd.f32 %v1870_v2, %v388_v63  ;;  %v1872_v5 = vpop.f32.mrb[1].mxu0  ;;  %v2036_v6 = vpop.f32.mrb[1].mxu1  ;;  %v7308_v50 = vadd.f32 %v8518_v3, %v396_v47  ;;  %v8120_v63 = vmov 0.0  }
 0x1dd   :  { %v7307_v7 = vadd.f32 %v1872_v5, %v392_v0  ;;  %v7309_v8 = vadd.f32 %v2036_v6, %v400_v1  ;;  %v1874_v9 = vpop.f32.mrb[2].mxu0  ;;  %v2038_v10 = vpop.f32.mrb[2].mxu1  ;;  %7146 = vmatprep.subr.bf16.mxu1 %v8120_v63  ;;  %v2113_v0 = vld [vmem:[%s6257_s29] sm:$0x3]  ;;  %s8774_s29 = sld [smem:[%s9193_s0 + %s8138_s26]]  }
 0x1de   :  { %v2041_v12 = vmax.f32 %v7306_v4, 0.0  ;;  %v1875_v13 = vpop.f32.mrb[3].mxu0  ;;  %v2039_v14 = vpop.f32.mrb[3].mxu1  ;;  %v2043_v53 = vmax.f32 %v7308_v50, 0.0  ;;  %v2118_v1 = vrot.slane %v2113_v0, %v8502_v59  ;;  %v2122_v2 = vrot.slane %v2113_v0, %v8507_v61  ;;  %v7919_v50 = vld [vmem:[%s8622_s11 + $0x18] sm:$0xff]   ;;  %v7928_v0 = vld [vmem:[%s8648_s19 + $0x20] sm:$0xff]  }
 0x1df   :  { %v2042_v15 = vmax.f32 %v7307_v7, 0.0  ;;  %v2044_v17 = vmax.f32 %v7309_v8, 0.0  ;;  %v7900_v13 = vld [vmem:[%s8565_s25] sm:$0xff]  }
 0x1e0   :  { %v2045_v16 = vpack.c.bf16 %v2041_v12, %v2041_v12  ;;  %v2047_v54 = vpack.c.bf16 %v2043_v53, %v2043_v53  ;;  %v7922_v53 = vld [vmem:[%s8622_s11 + $0x30] sm:$0xff]  }
 0x1e1   :  { %v2046_v18 = vpack.c.bf16 %v2042_v15, %v2042_v15  ;;  %v2048_v20 = vpack.c.bf16 %v2044_v17, %v2044_v17  ;;  %v7901_v15 = vld [vmem:[%s8565_s25 + $0x8] sm:$0xff]   ;;  %v7902_v17 = vld [vmem:[%s8565_s25 + $0x10] sm:$0xff]  }
 0x1e3   :  { %2477 = vmatprep.mubr.bf16.mxu0 %v2046_v18  ;;  %v7903_v18 = vld [vmem:[%s8565_s25 + $0x18] sm:$0xff]  }
 0x1e4   :  { %2478 = vmatmul.mubr.bf16.vlgmr.msra.gmra.mrb[4].mxu0 %v2045_v16  ;;  %v7905_v16 = vld [vmem:[%s8565_s25 + $0x28] sm:$0xff]  }
 0x1e5   :  { %2487 = vmatpush1.bf16.msra.mxu0 %v7836_v19  ;;  %2518 = vmatprep.mubr.bf16.mxu0 %v2048_v20  ;;  %v7904_v19 = vld [vmem:[%s8565_s25 + $0x20] sm:$0xff]   ;;  %v7907_v20 = vld [vmem:[%s8565_s25 + $0x38] sm:$0xff]  }
 0x1e6   :  { %2488 = vmatprep.subr.bf16.mxu0 %v7841_v11  ;;  %v7906_v11 = vld [vmem:[%s8565_s25 + $0x30] sm:$0xff]   ;;  %s6271_s25 = sld [smem:[%s9193_s0 + %s8137_s22]]  }
 0x1e9   :  { %2489 = vmatpush1.bf16.msra.mxu0 %v7839_v21 }
 0x1ea   :  { %2490 = vmatprep.subr.bf16.mxu0 %v7844_v22  ;;  %v6611_v22 = vld [vmem:[%s6259_s7] ss:$0 sm:$0xff]  ;;  %s8798_s7 = sld [smem:[%s9193_s0 + %s8141_s4]]  }
 0x1ed   :  { %2491 = vmatpush1.bf16.msra.mxu0 %v7842_v23 }
 0x1ee   :  { %2492 = vmatprep.subr.bf16.mxu0 %v7847_v24 }
 0x1f1   :  { %2493 = vmatpush1.bf16.msra.mxu0 %v7845_v25 }
 0x1f2   :  { %2494 = vmatprep.subr.bf16.mxu0 %v7850_v26 }
 0x1f5   :  { %2495 = vmatpush1.bf16.msra.mxu0 %v7848_v27 }
 0x1f6   :  { %2496 = vmatprep.subr.bf16.mxu0 %v7853_v28 }
 0x1f9   :  { %2497 = vmatpush1.bf16.msra.mxu0 %v7851_v29  ;;  %v7908_v29 = vld [vmem:[%s8596_s3] sm:$0xff]  }
 0x1fa   :  { %2498 = vmatprep.subr.bf16.mxu0 %v7856_v30 }
 0x1fd   :  { %2499 = vmatpush1.bf16.msra.mxu0 %v7854_v31  ;;  %v7909_v31 = vld [vmem:[%s8596_s3 + $0x8] sm:$0xff]  }
 0x1fe   :  { %2500 = vmatprep.subr.bf16.mxu0 %v7859_v32  ;;  %v7910_v32 = vld [vmem:[%s8596_s3 + $0x10] sm:$0xff]  }
 0x201   :  { %2501 = vmatpush1.bf16.msra.mxu0 %v7857_v33  ;;  %v7911_v33 = vld [vmem:[%s8596_s3 + $0x18] sm:$0xff]  }
 0x202   :  { %2502 = vmatprep.subr.bf16.mxu0 %v7862_v34  ;;  %v7912_v34 = vld [vmem:[%s8596_s3 + $0x20] sm:$0xff]  }
 0x205   :  { %2503 = vmatpush1.bf16.msra.mxu0 %v7860_v35  ;;  %v7913_v35 = vld [vmem:[%s8596_s3 + $0x28] sm:$0xff]  }
 0x206   :  { %2504 = vmatprep.subr.bf16.mxu0 %v7865_v36  ;;  %v7914_v36 = vld [vmem:[%s8596_s3 + $0x30] sm:$0xff]  }
 0x209   :  { %2505 = vmatpush1.bf16.msra.mxu0 %v7863_v37  ;;  %v7915_v37 = vld [vmem:[%s8596_s3 + $0x38] sm:$0xff]   ;;  %s6273_s3 = sld [smem:[%s9193_s0 + %s8139_s30]]  }
 0x20a   :  { %2506 = vmatprep.subr.bf16.mxu0 %v7868_v38  ;;  %v6628_v38 = vld [vmem:[%s6261_s15] ss:$0 sm:$0xff]  ;;  %s8870_s15 = sld [smem:[%s9193_s0 + %s8143_s12]]  }
 0x20d   :  { %2507 = vmatpush1.bf16.msra.mxu0 %v7866_v39 }
 0x20e   :  { %2508 = vmatprep.subr.bf16.mxu0 %v7871_v40 }
 0x211   :  { %2509 = vmatpush1.bf16.msra.mxu0 %v7869_v41 }
 0x212   :  { %2510 = vmatprep.subr.bf16.mxu0 %v7874_v42 }
 0x215   :  { %2511 = vmatpush1.bf16.msra.mxu0 %v7872_v43 }
 0x216   :  { %2512 = vmatprep.subr.bf16.mxu0 %v7877_v45 }
 0x219   :  { %2513 = vmatpush1.bf16.msra.mxu0 %v7875_v46  ;;  %v7916_v46 = vld [vmem:[%s8622_s11] sm:$0xff]  }
 0x21a   :  { %2514 = vmatprep.subr.bf16.mxu0 %v7880_v48  ;;  %v7917_v48 = vld [vmem:[%s8622_s11 + $0x8] sm:$0xff]  }
 0x21d   :  { %2515 = vmatpush1.bf16.msra.mxu0 %v7878_v49  ;;  %v7918_v49 = vld [vmem:[%s8622_s11 + $0x10] sm:$0xff]  }
 0x21e   :  { %2516 = vmatprep.subr.bf16.mxu0 %v7883_v51  ;;  %v7920_v51 = vld [vmem:[%s8622_s11 + $0x20] sm:$0xff]  }
 0x221   :  { %2517 = vmatpush1.bf16.msra.mxu0 %v7881_v52  ;;  %v7921_v52 = vld [vmem:[%s8622_s11 + $0x28] sm:$0xff]  }
 0x222   :  { %7206 = vmatprep.subr.bf16.mxu0 %v8120_v63 }
 0x224   :  { %2519 = vmatmul.mubr.bf16.vlgmr.msra.gmra.mrb[4].mxu0 %v2047_v54  ;;  %v7923_v54 = vld [vmem:[%s8622_s11 + $0x38] sm:$0xff]   ;;  %s6275_s11 = sld [smem:[%s9193_s0 + %s8142_s8]]  }
 0x225   :  { %7222 = vmatprep.mubr.msk.bf16.mxu0 %vm8123_vm0, %v8120_v63  ;;  %7207 = vmatpush3.bf16.msra.mxu0 %v7924_v55 }
 0x226   :  { %7208 = vmatprep.subr.bf16.mxu0 %v8120_v63 }
 0x229   :  { %7209 = vmatpush3.bf16.msra.mxu0 %v7925_v56 }
 0x22a   :  { %7210 = vmatprep.subr.bf16.mxu0 %v8120_v63 }
 0x22d   :  { %7211 = vmatpush3.bf16.msra.mxu0 %v7926_v57 }
 0x22e   :  { %7212 = vmatprep.subr.bf16.mxu0 %v8120_v63 }
 0x231   :  { %7213 = vmatpush3.bf16.msra.mxu0 %v7927_v60  ;;  %v7954_v60 = vld [vmem:[%s8726_s13 + $0x30] sm:$0xff]  }
 0x232   :  { %7214 = vmatprep.subr.bf16.mxu0 %v8120_v63 }
 0x235   :  { %7215 = vmatpush3.bf16.msra.mxu0 %v7928_v0  ;;  %v7955_v0 = vld [vmem:[%s8726_s13 + $0x38] sm:$0xff]  }
 0x236   :  { %7216 = vmatprep.subr.bf16.mxu0 %v8120_v63 }
 0x2f7   :  { %v2520_v3 = vpop.f32.mrb[4].mxu0 }
 0x2f8   :  { %v7310_v4 = vadd.f32 %v2520_v3, %v2118_v1  ;;  %v2522_v5 = vpop.f32.mrb[5].mxu0  ;;  %v7929_v1 = vld [vmem:[%s8648_s19 + $0x28] sm:$0xff]  }
 0x2f9   :  { %v7311_v6 = vadd.f32 %v2522_v5, %v2122_v2  ;;  %v2524_v7 = vpop.f32.mrb[6].mxu0  ;;  %7217 = vmatpush3.bf16.msra.mxu0 %v7929_v1  ;;  %v6637_v2 = vld [vmem:[%s6263_s23] ss:$0 sm:$0xff]  ;;  %s6279_s23 = sld [smem:[%s9193_s0 + %s8145_s20]]  }
 0x2fa   :  { %v2527_v8 = vmax.f32 %v7310_v4, 0.0  ;;  %v2525_v9 = vpop.f32.mrb[7].mxu0  ;;  %7218 = vmatprep.subr.bf16.mxu0 %v8120_v63  ;;  %v7956_v1 = vld [vmem:[%s8751_s21] sm:$0xff]  }
 0x2fb   :  { %v2528_v10 = vmax.f32 %v7311_v6, 0.0 }
 0x2fc   :  { %v2529_v14 = vpack.c.bf16 %v2527_v8, %v2527_v8 }
 0x2fd   :  { %v2530_v12 = vpack.c.bf16 %v2528_v10, %v2528_v10  ;;  %v7930_v10 = vld [vmem:[%s8648_s19 + $0x30] sm:$0xff]  }
 0x2fe   :  { %7219 = vmatpush3.bf16.msra.mxu0 %v7930_v10 }
 0x2ff   :  { %2698 = vmatprep.mubr.bf16.mxu1 %v2530_v12  ;;  %7220 = vmatprep.subr.bf16.mxu0 %v8120_v63  ;;  %v7931_v12 = vld [vmem:[%s8648_s19 + $0x38] sm:$0xff]   ;;  %s6277_s19 = sld [smem:[%s9193_s0 + %s8144_s16]]  }
 0x300   :  { %2699 = vmatmul.mubr.bf16.vlgmr.msra.gmra.mrb[4].mxu1 %v2529_v14  ;;  %v7933_v14 = vld [vmem:[%s8674_s27 + $0x8] sm:$0xff]  }
 0x301   :  { %7147 = vmatpush3.bf16.msra.mxu1 %v7900_v13  ;;  %7162 = vmatprep.mubr.msk.bf16.mxu1 %vm8123_vm0, %v8120_v63  ;;  %v7932_v13 = vld [vmem:[%s8674_s27] sm:$0xff]  }
 0x302   :  { %7148 = vmatprep.subr.bf16.mxu1 %v8120_v63  ;;  %7221 = vmatpush3.bf16.msra.mxu0 %v7931_v12 }
 0x303   :  { %7246 = vmatprep.subr.bf16.mxu0 %v8120_v63 }
 0x305   :  { %7149 = vmatpush3.bf16.msra.mxu1 %v7901_v15  ;;  %v7934_v15 = vld [vmem:[%s8674_s27 + $0x10] sm:$0xff]  }
 0x306   :  { %7150 = vmatprep.subr.bf16.mxu1 %v8120_v63 }
 0x309   :  { %7151 = vmatpush3.bf16.msra.mxu1 %v7902_v17  ;;  %v7935_v17 = vld [vmem:[%s8674_s27 + $0x18] sm:$0xff]  }
 0x30a   :  { %7152 = vmatprep.subr.bf16.mxu1 %v8120_v63 }
 0x30d   :  { %7153 = vmatpush3.bf16.msra.mxu1 %v7903_v18  ;;  %v7936_v18 = vld [vmem:[%s8674_s27 + $0x20] sm:$0xff]  }
 0x30e   :  { %7154 = vmatprep.subr.bf16.mxu1 %v8120_v63 }
 0x311   :  { %7155 = vmatpush3.bf16.msra.mxu1 %v7904_v19  ;;  %v7937_v19 = vld [vmem:[%s8674_s27 + $0x28] sm:$0xff]  }
 0x312   :  { %7156 = vmatprep.subr.bf16.mxu1 %v8120_v63 }
 0x315   :  { %7157 = vmatpush3.bf16.msra.mxu1 %v7905_v16  ;;  %v7938_v16 = vld [vmem:[%s8674_s27 + $0x30] sm:$0xff]  }
 0x316   :  { %7158 = vmatprep.subr.bf16.mxu1 %v8120_v63 }
 0x319   :  { %7159 = vmatpush3.bf16.msra.mxu1 %v7906_v11  ;;  %v6646_v11 = vld [vmem:[%s6265_s1] ss:$0 sm:$0xff]  ;;  %s9183_s1 = sld [smem:[%s9193_s0 + %s8147_s28]]  }
 0x31a   :  { %7160 = vmatprep.subr.bf16.mxu1 %v8120_v63 }
 0x31d   :  { %7161 = vmatpush3.bf16.msra.mxu1 %v7907_v20 }
 0x31e   :  { %7166 = vmatprep.subr.bf16.mxu1 %v8120_v63 }
 0x3d3   :  { %v7068_v21 = vpop.f32.mrb[4].mxu1 }
 0x3d4   :  { %v7069_v23 = vpop.f32.mrb[5].mxu1 }
 0x3d5   :  { %v7070_v24 = vadd.f32 %v7069_v23, %v7068_v21  ;;  %v7071_v25 = vpop.f32.mrb[6].mxu1 }
 0x3d6   :  { %v7072_v26 = vpop.f32.mrb[7].mxu1 }
 0x3d7   :  { %v2701_v27 = vadd.f32 %v7070_v24, %v6611_v22 }
 0x3d9   :  { %v2706_v28 = vmax.f32 %v2701_v27, 0.0  ;;  %v7939_v27 = vld [vmem:[%s8674_s27 + $0x38] sm:$0xff]   ;;  %s6281_s27 = sld [smem:[%s9193_s0 + %s8146_s24]]  }
 0x3db   :  { %v2707_v30 = vpack.c.bf16 %v2706_v28, %v2706_v28  ;;  %v7940_v28 = vld [vmem:[%s8700_s5] sm:$0xff]  }
 0x3dd   :  { %7163 = vmatmul.mubr.bf16.vlgmr.msra.gmra.mrb[8].mxu1 %v2707_v30  ;;  %v7942_v30 = vld [vmem:[%s8700_s5 + $0x10] sm:$0xff]  }
 0x3de   :  { %7167 = vmatpush3.bf16.msra.mxu1 %v7908_v29  ;;  %7182 = vmatprep.mubr.msk.bf16.mxu1 %vm8123_vm0, %v8120_v63  ;;  %v7941_v29 = vld [vmem:[%s8700_s5 + $0x8] sm:$0xff]  }
 0x3df   :  { %7168 = vmatprep.subr.bf16.mxu1 %v8120_v63 }
 0x3e2   :  { %7169 = vmatpush3.bf16.msra.mxu1 %v7909_v31  ;;  %v7943_v31 = vld [vmem:[%s8700_s5 + $0x18] sm:$0xff]  }
 0x3e3   :  { %7170 = vmatprep.subr.bf16.mxu1 %v8120_v63 }
 0x3e6   :  { %7171 = vmatpush3.bf16.msra.mxu1 %v7910_v32  ;;  %v7944_v32 = vld [vmem:[%s8700_s5 + $0x20] sm:$0xff]  }
 0x3e7   :  { %7172 = vmatprep.subr.bf16.mxu1 %v8120_v63 }
 0x3ea   :  { %7173 = vmatpush3.bf16.msra.mxu1 %v7911_v33  ;;  %v7945_v33 = vld [vmem:[%s8700_s5 + $0x28] sm:$0xff]  }
 0x3eb   :  { %7174 = vmatprep.subr.bf16.mxu1 %v8120_v63 }
 0x3ee   :  { %7175 = vmatpush3.bf16.msra.mxu1 %v7912_v34  ;;  %v6655_v34 = vld [vmem:[%s6267_s9] ss:$0 sm:$0xff] }
 0x3ef   :  { %7176 = vmatprep.subr.bf16.mxu1 %v8120_v63 }
 0x3f2   :  { %7177 = vmatpush3.bf16.msra.mxu1 %v7913_v35 }
 0x3f3   :  { %7178 = vmatprep.subr.bf16.mxu1 %v8120_v63 }
 0x3f6   :  { %7179 = vmatpush3.bf16.msra.mxu1 %v7914_v36 }
 0x3f7   :  { %7180 = vmatprep.subr.bf16.mxu1 %v8120_v63 }
 0x3fa   :  { %7181 = vmatpush3.bf16.msra.mxu1 %v7915_v37 }
 0x3fb   :  { %7186 = vmatprep.subr.bf16.mxu1 %v8120_v63 }
 0x4b0   :  { %v2813_v39 = vpop.f32.mrb[8].mxu1 }
 0x4b1   :  { %v2814_v40 = vadd.f32 %v6628_v38, %v2813_v39  ;;  %v7164_v41 = vpop.f32.mrb[9].mxu1 }
 0x4b2   :  { %v2816_v42 = vpop.f32.mrb[10].mxu1  ;;  %v7946_v41 = vld [vmem:[%s8700_s5 + $0x30] sm:$0xff]  }
 0x4b3   :  { %v2819_v43 = vmax.f32 %v2814_v40, 0.0  ;;  %v7165_v45 = vpop.f32.mrb[11].mxu1  ;;  %v7947_v42 = vld [vmem:[%s8700_s5 + $0x38] sm:$0xff]  }
 0x4b4   :  { %v7949_v45 = vld [vmem:[%s8726_s13 + $0x8] sm:$0xff]  }
 0x4b5   :  { %v2820_v47 = vpack.c.bf16 %v2819_v43, %v2819_v43  ;;  %v7948_v43 = vld [vmem:[%s8726_s13] sm:$0xff]  }
 0x4b7   :  { %7183 = vmatmul.mubr.bf16.vlgmr.msra.gmra.mrb[12].mxu1 %v2820_v47  ;;  %v7951_v47 = vld [vmem:[%s8726_s13 + $0x18] sm:$0xff]  }
 0x4b8   :  { %7187 = vmatpush3.bf16.msra.mxu1 %v7916_v46  ;;  %7202 = vmatprep.mubr.msk.bf16.mxu1 %vm8123_vm0, %v8120_v63  ;;  %v7950_v46 = vld [vmem:[%s8726_s13 + $0x10] sm:$0xff]  }
 0x4b9   :  { %7188 = vmatprep.subr.bf16.mxu1 %v8120_v63 }
 0x4bc   :  { %7189 = vmatpush3.bf16.msra.mxu1 %v7917_v48  ;;  %v7952_v48 = vld [vmem:[%s8726_s13 + $0x20] sm:$0xff]  }
 0x4bd   :  { %7190 = vmatprep.subr.bf16.mxu1 %v8120_v63 }
 0x4c0   :  { %7191 = vmatpush3.bf16.msra.mxu1 %v7918_v49  ;;  %v7953_v49 = vld [vmem:[%s8726_s13 + $0x28] sm:$0xff]  }
 0x4c1   :  { %7192 = vmatprep.subr.bf16.mxu1 %v8120_v63 }
 0x4c4   :  { %7193 = vmatpush3.bf16.msra.mxu1 %v7919_v50  ;;  %v6664_v50 = vld [vmem:[%s6269_s17] ss:$0 sm:$0xff] }
 0x4c5   :  { %7194 = vmatprep.subr.bf16.mxu1 %v8120_v63 }
 0x4c8   :  { %7195 = vmatpush3.bf16.msra.mxu1 %v7920_v51 }
 0x4c9   :  { %7196 = vmatprep.subr.bf16.mxu1 %v8120_v63 }
 0x4cc   :  { %7197 = vmatpush3.bf16.msra.mxu1 %v7921_v52 }
 0x4cd   :  { %7198 = vmatprep.subr.bf16.mxu1 %v8120_v63 }
 0x4d0   :  { %7199 = vmatpush3.bf16.msra.mxu1 %v7922_v53 }
 0x4d1   :  { %7200 = vmatprep.subr.bf16.mxu1 %v8120_v63 }
 0x4d4   :  { %7201 = vmatpush3.bf16.msra.mxu1 %v7923_v54 }
 0x4d5   :  { %7226 = vmatprep.subr.bf16.mxu1 %v8120_v63 }
 0x58a   :  { %v2926_v3 = vpop.f32.mrb[12].mxu1 }
 0x58b   :  { %v2927_v4 = vadd.f32 %v6637_v2, %v2926_v3  ;;  %v7184_v5 = vpop.f32.mrb[13].mxu1  ;;  %v7957_v2 = vld [vmem:[%s8751_s21 + $0x8] sm:$0xff]   ;;  %v7958_v3 = vld [vmem:[%s8751_s21 + $0x10] sm:$0xff]  }
 0x58c   :  { %v2929_v6 = vpop.f32.mrb[14].mxu1  ;;  %v7960_v5 = vld [vmem:[%s8751_s21 + $0x20] sm:$0xff]  }
 0x58d   :  { %v2932_v7 = vmax.f32 %v2927_v4, 0.0  ;;  %v7185_v8 = vpop.f32.mrb[15].mxu1  ;;  %v7959_v4 = vld [vmem:[%s8751_s21 + $0x18] sm:$0xff]   ;;  %v7961_v6 = vld [vmem:[%s8751_s21 + $0x28] sm:$0xff]  }
 0x58f   :  { %v2933_v9 = vpack.c.bf16 %v2932_v7, %v2932_v7  ;;  %v6673_v7 = vld [vmem:[%s6271_s25] ss:$0 sm:$0xff] }
 0x591   :  { %7203 = vmatmul.mubr.bf16.vlgmr.msra.gmra.mrb[16].mxu1 %v2933_v9 }
 0x592   :  { %7242 = vmatprep.mubr.msk.bf16.mxu1 %vm8123_vm0, %v8120_v63  ;;  %7227 = vmatpush3.bf16.msra.mxu1 %v7932_v13 }
 0x593   :  { %7228 = vmatprep.subr.bf16.mxu1 %v8120_v63 }
 0x596   :  { %7229 = vmatpush3.bf16.msra.mxu1 %v7933_v14 }
 0x597   :  { %7230 = vmatprep.subr.bf16.mxu1 %v8120_v63 }
 0x59a   :  { %7231 = vmatpush3.bf16.msra.mxu1 %v7934_v15 }
 0x59b   :  { %7232 = vmatprep.subr.bf16.mxu1 %v8120_v63 }
 0x59e   :  { %7233 = vmatpush3.bf16.msra.mxu1 %v7935_v17  ;;  %v7962_v17 = vld [vmem:[%s8751_s21 + $0x30] sm:$0xff]  }
 0x59f   :  { %7234 = vmatprep.subr.bf16.mxu1 %v8120_v63 }
 0x5a2   :  { %7235 = vmatpush3.bf16.msra.mxu1 %v7936_v18  ;;  %v7963_v18 = vld [vmem:[%s8751_s21 + $0x38] sm:$0xff]  }
 0x5a3   :  { %7236 = vmatprep.subr.bf16.mxu1 %v8120_v63 }
 0x5a6   :  { %7237 = vmatpush3.bf16.msra.mxu1 %v7937_v19  ;;  %v7964_v19 = vld [vmem:[%s8774_s29] ss:$8 sps:$4 sm:$0xff]  }
 0x5a7   :  { %7238 = vmatprep.subr.bf16.mxu1 %v8120_v63 }
 0x5aa   :  { %7239 = vmatpush3.bf16.msra.mxu1 %v7938_v16  ;;  %v7966_v16 = vld [vmem:[%s8774_s29 + $0x4] ss:$8 sps:$4 sm:$0xff]  }
 0x5ab   :  { %7240 = vmatprep.subr.bf16.mxu1 %v8120_v63 }
 0x5ae   :  { %7241 = vmatpush3.bf16.msra.mxu1 %v7939_v27  ;;  %v7979_v27 = vld [vmem:[%s8774_s29 + $0x50] ss:$8 sps:$4 sm:$0xff]  }
 0x5af   :  { %7266 = vmatprep.subr.bf16.mxu1 %v8120_v63 }
 0x664   :  { %v3039_v20 = vpop.f32.mrb[16].mxu1 }
 0x665   :  { %v3040_v21 = vadd.f32 %v6646_v11, %v3039_v20  ;;  %v7204_v22 = vpop.f32.mrb[17].mxu1  ;;  %v7967_v11 = vld [vmem:[%s8774_s29 + $0x10] ss:$8 sps:$4 sm:$0xff]   ;;  %v7972_v20 = vld [vmem:[%s8774_s29 + $0x24] ss:$8 sps:$4 sm:$0xff]  }
 0x666   :  { %v3042_v23 = vpop.f32.mrb[18].mxu1  ;;  %v7975_v22 = vld [vmem:[%s8774_s29 + $0x34] ss:$8 sps:$4 sm:$0xff]  }
 0x667   :  { %v3045_v24 = vmax.f32 %v3040_v21, 0.0  ;;  %v7205_v25 = vpop.f32.mrb[19].mxu1  ;;  %v7970_v21 = vld [vmem:[%s8774_s29 + $0x20] ss:$8 sps:$4 sm:$0xff]   ;;  %v7973_v23 = vld [vmem:[%s8774_s29 + $0x30] ss:$8 sps:$4 sm:$0xff]  }
 0x668   :  { %v7976_v25 = vld [vmem:[%s8774_s29 + $0x40] ss:$8 sps:$4 sm:$0xff]  }
 0x669   :  { %v3046_v26 = vpack.c.bf16 %v3045_v24, %v3045_v24  ;;  %v7978_v24 = vld [vmem:[%s8774_s29 + $0x44] ss:$8 sps:$4 sm:$0xff]  }
 0x66b   :  { %7223 = vmatmul.mubr.bf16.vlgmr.msra.gmra.mrb[8].mxu0 %v3046_v26  ;;  %v7981_v26 = vld [vmem:[%s8774_s29 + $0x54] ss:$8 sps:$4 sm:$0xff]  }
 0x66c   :  { %7262 = vmatprep.mubr.msk.bf16.mxu0 %vm8123_vm0, %v8120_v63  ;;  %7247 = vmatpush3.bf16.msra.mxu0 %v7940_v28  ;;  %v7984_v28 = vld [vmem:[%s8774_s29 + $0x64] ss:$8 sps:$4 sm:$0xff]  }
 0x66d   :  { %7248 = vmatprep.subr.bf16.mxu0 %v8120_v63 }
 0x670   :  { %7249 = vmatpush3.bf16.msra.mxu0 %v7941_v29  ;;  %v7982_v29 = vld [vmem:[%s8774_s29 + $0x60] ss:$8 sps:$4 sm:$0xff]  }
 0x671   :  { %7250 = vmatprep.subr.bf16.mxu0 %v8120_v63 }
 0x674   :  { %7251 = vmatpush3.bf16.msra.mxu0 %v7942_v30  ;;  %v6682_v30 = vld [vmem:[%s6273_s3] ss:$0 sm:$0xff] }
 0x675   :  { %7252 = vmatprep.subr.bf16.mxu0 %v8120_v63 }
 0x678   :  { %7253 = vmatpush3.bf16.msra.mxu0 %v7943_v31 }
 0x679   :  { %7254 = vmatprep.subr.bf16.mxu0 %v8120_v63 }
 0x67c   :  { %7255 = vmatpush3.bf16.msra.mxu0 %v7944_v32 }
 0x67d   :  { %7256 = vmatprep.subr.bf16.mxu0 %v8120_v63 }
 0x680   :  { %7257 = vmatpush3.bf16.msra.mxu0 %v7945_v33 }
 0x681   :  { %7258 = vmatprep.subr.bf16.mxu0 %v8120_v63 }
 0x684   :  { %7259 = vmatpush3.bf16.msra.mxu0 %v7946_v41  ;;  %v7988_v41 = vld [vmem:[%s8798_s7] ss:$16 sps:$4 sm:$0xff]  }
 0x685   :  { %7260 = vmatprep.subr.bf16.mxu0 %v8120_v63 }
 0x688   :  { %7261 = vmatpush3.bf16.msra.mxu0 %v7947_v42  ;;  %v7990_v42 = vld [vmem:[%s8798_s7 + $0x4] ss:$16 sps:$4 sm:$0xff]  }
 0x689   :  { %7286 = vmatprep.subr.bf16.mxu0 %v8120_v63 }
 0x73e   :  { %v3152_v35 = vpop.f32.mrb[8].mxu0 }
 0x73f   :  { %v3153_v36 = vadd.f32 %v6655_v34, %v3152_v35  ;;  %v7224_v37 = vpop.f32.mrb[9].mxu0 }
 0x740   :  { %v3155_v38 = vpop.f32.mrb[10].mxu0 }
 0x741   :  { %v3158_v39 = vpack.c.bf16 %v3153_v36, %v3153_v36  ;;  %v7225_v40 = vpop.f32.mrb[11].mxu0  ;;  %v7987_v38 = vld [vmem:[%s8774_s29 + $0x74] ss:$8 sps:$4 sm:$0xff]  }
 0x742   :  { %v8140_v40 = vmov 0  }
 0x743   :  { %7243 = vmatmul.mubr.bf16.vlgmr.msra.gmra.mrb[20].mxu1 %v3158_v39  ;;  %v7985_v39 = vld [vmem:[%s8774_s29 + $0x70] ss:$8 sps:$4 sm:$0xff]  }
 0x744   :  { %7282 = vmatprep.mubr.msk.bf16.mxu1 %vm8123_vm0, %v8120_v63  ;;  %7267 = vmatpush3.bf16.msra.mxu1 %v7948_v43  ;;  %v7993_v43 = vld [vmem:[%s8798_s7 + $0xc] ss:$16 sps:$4 sm:$0xff]  }
 0x745   :  { %7268 = vmatprep.subr.bf16.mxu1 %v8120_v63 }
 0x748   :  { %7269 = vmatpush3.bf16.msra.mxu1 %v7949_v45  ;;  %v7996_v45 = vld [vmem:[%s8798_s7 + $0x24] ss:$16 sps:$4 sm:$0xff]  }
 0x749   :  { %7270 = vmatprep.subr.bf16.mxu1 %v8120_v63 }
 0x74c   :  { %7271 = vmatpush3.bf16.msra.mxu1 %v7950_v46  ;;  %v7994_v46 = vld [vmem:[%s8798_s7 + $0x20] ss:$16 sps:$4 sm:$0xff]  }
 0x74d   :  { %7272 = vmatprep.subr.bf16.mxu1 %v8120_v63 }
 0x750   :  { %7273 = vmatpush3.bf16.msra.mxu1 %v7951_v47  ;;  %v8002_v47 = vld [vmem:[%s8798_s7 + $0x44] ss:$16 sps:$4 sm:$0xff]  }
 0x751   :  { %7274 = vmatprep.subr.bf16.mxu1 %v8120_v63 }
 0x754   :  { %7275 = vmatpush3.bf16.msra.mxu1 %v7952_v48  ;;  %v8000_v48 = vld [vmem:[%s8798_s7 + $0x40] ss:$16 sps:$4 sm:$0xff]  }
 0x755   :  { %7276 = vmatprep.subr.bf16.mxu1 %v8120_v63 }
 0x758   :  { %7277 = vmatpush3.bf16.msra.mxu1 %v7953_v49  ;;  %v8008_v49 = vld [vmem:[%s8798_s7 + $0x64] ss:$16 sps:$4 sm:$0xff]  }
 0x759   :  { %7278 = vmatprep.subr.bf16.mxu1 %v8120_v63 }
 0x75c   :  { %7279 = vmatpush3.bf16.msra.mxu1 %v7954_v60  ;;  %v8030_v60 = vld [vmem:[%s8798_s7 + $0xe0] ss:$16 sps:$4 sm:$0xff]  }
 0x75d   :  { %7280 = vmatprep.subr.bf16.mxu1 %v8120_v63 }
 0x760   :  { %7281 = vmatpush3.bf16.msra.mxu1 %v7955_v0  ;;  %v8038_v0 = vld [vmem:[%s8798_s7 + $0x104] ss:$16 sps:$4 sm:$0xff]  }
 0x761   :  { %3719 = vmatprep.subr.bf16.mxu1 %v7966_v16 }
 0x816   :  { %v3264_v51 = vpop.f32.mrb[20].mxu1 }
 0x817   :  { %v3265_v52 = vadd.f32 %v6664_v50, %v3264_v51  ;;  %v7244_v53 = vpop.f32.mrb[21].mxu1  ;;  %v8006_v50 = vld [vmem:[%s8798_s7 + $0x60] ss:$16 sps:$4 sm:$0xff]   ;;  %v8014_v51 = vld [vmem:[%s8798_s7 + $0x84] ss:$16 sps:$4 sm:$0xff]  }
 0x818   :  { %v3267_v54 = vpop.f32.mrb[22].mxu1  ;;  %v8020_v53 = vld [vmem:[%s8798_s7 + $0xa4] ss:$16 sps:$4 sm:$0xff]  }
 0x819   :  { %v3270_v55 = vmax.f32 %v3265_v52, 0.0  ;;  %v7245_v56 = vpop.f32.mrb[23].mxu1  ;;  %v8012_v52 = vld [vmem:[%s8798_s7 + $0x80] ss:$16 sps:$4 sm:$0xff]  }
 0x81a   :  { %v8018_v54 = vld [vmem:[%s8798_s7 + $0xa0] ss:$16 sps:$4 sm:$0xff]  }
 0x81b   :  { %v3271_v57 = vpack.c.bf16 %v3270_v55, %v3270_v55  ;;  %v8026_v55 = vld [vmem:[%s8798_s7 + $0xc4] ss:$16 sps:$4 sm:$0xff]   ;;  %v8024_v56 = vld [vmem:[%s8798_s7 + $0xc0] ss:$16 sps:$4 sm:$0xff]  }
 0x81d   :  { %7263 = vmatmul.mubr.bf16.vlgmr.msra.gmra.mrb[12].mxu0 %v3271_v57  ;;  %v8032_v57 = vld [vmem:[%s8798_s7 + $0xe4] ss:$16 sps:$4 sm:$0xff]  }
 0x81e   :  { %7302 = vmatprep.mubr.msk.bf16.mxu0 %vm8123_vm0, %v8120_v63  ;;  %7287 = vmatpush3.bf16.msra.mxu0 %v7956_v1  ;;  %v8036_v1 = vld [vmem:[%s8798_s7 + $0x100] ss:$16 sps:$4 sm:$0xff]  }
 0x81f   :  { %7288 = vmatprep.subr.bf16.mxu0 %v8120_v63 }
 0x822   :  { %7289 = vmatpush3.bf16.msra.mxu0 %v7957_v2  ;;  %v8044_v2 = vld [vmem:[%s8798_s7 + $0x124] ss:$16 sps:$4 sm:$0xff]  }
 0x823   :  { %7290 = vmatprep.subr.bf16.mxu0 %v8120_v63 }
 0x826   :  { %7291 = vmatpush3.bf16.msra.mxu0 %v7958_v3  ;;  %v8042_v3 = vld [vmem:[%s8798_s7 + $0x120] ss:$16 sps:$4 sm:$0xff]  }
 0x827   :  { %7292 = vmatprep.subr.bf16.mxu0 %v8120_v63 }
 0x82a   :  { %7293 = vmatpush3.bf16.msra.mxu0 %v7959_v4  ;;  %v8050_v4 = vld [vmem:[%s8798_s7 + $0x144] ss:$16 sps:$4 sm:$0xff]  }
 0x82b   :  { %7294 = vmatprep.subr.bf16.mxu0 %v8120_v63 }
 0x82e   :  { %7295 = vmatpush3.bf16.msra.mxu0 %v7960_v5  ;;  %v8048_v5 = vld [vmem:[%s8798_s7 + $0x140] ss:$16 sps:$4 sm:$0xff]  }
 0x82f   :  { %7296 = vmatprep.subr.bf16.mxu0 %v8120_v63 }
 0x832   :  { %7297 = vmatpush3.bf16.msra.mxu0 %v7961_v6  ;;  %v8056_v6 = vld [vmem:[%s8798_s7 + $0x164] ss:$16 sps:$4 sm:$0xff]  }
 0x833   :  { %7298 = vmatprep.subr.bf16.mxu0 %v8120_v63 }
 0x836   :  { %7299 = vmatpush3.bf16.msra.mxu0 %v7962_v17 }
 0x837   :  { %7300 = vmatprep.subr.bf16.mxu0 %v8120_v63  ;;  %v7969_v63 = vld [vmem:[%s8774_s29 + $0x14] ss:$8 sps:$4 sm:$0xff]  }
 0x83a   :  { %7301 = vmatpush3.bf16.msra.mxu0 %v7963_v18 }
 0x83b   :  { %4170 = vmatprep.subr.bf16.mxu0 %v7990_v42  ;;  %v8065_v42 = vld [vmem:[%s8798_s7 + $0x18c] ss:$16 sps:$4 sm:$0xff]  }
 0x8f0   :  { %v3377_v8 = vpop.f32.mrb[12].mxu0 }
 0x8f1   :  { %v3378_v9 = vadd.f32 %v6673_v7, %v3377_v8  ;;  %v7264_v10 = vpop.f32.mrb[13].mxu0  ;;  %v8054_v7 = vld [vmem:[%s8798_s7 + $0x160] ss:$16 sps:$4 sm:$0xff]   ;;  %v8062_v8 = vld [vmem:[%s8798_s7 + $0x184] ss:$16 sps:$4 sm:$0xff]  }
 0x8f2   :  { %v3380_v12 = vpop.f32.mrb[14].mxu0  ;;  %v8068_v10 = vld [vmem:[%s8798_s7 + $0x1a4] ss:$16 sps:$4 sm:$0xff]  }
 0x8f3   :  { %v3383_v13 = vmax.f32 %v3378_v9, 0.0  ;;  %v7265_v14 = vpop.f32.mrb[15].mxu0  ;;  %v8060_v9 = vld [vmem:[%s8798_s7 + $0x180] ss:$16 sps:$4 sm:$0xff]  }
 0x8f4   :  { %v8066_v12 = vld [vmem:[%s8798_s7 + $0x1a0] ss:$16 sps:$4 sm:$0xff]  }
 0x8f5   :  { %v3384_v15 = vpack.c.bf16 %v3383_v13, %v3383_v13  ;;  %v6691_v13 = vld [vmem:[%s6275_s11] ss:$0 sm:$0xff] }
 0x8f7   :  { %7283 = vmatmul.mubr.bf16.vlgmr.msra.gmra.mrb[24].mxu1 %v3384_v15 }
 0x8f8   :  { %3720 = vmatpush1.bf16.msra.mxu1 %v7964_v19  ;;  %3751 = vmatprep.mubr.bf16.mxu1 %v8140_v40  ;;  %v8059_v40 = vld [vmem:[%s8798_s7 + $0x16c] ss:$16 sps:$4 sm:$0xff]  }
 0x8f9   :  { %3721 = vmatprep.subr.bf16.mxu1 %v7969_v63  ;;  %v7991_v63 = vld [vmem:[%s8798_s7 + $0x8] ss:$16 sps:$4 sm:$0xff]  }
 0x8fc   :  { %3722 = vmatpush1.bf16.msra.mxu1 %v7967_v11 }
 0x8fd   :  { %3723 = vmatprep.subr.bf16.mxu1 %v7972_v20  ;;  %v7999_v20 = vld [vmem:[%s8798_s7 + $0x2c] ss:$16 sps:$4 sm:$0xff]  }
 0x900   :  { %3724 = vmatpush1.bf16.msra.mxu1 %v7970_v21  ;;  %v7997_v21 = vld [vmem:[%s8798_s7 + $0x28] ss:$16 sps:$4 sm:$0xff]  }
 0x901   :  { %3725 = vmatprep.subr.bf16.mxu1 %v7975_v22  ;;  %v8005_v22 = vld [vmem:[%s8798_s7 + $0x4c] ss:$16 sps:$4 sm:$0xff]  }
 0x904   :  { %3726 = vmatpush1.bf16.msra.mxu1 %v7973_v23  ;;  %v8003_v23 = vld [vmem:[%s8798_s7 + $0x48] ss:$16 sps:$4 sm:$0xff]  }
 0x905   :  { %3727 = vmatprep.subr.bf16.mxu1 %v7978_v24  ;;  %v8011_v24 = vld [vmem:[%s8798_s7 + $0x6c] ss:$16 sps:$4 sm:$0xff]  }
 0x908   :  { %3728 = vmatpush1.bf16.msra.mxu1 %v7976_v25  ;;  %v8009_v25 = vld [vmem:[%s8798_s7 + $0x68] ss:$16 sps:$4 sm:$0xff]  }
 0x909   :  { %3729 = vmatprep.subr.bf16.mxu1 %v7981_v26  ;;  %v8017_v26 = vld [vmem:[%s8798_s7 + $0x8c] ss:$16 sps:$4 sm:$0xff]  }
 0x90c   :  { %3730 = vmatpush1.bf16.msra.mxu1 %v7979_v27  ;;  %v8015_v27 = vld [vmem:[%s8798_s7 + $0x88] ss:$16 sps:$4 sm:$0xff]  }
 0x90d   :  { %3731 = vmatprep.subr.bf16.mxu1 %v7984_v28  ;;  %v8023_v28 = vld [vmem:[%s8798_s7 + $0xac] ss:$16 sps:$4 sm:$0xff]  }
 0x910   :  { %3732 = vmatpush1.bf16.msra.mxu1 %v7982_v29  ;;  %v8021_v29 = vld [vmem:[%s8798_s7 + $0xa8] ss:$16 sps:$4 sm:$0xff]  }
 0x911   :  { %3733 = vmatprep.subr.bf16.mxu1 %v7987_v38  ;;  %v8053_v38 = vld [vmem:[%s8798_s7 + $0x14c] ss:$16 sps:$4 sm:$0xff]  }
 0x914   :  { %3734 = vmatpush1.bf16.msra.mxu1 %v7985_v39  ;;  %v8051_v39 = vld [vmem:[%s8798_s7 + $0x148] ss:$16 sps:$4 sm:$0xff]  }
 0x915   :  { %4211 = vmatprep.subr.bf16.mxu1 %v7993_v43  ;;  %v8063_v43 = vld [vmem:[%s8798_s7 + $0x188] ss:$16 sps:$4 sm:$0xff]  }
 0x9ca   :  { %v3490_v31 = vpop.f32.mrb[24].mxu1 }
 0x9cb   :  { %v3491_v32 = vadd.f32 %v6682_v30, %v3490_v31  ;;  %v7284_v33 = vpop.f32.mrb[25].mxu1  ;;  %v8029_v30 = vld [vmem:[%s8798_s7 + $0xcc] ss:$16 sps:$4 sm:$0xff]   ;;  %v8027_v31 = vld [vmem:[%s8798_s7 + $0xc8] ss:$16 sps:$4 sm:$0xff]  }
 0x9cc   :  { %v3493_v34 = vpop.f32.mrb[26].mxu1  ;;  %v8033_v33 = vld [vmem:[%s8798_s7 + $0xe8] ss:$16 sps:$4 sm:$0xff]  }
 0x9cd   :  { %v3496_v35 = vmax.f32 %v3491_v32, 0.0  ;;  %v7285_v36 = vpop.f32.mrb[27].mxu1  ;;  %v8035_v32 = vld [vmem:[%s8798_s7 + $0xec] ss:$16 sps:$4 sm:$0xff]  }
 0x9ce   :  { %v8041_v34 = vld [vmem:[%s8798_s7 + $0x10c] ss:$16 sps:$4 sm:$0xff]  }
 0x9cf   :  { %v3497_v37 = vpack.c.bf16 %v3496_v35, %v3496_v35  ;;  %v8039_v35 = vld [vmem:[%s8798_s7 + $0x108] ss:$16 sps:$4 sm:$0xff]   ;;  %v8047_v36 = vld [vmem:[%s8798_s7 + $0x12c] ss:$16 sps:$4 sm:$0xff]  }
 0x9d1   :  { %7303 = vmatmul.mubr.bf16.vlgmr.msra.gmra.mrb[16].mxu0 %v3497_v37  ;;  %v8045_v37 = vld [vmem:[%s8798_s7 + $0x128] ss:$16 sps:$4 sm:$0xff]  }
 0x9d2   :  { %4171 = vmatpush1.bf16.msra.mxu0 %v7988_v41  ;;  %v8057_v41 = vld [vmem:[%s8798_s7 + $0x168] ss:$16 sps:$4 sm:$0xff]  }
 0x9d3   :  { %4172 = vmatprep.subr.bf16.mxu0 %v7996_v45  ;;  %v8071_v45 = vld [vmem:[%s8798_s7 + $0x1ac] ss:$16 sps:$4 sm:$0xff]  }
 0x9d6   :  { %4173 = vmatpush1.bf16.msra.mxu0 %v7994_v46  ;;  %v8069_v46 = vld [vmem:[%s8798_s7 + $0x1a8] ss:$16 sps:$4 sm:$0xff]  }
 0x9d7   :  { %4174 = vmatprep.subr.bf16.mxu0 %v8002_v47  ;;  %v8074_v47 = vld [vmem:[%s8798_s7 + $0x1c4] ss:$16 sps:$4 sm:$0xff]  }
 0x9da   :  { %4175 = vmatpush1.bf16.msra.mxu0 %v8000_v48  ;;  %v8077_v48 = vld [vmem:[%s8798_s7 + $0x1cc] ss:$16 sps:$4 sm:$0xff]  }
 0x9db   :  { %4176 = vmatprep.subr.bf16.mxu0 %v8008_v49  ;;  %v8072_v49 = vld [vmem:[%s8798_s7 + $0x1c0] ss:$16 sps:$4 sm:$0xff]  }
 0x9de   :  { %4177 = vmatpush1.bf16.msra.mxu0 %v8006_v50  ;;  %v8075_v50 = vld [vmem:[%s8798_s7 + $0x1c8] ss:$16 sps:$4 sm:$0xff]  }
 0x9df   :  { %4178 = vmatprep.subr.bf16.mxu0 %v8014_v51  ;;  %v8080_v51 = vld [vmem:[%s8798_s7 + $0x1e4] ss:$16 sps:$4 sm:$0xff]  }
 0x9e2   :  { %4179 = vmatpush1.bf16.msra.mxu0 %v8012_v52  ;;  %v8083_v52 = vld [vmem:[%s8798_s7 + $0x1ec] ss:$16 sps:$4 sm:$0xff]  }
 0x9e3   :  { %4180 = vmatprep.subr.bf16.mxu0 %v8020_v53  ;;  %v8078_v53 = vld [vmem:[%s8798_s7 + $0x1e0] ss:$16 sps:$4 sm:$0xff]  }
 0x9e6   :  { %4181 = vmatpush1.bf16.msra.mxu0 %v8018_v54  ;;  %v8081_v54 = vld [vmem:[%s8798_s7 + $0x1e8] ss:$16 sps:$4 sm:$0xff]  }
 0x9e7   :  { %4182 = vmatprep.subr.bf16.mxu0 %v8026_v55  ;;  %v4260_v55 = vld [vmem:[%s8870_s15] sm:$0xff] }
 0x9ea   :  { %4183 = vmatpush1.bf16.msra.mxu0 %v8024_v56  ;;  %v4264_v56 = vld [vmem:[%s8870_s15 + $0x20] sm:$0xff] }
 0x9eb   :  { %4184 = vmatprep.subr.bf16.mxu0 %v8032_v57  ;;  %v4261_v57 = vld [vmem:[%s8870_s15 + $0x8] sm:$0xff] }
 0x9ee   :  { %4185 = vmatpush1.bf16.msra.mxu0 %v8030_v60  ;;  %v6780_v60 = vcombine.low %v4260_v55, %v4264_v56 }
 0x9ef   :  { %4186 = vmatprep.subr.bf16.mxu0 %v8038_v0  ;;  %v6781_v0 = vcombine.high %v4260_v55, %v4264_v56  ;;  %v4308_v55 = vld [vmem:[%s8870_s15 + $0x180] sm:$0xff] }
 0x9f0   :  { %v4312_v56 = vld [vmem:[%s8870_s15 + $0x1a0] sm:$0xff] }
 0x9f2   :  { %4187 = vmatpush1.bf16.msra.mxu0 %v8036_v1  ;;  %v4265_v1 = vld [vmem:[%s8870_s15 + $0x28] sm:$0xff] }
 0x9f3   :  { %4188 = vmatprep.subr.bf16.mxu0 %v8044_v2  ;;  %v6782_v2 = vcombine.low %v4261_v57, %v4265_v1 }
 0x9f6   :  { %4189 = vmatpush1.bf16.msra.mxu0 %v8042_v3  ;;  %v6783_v3 = vcombine.high %v4261_v57, %v4265_v1  ;;  %v4309_v57 = vld [vmem:[%s8870_s15 + $0x188] sm:$0xff] }
 0x9f7   :  { %4190 = vmatprep.subr.bf16.mxu0 %v8050_v4  ;;  %v3627_v4 = vld [vmem:[%s6277_s19] sm:$0x3] }
 0x9fa   :  { %4191 = vmatpush1.bf16.msra.mxu0 %v8048_v5  ;;  %v3632_v5 = vrot.slane %v3627_v4, %v8502_v59 }
 0x9fb   :  { %4192 = vmatprep.subr.bf16.mxu0 %v8056_v6  ;;  %v3636_v6 = vrot.slane %v3627_v4, %v8507_v61  ;;  %v4316_v4 = vld [vmem:[%s8870_s15 + $0x1c0] sm:$0xff] }
 0x9fe   :  { %4193 = vmatpush1.bf16.msra.mxu0 %v8054_v7 }
 0x9ff   :  { %4194 = vmatprep.subr.bf16.mxu0 %v8062_v8 }
 0xa02   :  { %4195 = vmatpush1.bf16.msra.mxu0 %v8060_v9 }
 0xa03   :  { %4196 = vmatprep.subr.bf16.mxu0 %v8068_v10 }
 0xa06   :  { %4197 = vmatpush1.bf16.msra.mxu0 %v8066_v12 }
 0xa07   :  { %4198 = vmatprep.subr.bf16.mxu0 %v8074_v47  ;;  %v4300_v47 = vld [vmem:[%s8870_s15 + $0x140] sm:$0xff] }
 0xa0a   :  { %4199 = vmatpush1.bf16.msra.mxu0 %v8072_v49  ;;  %v4301_v49 = vld [vmem:[%s8870_s15 + $0x148] sm:$0xff] }
 0xa0b   :  { %4200 = vmatprep.subr.bf16.mxu0 %v8080_v51 }
 0xa0e   :  { %4201 = vmatpush1.bf16.msra.mxu0 %v8078_v53 }
 0xa0f   :  { %5838 = vmatprep.subr.bf16.mxu0 %v6781_v0 }
 0xaa4   :  { %v3603_v14 = vpop.f32.mrb[16].mxu0 }
 0xaa5   :  { %v3604_v15 = vadd.f32 %v6691_v13, %v3603_v14  ;;  %v7304_v17 = vpop.f32.mrb[17].mxu0 }
 0xaa6   :  { %v3606_v18 = vpop.f32.mrb[18].mxu0 }
 0xaa7   :  { %v3609_v19 = vmax.f32 %v3604_v15, 0.0  ;;  %v7305_v16 = vpop.f32.mrb[19].mxu0  ;;  %v4268_v15 = vld [vmem:[%s8870_s15 + $0x40] sm:$0xff] }
 0xaa8   :  { %v4272_v18 = vld [vmem:[%s8870_s15 + $0x60] sm:$0xff]  ;;  %v4273_v16 = vld [vmem:[%s8870_s15 + $0x68] sm:$0xff] }
 0xaa9   :  { %v3610_v11 = vpack.c.bf16 %v3609_v19, %v3609_v19  ;;  %v4269_v19 = vld [vmem:[%s8870_s15 + $0x48] sm:$0xff] }
 0xaab   :  { %3752 = vmatmul.mubr.bf16.vlgmr.msra.gmra.mrb[28].mxu1 %v3610_v11 }
 0xaac   :  { %4212 = vmatpush1.bf16.msra.mxu1 %v7991_v63 }
 0xaad   :  { %4213 = vmatprep.subr.bf16.mxu1 %v7999_v20  ;;  %v6789_v20 = vcombine.high %v4268_v15, %v4272_v18 }
 0xab0   :  { %4214 = vmatpush1.bf16.msra.mxu1 %v7997_v21  ;;  %v6791_v21 = vcombine.high %v4269_v19, %v4273_v16 }
 0xab1   :  { %4215 = vmatprep.subr.bf16.mxu1 %v8005_v22  ;;  %v4276_v22 = vld [vmem:[%s8870_s15 + $0x80] sm:$0xff] }
 0xab4   :  { %4216 = vmatpush1.bf16.msra.mxu1 %v8003_v23  ;;  %v4280_v23 = vld [vmem:[%s8870_s15 + $0xa0] sm:$0xff] }
 0xab5   :  { %4217 = vmatprep.subr.bf16.mxu1 %v8011_v24  ;;  %v4277_v24 = vld [vmem:[%s8870_s15 + $0x88] sm:$0xff] }
 0xab8   :  { %4218 = vmatpush1.bf16.msra.mxu1 %v8009_v25  ;;  %v4281_v25 = vld [vmem:[%s8870_s15 + $0xa8] sm:$0xff] }
 0xab9   :  { %4219 = vmatprep.subr.bf16.mxu1 %v8017_v26  ;;  %v6788_v26 = vcombine.low %v4268_v15, %v4272_v18  ;;  %v4325_v15 = vld [vmem:[%s8870_s15 + $0x208] sm:$0xff] }
 0xabc   :  { %4220 = vmatpush1.bf16.msra.mxu1 %v8015_v27  ;;  %v6790_v27 = vcombine.low %v4269_v19, %v4273_v16 }
 0xabd   :  { %4221 = vmatprep.subr.bf16.mxu1 %v8023_v28  ;;  %v6797_v28 = vcombine.high %v4276_v22, %v4280_v23 }
 0xac0   :  { %4222 = vmatpush1.bf16.msra.mxu1 %v8021_v29  ;;  %v6799_v29 = vcombine.high %v4277_v24, %v4281_v25 }
 0xac1   :  { %4223 = vmatprep.subr.bf16.mxu1 %v8029_v30  ;;  %v4284_v30 = vld [vmem:[%s8870_s15 + $0xc0] sm:$0xff] }
 0xac4   :  { %4224 = vmatpush1.bf16.msra.mxu1 %v8027_v31  ;;  %v4288_v31 = vld [vmem:[%s8870_s15 + $0xe0] sm:$0xff] }
 0xac5   :  { %4225 = vmatprep.subr.bf16.mxu1 %v8035_v32  ;;  %v4285_v32 = vld [vmem:[%s8870_s15 + $0xc8] sm:$0xff] }
 0xac8   :  { %4226 = vmatpush1.bf16.msra.mxu1 %v8033_v33  ;;  %v4289_v33 = vld [vmem:[%s8870_s15 + $0xe8] sm:$0xff] }
 0xac9   :  { %4227 = vmatprep.subr.bf16.mxu1 %v8041_v34  ;;  %v6796_v34 = vcombine.low %v4276_v22, %v4280_v23  ;;  %v4337_v22 = vld [vmem:[%s8870_s15 + $0x268] sm:$0xff] }
 0xacc   :  { %4228 = vmatpush1.bf16.msra.mxu1 %v8039_v35  ;;  %v6798_v35 = vcombine.low %v4277_v24, %v4281_v25 }
 0xacd   :  { %4229 = vmatprep.subr.bf16.mxu1 %v8047_v36  ;;  %v6805_v36 = vcombine.high %v4284_v30, %v4288_v31 }
 0xad0   :  { %4230 = vmatpush1.bf16.msra.mxu1 %v8045_v37  ;;  %v6807_v37 = vcombine.high %v4285_v32, %v4289_v33 }
 0xad1   :  { %4231 = vmatprep.subr.bf16.mxu1 %v8053_v38  ;;  %v4292_v38 = vld [vmem:[%s8870_s15 + $0x100] sm:$0xff] }
 0xad4   :  { %4232 = vmatpush1.bf16.msra.mxu1 %v8051_v39  ;;  %v4296_v39 = vld [vmem:[%s8870_s15 + $0x120] sm:$0xff] }
 0xad5   :  { %4233 = vmatprep.subr.bf16.mxu1 %v8059_v40  ;;  %v4293_v40 = vld [vmem:[%s8870_s15 + $0x108] sm:$0xff]  ;;  %v6812_v51 = vcombine.low %v4292_v38, %v4296_v39 }
 0xad8   :  { %4234 = vmatpush1.bf16.msra.mxu1 %v8057_v41  ;;  %v4297_v41 = vld [vmem:[%s8870_s15 + $0x128] sm:$0xff] }
 0xad9   :  { %4235 = vmatprep.subr.bf16.mxu1 %v8065_v42  ;;  %v6804_v42 = vcombine.low %v4284_v30, %v4288_v31  ;;  %v4345_v30 = vld [vmem:[%s8870_s15 + $0x2a8] sm:$0xff] }
 0xadc   :  { %4236 = vmatpush1.bf16.msra.mxu1 %v8063_v43  ;;  %v6806_v43 = vcombine.low %v4285_v32, %v4289_v33 }
 0xadd   :  { %4237 = vmatprep.subr.bf16.mxu1 %v8071_v45  ;;  %v6813_v45 = vcombine.high %v4292_v38, %v4296_v39  ;;  %v4353_v38 = vld [vmem:[%s8870_s15 + $0x2e8] sm:$0xff] }
 0xae0   :  { %4238 = vmatpush1.bf16.msra.mxu1 %v8069_v46  ;;  %v6815_v46 = vcombine.high %v4293_v40, %v4297_v41 }
 0xae1   :  { %4239 = vmatprep.subr.bf16.mxu1 %v8077_v48  ;;  %v4304_v48 = vld [vmem:[%s8870_s15 + $0x160] sm:$0xff] }
 0xae2   :  { %v6821_v53 = vcombine.high %v4300_v47, %v4304_v48  ;;  %v6820_v0 = vcombine.low %v4300_v47, %v4304_v48  ;;  %v4361_v47 = vld [vmem:[%s8870_s15 + $0x328] sm:$0xff] }
 0xae4   :  { %4240 = vmatpush1.bf16.msra.mxu1 %v8075_v50  ;;  %v4305_v50 = vld [vmem:[%s8870_s15 + $0x168] sm:$0xff] }
 0xae5   :  { %4241 = vmatprep.subr.bf16.mxu1 %v8083_v52  ;;  %v6814_v52 = vcombine.low %v4293_v40, %v4297_v41  ;;  %v6822_v1 = vcombine.low %v4301_v49, %v4305_v50 }
 0xae8   :  { %4242 = vmatpush1.bf16.msra.mxu1 %v8081_v54  ;;  %v6823_v54 = vcombine.high %v4301_v49, %v4305_v50 }
 0xae9   :  { %5920 = vmatprep.subr.bf16.mxu1 %v6783_v3 }
 0xb7e   :  { %v3753_v7 = vpop.f32.mrb[28].mxu1 }
 0xb7f   :  { %v3754_v8 = vadd.f32 %v3753_v7, %v3632_v5  ;;  %v3755_v9 = vpop.f32.mrb[29].mxu1  ;;  %v4320_v5 = vld [vmem:[%s8870_s15 + $0x1e0] sm:$0xff]  ;;  %v4321_v7 = vld [vmem:[%s8870_s15 + $0x1e8] sm:$0xff] }
 0xb80   :  { %v3756_v10 = vadd.f32 %v3755_v9, %v3636_v6  ;;  %v3757_v12 = vpop.f32.mrb[30].mxu1  ;;  %v4317_v6 = vld [vmem:[%s8870_s15 + $0x1c8] sm:$0xff]  ;;  %v6836_v18 = vcombine.low %v4316_v4, %v4320_v5 }
 0xb81   :  { %v3760_v13 = vmax.f32 %v3754_v8, 0.0  ;;  %v3758_v14 = vpop.f32.mrb[31].mxu1  ;;  %v6828_v8 = vcombine.low %v4308_v55, %v4312_v56  ;;  %v6839_v12 = vcombine.high %v4317_v6, %v4321_v7  ;;  %v6838_v19 = vcombine.low %v4317_v6, %v4321_v7  ;;  %v4377_v7 = vld [vmem:[%s8870_s15 + $0x3a8] sm:$0xff] }
 0xb82   :  { %v3761_v17 = vmax.f32 %v3756_v10, 0.0  ;;  %v6837_v10 = vcombine.high %v4316_v4, %v4320_v5  ;;  %v4328_v14 = vld [vmem:[%s8870_s15 + $0x220] sm:$0xff]  ;;  %v4373_v5 = vld [vmem:[%s8870_s15 + $0x388] sm:$0xff] }
 0xb83   :  { %v3762_v11 = vpack.c.bf16 %v3760_v13, %v3760_v13  ;;  %v4324_v13 = vld [vmem:[%s8870_s15 + $0x200] sm:$0xff] }
 0xb84   :  { %v3763_v63 = vpack.c.bf16 %v3761_v17, %v3761_v17  ;;  %v4329_v17 = vld [vmem:[%s8870_s15 + $0x228] sm:$0xff]  ;;  %v6845_v16 = vcombine.high %v4324_v13, %v4328_v14  ;;  %v6844_v23 = vcombine.low %v4324_v13, %v4328_v14  ;;  %v4376_v4 = vld [vmem:[%s8870_s15 + $0x3a0] sm:$0xff] }
 0xb85   :  { %v6846_v24 = vcombine.low %v4325_v15, %v4329_v17  ;;  %v4384_v13 = vld [vmem:[%s8870_s15 + $0x3e0] sm:$0xff]  ;;  %v4381_v14 = vld [vmem:[%s8870_s15 + $0x3c8] sm:$0xff] }
 0xb86   :  { %4202 = vmatprep.mubr.bf16.mxu0 %v3763_v63  ;;  %4243 = vmatprep.mubr.bf16.mxu1 %v3763_v63  ;;  %v6847_v63 = vcombine.high %v4325_v15, %v4329_v17  ;;  %v4385_v17 = vld [vmem:[%s8870_s15 + $0x3e8] sm:$0xff] }
 0xb87   :  { %4203 = vmatmul.mubr.bf16.vlgmr.msra.gmra.mrb[20].mxu0 %v3762_v11  ;;  %4244 = vmatmul.mubr.bf16.vlgmr.msra.gmra.mrb[32].mxu1 %v3762_v11  ;;  %v4332_v11 = vld [vmem:[%s8870_s15 + $0x240] sm:$0xff] }
 0xb88   :  { %5839 = vmatpush1.bf16.msra.mxu0 %v6780_v60  ;;  %5921 = vmatpush1.bf16.msra.mxu1 %v6782_v2  ;;  %v4313_v60 = vld [vmem:[%s8870_s15 + $0x1a8] sm:$0xff]  ;;  %v6829_v2 = vcombine.high %v4308_v55, %v4312_v56 }
 0xb89   :  { %5840 = vmatprep.subr.bf16.mxu0 %v6789_v20  ;;  %5922 = vmatprep.subr.bf16.mxu1 %v6791_v21  ;;  %v6831_v3 = vcombine.high %v4309_v57, %v4313_v60  ;;  %v6830_v9 = vcombine.low %v4309_v57, %v4313_v60  ;;  %v4336_v20 = vld [vmem:[%s8870_s15 + $0x260] sm:$0xff]  ;;  %v4333_v21 = vld [vmem:[%s8870_s15 + $0x248] sm:$0xff] }
 0xb8a   :  { %v6853_v25 = vcombine.high %v4332_v11, %v4336_v20  ;;  %v6852_v31 = vcombine.low %v4332_v11, %v4336_v20  ;;  %v6854_v32 = vcombine.low %v4333_v21, %v4337_v22  ;;  %v4369_v55 = vld [vmem:[%s8870_s15 + $0x368] sm:$0xff]  ;;  %v4392_v11 = vld [vmem:[%s8870_s15 + $0x420] sm:$0xff] }
 0xb8b   :  { %v4389_v20 = vld [vmem:[%s8870_s15 + $0x408] sm:$0xff] }
 0xb8c   :  { %5841 = vmatpush1.bf16.msra.mxu0 %v6788_v26  ;;  %5923 = vmatpush1.bf16.msra.mxu1 %v6790_v27  ;;  %v6855_v26 = vcombine.high %v4333_v21, %v4337_v22  ;;  %v4340_v27 = vld [vmem:[%s8870_s15 + $0x280] sm:$0xff]  ;;  %v4393_v22 = vld [vmem:[%s8870_s15 + $0x428] sm:$0xff] }
 0xb8d   :  { %5842 = vmatprep.subr.bf16.mxu0 %v6797_v28  ;;  %5924 = vmatprep.subr.bf16.mxu1 %v6799_v29  ;;  %v4344_v28 = vld [vmem:[%s8870_s15 + $0x2a0] sm:$0xff]  ;;  %v4341_v29 = vld [vmem:[%s8870_s15 + $0x288] sm:$0xff] }
 0xb8e   :  { %v6861_v33 = vcombine.high %v4340_v27, %v4344_v28  ;;  %v6860_v39 = vcombine.low %v4340_v27, %v4344_v28  ;;  %v6862_v40 = vcombine.low %v4341_v29, %v4345_v30 }
 0xb90   :  { %5843 = vmatpush1.bf16.msra.mxu0 %v6796_v34  ;;  %5925 = vmatpush1.bf16.msra.mxu1 %v6798_v35  ;;  %v6863_v34 = vcombine.high %v4341_v29, %v4345_v30  ;;  %v4348_v35 = vld [vmem:[%s8870_s15 + $0x2c0] sm:$0xff] }
 0xb91   :  { %5844 = vmatprep.subr.bf16.mxu0 %v6805_v36  ;;  %5926 = vmatprep.subr.bf16.mxu1 %v6807_v37  ;;  %v4352_v36 = vld [vmem:[%s8870_s15 + $0x2e0] sm:$0xff]  ;;  %v4349_v37 = vld [vmem:[%s8870_s15 + $0x2c8] sm:$0xff] }
 0xb92   :  { %v6869_v41 = vcombine.high %v4348_v35, %v4352_v36  ;;  %v6868_v48 = vcombine.low %v4348_v35, %v4352_v36  ;;  %v6870_v49 = vcombine.low %v4349_v37, %v4353_v38 }
 0xb94   :  { %5845 = vmatpush1.bf16.msra.mxu0 %v6804_v42  ;;  %5927 = vmatpush1.bf16.msra.mxu1 %v6806_v43  ;;  %v6871_v42 = vcombine.high %v4349_v37, %v4353_v38  ;;  %v4356_v43 = vld [vmem:[%s8870_s15 + $0x300] sm:$0xff] }
 0xb95   :  { %5846 = vmatprep.subr.bf16.mxu0 %v6813_v45  ;;  %5928 = vmatprep.subr.bf16.mxu1 %v6815_v46  ;;  %v4360_v45 = vld [vmem:[%s8870_s15 + $0x320] sm:$0xff]  ;;  %v4357_v46 = vld [vmem:[%s8870_s15 + $0x308] sm:$0xff] }
 0xb96   :  { %v6877_v50 = vcombine.high %v4356_v43, %v4360_v45  ;;  %v6876_v56 = vcombine.low %v4356_v43, %v4360_v45  ;;  %v6878_v57 = vcombine.low %v4357_v46, %v4361_v47  ;;  %v4396_v43 = vld [vmem:[%s8870_s15 + $0x440] sm:$0xff] }
 0xb98   :  { %5847 = vmatpush1.bf16.msra.mxu0 %v6812_v51  ;;  %5929 = vmatpush1.bf16.msra.mxu1 %v6814_v52  ;;  %v6879_v51 = vcombine.high %v4357_v46, %v4361_v47  ;;  %v4364_v52 = vld [vmem:[%s8870_s15 + $0x340] sm:$0xff]  ;;  %v4397_v47 = vld [vmem:[%s8870_s15 + $0x448] sm:$0xff] }
 0xb99   :  { %5848 = vmatprep.subr.bf16.mxu0 %v6821_v53  ;;  %5930 = vmatprep.subr.bf16.mxu1 %v6823_v54  ;;  %v4368_v53 = vld [vmem:[%s8870_s15 + $0x360] sm:$0xff]  ;;  %v4365_v54 = vld [vmem:[%s8870_s15 + $0x348] sm:$0xff] }
 0xb9a   :  { %v6885_v60 = vcombine.high %v4364_v52, %v4368_v53  ;;  %v4400_v46 = vld [vmem:[%s8870_s15 + $0x460] sm:$0xff] }
 0xb9c   :  { %5849 = vmatpush1.bf16.msra.mxu0 %v6820_v0  ;;  %5931 = vmatpush1.bf16.msra.mxu1 %v6822_v1  ;;  %v6887_v0 = vcombine.high %v4365_v54, %v4369_v55  ;;  %v6884_v1 = vcombine.low %v4364_v52, %v4368_v53  ;;  %v6917_v52 = vcombine.high %v4396_v43, %v4400_v46 }
 0xb9d   :  { %5850 = vmatprep.subr.bf16.mxu0 %v6829_v2  ;;  %5932 = vmatprep.subr.bf16.mxu1 %v6831_v3  ;;  %v6886_v2 = vcombine.low %v4365_v54, %v4369_v55  ;;  %v4372_v3 = vld [vmem:[%s8870_s15 + $0x380] sm:$0xff]  ;;  %v4405_v55 = vld [vmem:[%s8870_s15 + $0x488] sm:$0xff] }
 0xb9e   :  { %v6893_v6 = vcombine.high %v4372_v3, %v4376_v4  ;;  %v4408_v54 = vld [vmem:[%s8870_s15 + $0x4a0] sm:$0xff] }
 0xba0   :  { %5851 = vmatpush1.bf16.msra.mxu0 %v6828_v8  ;;  %5933 = vmatpush1.bf16.msra.mxu1 %v6830_v9  ;;  %v6892_v8 = vcombine.low %v4372_v3, %v4376_v4  ;;  %v6894_v9 = vcombine.low %v4373_v5, %v4377_v7  ;;  %v4412_v3 = vld [vmem:[%s8870_s15 + $0x4c0] sm:$0xff] }
 0xba1   :  { %5852 = vmatprep.subr.bf16.mxu0 %v6837_v10  ;;  %5934 = vmatprep.subr.bf16.mxu1 %v6839_v12  ;;  %v6895_v10 = vcombine.high %v4373_v5, %v4377_v7  ;;  %v4380_v12 = vld [vmem:[%s8870_s15 + $0x3c0] sm:$0xff]  ;;  %v4413_v5 = vld [vmem:[%s8870_s15 + $0x4c8] sm:$0xff] }
 0xba2   :  { %v6901_v15 = vcombine.high %v4380_v12, %v4384_v13  ;;  %v4416_v4 = vld [vmem:[%s8870_s15 + $0x4e0] sm:$0xff] }
 0xba4   :  { %5853 = vmatpush1.bf16.msra.mxu0 %v6836_v18  ;;  %5935 = vmatpush1.bf16.msra.mxu1 %v6838_v19  ;;  %v6900_v18 = vcombine.low %v4380_v12, %v4384_v13  ;;  %v6902_v19 = vcombine.low %v4381_v14, %v4385_v17  ;;  %v4420_v12 = vld [vmem:[%s8870_s15 + $0x500] sm:$0xff] }
 0xba5   :  { %5854 = vmatprep.subr.bf16.mxu0 %v6845_v16  ;;  %5936 = vmatprep.subr.bf16.mxu1 %v6847_v63  ;;  %v6903_v16 = vcombine.high %v4381_v14, %v4385_v17  ;;  %v4388_v63 = vld [vmem:[%s8870_s15 + $0x400] sm:$0xff]  ;;  %v4421_v14 = vld [vmem:[%s8870_s15 + $0x508] sm:$0xff]  ;;  %v6932_v17 = vcombine.low %v4412_v3, %v4416_v4 }
 0xba6   :  { %v6909_v21 = vcombine.high %v4388_v63, %v4392_v11  ;;  %v4424_v13 = vld [vmem:[%s8870_s15 + $0x520] sm:$0xff] }
 0xba8   :  { %5855 = vmatpush1.bf16.msra.mxu0 %v6844_v23  ;;  %5937 = vmatpush1.bf16.msra.mxu1 %v6846_v24  ;;  %v6908_v23 = vcombine.low %v4388_v63, %v4392_v11  ;;  %v6910_v24 = vcombine.low %v4389_v20, %v4393_v22  ;;  %v4428_v63 = vld [vmem:[%s8870_s15 + $0x540] sm:$0xff] }
 0xba9   :  { %5856 = vmatprep.subr.bf16.mxu0 %v6853_v25  ;;  %5938 = vmatprep.subr.bf16.mxu1 %v6855_v26  ;;  %v6911_v25 = vcombine.high %v4389_v20, %v4393_v22  ;;  %v8948_v26 = vld [vmem:[%s6279_s23] sm:$0xf]  ;;  %v4429_v20 = vld [vmem:[%s8870_s15 + $0x548] sm:$0xff]  ;;  %v6940_v22 = vcombine.low %v4420_v12, %v4424_v13 }
 0xbaa   :  { %v3833_v27 = vrot.slane %v8948_v26, %v8502_v59  ;;  %v3837_v28 = vrot.slane %v8948_v26, %v8507_v61  ;;  %v3845_v29 = vrot.slane %v8948_v26, %v8510_v62  ;;  %v4432_v11 = vld [vmem:[%s8870_s15 + $0x560] sm:$0xff] }
 0xbac   :  { %5857 = vmatpush1.bf16.msra.mxu0 %v6852_v31  ;;  %5939 = vmatpush1.bf16.msra.mxu1 %v6854_v32 }
 0xbad   :  { %5858 = vmatprep.subr.bf16.mxu0 %v6861_v33  ;;  %5940 = vmatprep.subr.bf16.mxu1 %v6863_v34 }
 0xbb0   :  { %5859 = vmatpush1.bf16.msra.mxu0 %v6860_v39  ;;  %5941 = vmatpush1.bf16.msra.mxu1 %v6862_v40 }
 0xbb1   :  { %5860 = vmatprep.subr.bf16.mxu0 %v6869_v41  ;;  %5942 = vmatprep.subr.bf16.mxu1 %v6871_v42 }
 0xbb4   :  { %5861 = vmatpush1.bf16.msra.mxu0 %v6868_v48  ;;  %5943 = vmatpush1.bf16.msra.mxu1 %v6870_v49  ;;  %v4401_v48 = vld [vmem:[%s8870_s15 + $0x468] sm:$0xff] }
 0xbb5   :  { %5862 = vmatprep.subr.bf16.mxu0 %v6877_v50  ;;  %5944 = vmatprep.subr.bf16.mxu1 %v6879_v51  ;;  %v4404_v51 = vld [vmem:[%s8870_s15 + $0x480] sm:$0xff]  ;;  %v6919_v53 = vcombine.high %v4397_v47, %v4401_v48 }
 0xbb6   :  { %v6924_v7 = vcombine.low %v4404_v51, %v4408_v54 }
 0xbb8   :  { %5863 = vmatpush1.bf16.msra.mxu0 %v6876_v56  ;;  %5945 = vmatpush1.bf16.msra.mxu1 %v6878_v57  ;;  %v4409_v56 = vld [vmem:[%s8870_s15 + $0x4a8] sm:$0xff] }
 0xbb9   :  { %5864 = vmatprep.subr.bf16.mxu0 %v6885_v60  ;;  %5946 = vmatprep.subr.bf16.mxu1 %v6887_v0  ;;  %v6916_v60 = vcombine.low %v4396_v43, %v4400_v46  ;;  %v6918_v0 = vcombine.low %v4397_v47, %v4401_v48  ;;  %v4456_v46 = vld [vmem:[%s8870_s15 + $0x620] sm:$0xff]  ;;  %v4453_v47 = vld [vmem:[%s8870_s15 + $0x608] sm:$0xff] }
 0xbba   :  { %v4457_v48 = vld [vmem:[%s8870_s15 + $0x628] sm:$0xff] }
 0xbbc   :  { %5865 = vmatpush1.bf16.msra.mxu0 %v6884_v1  ;;  %5947 = vmatpush1.bf16.msra.mxu1 %v6886_v2  ;;  %v6925_v1 = vcombine.high %v4404_v51, %v4408_v54  ;;  %v6927_v2 = vcombine.high %v4405_v55, %v4409_v56  ;;  %v6975_v54 = vcombine.high %v4453_v47, %v4457_v48 }
 0xbbd   :  { %5866 = vmatprep.subr.bf16.mxu0 %v6893_v6  ;;  %5948 = vmatprep.subr.bf16.mxu1 %v6895_v10  ;;  %v4417_v6 = vld [vmem:[%s8870_s15 + $0x4e8] sm:$0xff] }
 0xbbe   :  { %v6935_v10 = vcombine.high %v4413_v5, %v4417_v6 }
 0xbc0   :  { %5867 = vmatpush1.bf16.msra.mxu0 %v6892_v8  ;;  %5949 = vmatpush1.bf16.msra.mxu1 %v6894_v9  ;;  %v6926_v8 = vcombine.low %v4405_v55, %v4409_v56  ;;  %v6933_v9 = vcombine.high %v4412_v3, %v4416_v4  ;;  %v4460_v55 = vld [vmem:[%s8870_s15 + $0x640] sm:$0xff] }
 0xbc1   :  { %5868 = vmatprep.subr.bf16.mxu0 %v6901_v15  ;;  %5950 = vmatprep.subr.bf16.mxu1 %v6903_v16  ;;  %v4425_v15 = vld [vmem:[%s8870_s15 + $0x528] sm:$0xff]  ;;  %v4464_v56 = vld [vmem:[%s8870_s15 + $0x660] sm:$0xff] }
 0xbc2   :  { %v6943_v16 = vcombine.high %v4421_v14, %v4425_v15  ;;  %v6981_v3 = vcombine.high %v4460_v55, %v4464_v56 }
 0xbc4   :  { %5869 = vmatpush1.bf16.msra.mxu0 %v6900_v18  ;;  %5951 = vmatpush1.bf16.msra.mxu1 %v6902_v19  ;;  %v6934_v18 = vcombine.low %v4413_v5, %v4417_v6  ;;  %v6941_v19 = vcombine.high %v4420_v12, %v4424_v13  ;;  %v4468_v5 = vld [vmem:[%s8870_s15 + $0x680] sm:$0xff] }
 0xbc5   :  { %5879 = vmatprep.subr.bf16.mxu0 %v6909_v21  ;;  %5961 = vmatprep.subr.bf16.mxu1 %v6911_v25  ;;  %v4433_v21 = vld [vmem:[%s8870_s15 + $0x568] sm:$0xff]  ;;  %v4472_v6 = vld [vmem:[%s8870_s15 + $0x6a0] sm:$0xff] }
 0xbc6   :  { %v6951_v25 = vcombine.high %v4429_v20, %v4433_v21  ;;  %v6989_v12 = vcombine.high %v4468_v5, %v4472_v6 }
 0xc5a   :  { %v4204_v30 = vpop.f32.mrb[20].mxu0  ;;  %v8956_v31 = vpop.f32.mrb[32].mxu1 }
 0xc5b   :  { %v4205_v32 = vadd.f32 %v4204_v30, %v3833_v27  ;;  %v4206_v33 = vpop.f32.mrb[21].mxu0  ;;  %v4247_v34 = vpop.f32.mrb[33].mxu1  ;;  %v4436_v27 = vld [vmem:[%s8870_s15 + $0x580] sm:$0xff]  ;;  %v4441_v30 = vld [vmem:[%s8870_s15 + $0x5a8] sm:$0xff] }
 0xc5c   :  { %v4207_v35 = vadd.f32 %v4206_v33, %v3837_v28  ;;  %v4248_v36 = vadd.f32 %v4247_v34, %v3845_v29  ;;  %v4208_v37 = vpop.f32.mrb[22].mxu0  ;;  %v4249_v38 = vpop.f32.mrb[34].mxu1  ;;  %v4440_v28 = vld [vmem:[%s8870_s15 + $0x5a0] sm:$0xff]  ;;  %v4437_v29 = vld [vmem:[%s8870_s15 + $0x588] sm:$0xff]  ;;  %v6950_v33 = vcombine.low %v4429_v20, %v4433_v21 }
 0xc5d   :  { %v4252_v39 = vmax.f32 %v4205_v32, 0.0  ;;  %v4209_v40 = vpop.f32.mrb[23].mxu0  ;;  %v4250_v41 = vpop.f32.mrb[35].mxu1  ;;  %v6948_v32 = vcombine.low %v4428_v63, %v4432_v11  ;;  %v6957_v34 = vcombine.high %v4436_v27, %v4440_v28  ;;  %v4448_v37 = vld [vmem:[%s8870_s15 + $0x5e0] sm:$0xff]  ;;  %v4445_v38 = vld [vmem:[%s8870_s15 + $0x5c8] sm:$0xff] }
 0xc5e   :  { %v4253_v42 = vmax.f32 %v4207_v35, 0.0  ;;  %v4255_v45 = vmax.f32 %v4248_v36, 0.0  ;;  %v6959_v35 = vcombine.high %v4437_v29, %v4441_v30  ;;  %v4444_v36 = vld [vmem:[%s8870_s15 + $0x5c0] sm:$0xff]  ;;  %v6956_v40 = vcombine.low %v4436_v27, %v4440_v28 }
 0xc5f   :  { %v8964_v50 = vpack.c.bf16 %v4252_v39, %v4252_v39  ;;  %v4449_v39 = vld [vmem:[%s8870_s15 + $0x5e8] sm:$0xff]  ;;  %v6958_v41 = vcombine.low %v4437_v29, %v4441_v30  ;;  %v6964_v51 = vcombine.low %v4444_v36, %v4448_v37  ;;  %v4484_v20 = vld [vmem:[%s8870_s15 + $0x700] sm:$0xff] }
 0xc60   :  { %v8962_v49 = vpack.c.bf16 %v4253_v42, %v4253_v42  ;;  %v8972_v57 = vpack.c.bf16 %v4255_v45, %v4255_v45  ;;  %v6965_v42 = vcombine.high %v4444_v36, %v4448_v37  ;;  %v6967_v43 = vcombine.high %v4445_v38, %v4449_v39  ;;  %v4452_v45 = vld [vmem:[%s8870_s15 + $0x600] sm:$0xff] }
 0xc61   :  { %v4488_v21 = vld [vmem:[%s8870_s15 + $0x720] sm:$0xff] }
 0xc62   :  { %5870 = vmatprep.mubr.bf16.mxu0 %v8962_v49  ;;  %5952 = vmatprep.mubr.bf16.mxu1 %v8962_v49  ;;  %v7005_v27 = vcombine.high %v4484_v20, %v4488_v21  ;;  %v4492_v29 = vld [vmem:[%s8870_s15 + $0x740] sm:$0xff] }
 0xc63   :  { %5871 = vmatmul.mubr.bf16.vlgmr.msra.gmra.mrb[24].mxu0 %v8964_v50  ;;  %5953 = vmatmul.mubr.bf16.vlgmr.msra.gmra.mrb[36].mxu1 %v8964_v50  ;;  %v4496_v30 = vld [vmem:[%s8870_s15 + $0x760] sm:$0xff] }
 0xc64   :  { %5880 = vmatpush1.bf16.msra.mxu0 %v6908_v23  ;;  %5962 = vmatpush1.bf16.msra.mxu1 %v6910_v24  ;;  %v6942_v23 = vcombine.low %v4421_v14, %v4425_v15  ;;  %v6949_v24 = vcombine.high %v4428_v63, %v4432_v11  ;;  %v4476_v14 = vld [vmem:[%s8870_s15 + $0x6c0] sm:$0xff]  ;;  %v7013_v36 = vcombine.high %v4492_v29, %v4496_v30 }
 0xc65   :  { %5911 = vmatprep.mubr.bf16.mxu0 %v8972_v57  ;;  %5993 = vmatprep.mubr.bf16.mxu1 %v8972_v57  ;;  %v4480_v15 = vld [vmem:[%s8870_s15 + $0x6e0] sm:$0xff] }
 0xc66   :  { %5881 = vmatprep.subr.bf16.mxu0 %v6917_v52  ;;  %5963 = vmatprep.subr.bf16.mxu1 %v6919_v53  ;;  %v6966_v52 = vcombine.low %v4445_v38, %v4449_v39  ;;  %v6973_v53 = vcombine.high %v4452_v45, %v4456_v46  ;;  %v6997_v63 = vcombine.high %v4476_v14, %v4480_v15  ;;  %v4500_v38 = vld [vmem:[%s8870_s15 + $0x780] sm:$0xff] }
 0xc67   :  { %v4504_v39 = vld [vmem:[%s8870_s15 + $0x7a0] sm:$0xff] }
 0xc68   :  { %5882 = vmatpush1.bf16.msra.mxu0 %v6916_v60  ;;  %5964 = vmatpush1.bf16.msra.mxu1 %v6918_v0  ;;  %v4461_v60 = vld [vmem:[%s8870_s15 + $0x648] sm:$0xff] }
 0xc69   :  { %5883 = vmatprep.subr.bf16.mxu0 %v6925_v1  ;;  %5965 = vmatprep.subr.bf16.mxu1 %v6927_v2  ;;  %v4465_v0 = vld [vmem:[%s8870_s15 + $0x668] sm:$0xff]  ;;  %v6972_v1 = vcombine.low %v4452_v45, %v4456_v46  ;;  %v6974_v2 = vcombine.low %v4453_v47, %v4457_v48  ;;  %v3841_v45 = vrot.slane %v8948_v26, %v8546_v44  ;;  %v4508_v48 = vld [vmem:[%s8870_s15 + $0x7c0] sm:$0xff] }
 0xc6a   :  { %v6983_v4 = vcombine.high %v4461_v60, %v4465_v0  ;;  %v7021_v46 = vcombine.high %v4500_v38, %v4504_v39 }
 0xc6c   :  { %5884 = vmatpush1.bf16.msra.mxu0 %v6924_v7  ;;  %5966 = vmatpush1.bf16.msra.mxu1 %v6926_v8  ;;  %v4469_v7 = vld [vmem:[%s8870_s15 + $0x688] sm:$0xff] }
 0xc6d   :  { %5885 = vmatprep.subr.bf16.mxu0 %v6933_v9  ;;  %5967 = vmatprep.subr.bf16.mxu1 %v6935_v10  ;;  %v4473_v8 = vld [vmem:[%s8870_s15 + $0x6a8] sm:$0xff]  ;;  %v6980_v9 = vcombine.low %v4460_v55, %v4464_v56  ;;  %v6982_v10 = vcombine.low %v4461_v60, %v4465_v0  ;;  %v4246_v56 = vadd.f32 %v8956_v31, %v3841_v45  ;;  %v4262_v0 = vld [vmem:[%s8870_s15 + $0x10] sm:$0xff]  ;;  %v4307_v45 = vld [vmem:[%s8870_s15 + $0x178] sm:$0xff] }
 0xc6e   :  { %v6991_v13 = vcombine.high %v4469_v7, %v4473_v8 }
 0xc70   :  { %5886 = vmatpush1.bf16.msra.mxu0 %v6932_v17  ;;  %5968 = vmatpush1.bf16.msra.mxu1 %v6934_v18  ;;  %v4477_v17 = vld [vmem:[%s8870_s15 + $0x6c8] sm:$0xff] }
 0xc71   :  { %5887 = vmatprep.subr.bf16.mxu0 %v6941_v19  ;;  %5969 = vmatprep.subr.bf16.mxu1 %v6943_v16  ;;  %v4481_v18 = vld [vmem:[%s8870_s15 + $0x6e8] sm:$0xff]  ;;  %v6988_v19 = vcombine.low %v4468_v5, %v4472_v6  ;;  %v6990_v16 = vcombine.low %v4469_v7, %v4473_v8  ;;  %v4254_v6 = vmax.f32 %v4246_v56, 0.0  ;;  %v4270_v8 = vld [vmem:[%s8870_s15 + $0x50] sm:$0xff] }
 0xc72   :  { %v6999_v11 = vcombine.high %v4477_v17, %v4481_v18 }
 0xc74   :  { %5888 = vmatpush1.bf16.msra.mxu0 %v6940_v22  ;;  %5970 = vmatpush1.bf16.msra.mxu1 %v6942_v23  ;;  %v4485_v22 = vld [vmem:[%s8870_s15 + $0x708] sm:$0xff] }
 0xc75   :  { %5889 = vmatprep.subr.bf16.mxu0 %v6949_v24  ;;  %5971 = vmatprep.subr.bf16.mxu1 %v6951_v25  ;;  %v4489_v23 = vld [vmem:[%s8870_s15 + $0x728] sm:$0xff]  ;;  %v6996_v24 = vcombine.low %v4476_v14, %v4480_v15  ;;  %v6998_v25 = vcombine.low %v4477_v17, %v4481_v18  ;;  %v9041_v14 = vpack.c.bf16 %v4254_v6, %v4254_v6 }
 0xc76   :  { %v7007_v28 = vcombine.high %v4485_v22, %v4489_v23 }
 0xc78   :  { %5890 = vmatpush1.bf16.msra.mxu0 %v6948_v32  ;;  %5972 = vmatpush1.bf16.msra.mxu1 %v6950_v33  ;;  %v4493_v32 = vld [vmem:[%s8870_s15 + $0x748] sm:$0xff] }
 0xc79   :  { %5891 = vmatprep.subr.bf16.mxu0 %v6957_v34  ;;  %5973 = vmatprep.subr.bf16.mxu1 %v6959_v35  ;;  %v4497_v33 = vld [vmem:[%s8870_s15 + $0x768] sm:$0xff]  ;;  %v7004_v34 = vcombine.low %v4484_v20, %v4488_v21  ;;  %v7006_v35 = vcombine.low %v4485_v22, %v4489_v23 }
 0xc7a   :  { %v7015_v37 = vcombine.high %v4493_v32, %v4497_v33 }
 0xc7c   :  { %5892 = vmatpush1.bf16.msra.mxu0 %v6956_v40  ;;  %5974 = vmatpush1.bf16.msra.mxu1 %v6958_v41  ;;  %v4501_v40 = vld [vmem:[%s8870_s15 + $0x788] sm:$0xff] }
 0xc7d   :  { %5893 = vmatprep.subr.bf16.mxu0 %v6965_v42  ;;  %5975 = vmatprep.subr.bf16.mxu1 %v6967_v43  ;;  %v4505_v41 = vld [vmem:[%s8870_s15 + $0x7a8] sm:$0xff]  ;;  %v7012_v42 = vcombine.low %v4492_v29, %v4496_v30  ;;  %v7014_v43 = vcombine.low %v4493_v32, %v4497_v33  ;;  %v4294_v33 = vld [vmem:[%s8870_s15 + $0x110] sm:$0xff] }
 0xc7e   :  { %v7023_v47 = vcombine.high %v4501_v40, %v4505_v41  ;;  %v7022_v55 = vcombine.low %v4501_v40, %v4505_v41  ;;  %v4302_v41 = vld [vmem:[%s8870_s15 + $0x150] sm:$0xff] }
 0xc80   :  { %5894 = vmatpush1.bf16.msra.mxu0 %v6964_v51  ;;  %5976 = vmatpush1.bf16.msra.mxu1 %v6966_v52  ;;  %v4512_v51 = vld [vmem:[%s8870_s15 + $0x7e0] sm:$0xff]  ;;  %v4509_v52 = vld [vmem:[%s8870_s15 + $0x7c8] sm:$0xff] }
 0xc81   :  { %5895 = vmatprep.subr.bf16.mxu0 %v6973_v53  ;;  %5977 = vmatprep.subr.bf16.mxu1 %v6975_v54  ;;  %v4513_v53 = vld [vmem:[%s8870_s15 + $0x7e8] sm:$0xff]  ;;  %v7020_v54 = vcombine.low %v4500_v38, %v4504_v39  ;;  %v7029_v26 = vcombine.high %v4508_v48, %v4512_v51 }
 0xc82   :  { %v7031_v60 = vcombine.high %v4509_v52, %v4513_v53  ;;  %v7030_v5 = vcombine.low %v4509_v52, %v4513_v53  ;;  %v4310_v52 = vld [vmem:[%s8870_s15 + $0x190] sm:$0xff] }
 0xc83   :  { %v4314_v53 = vld [vmem:[%s8870_s15 + $0x1b0] sm:$0xff] }
 0xc84   :  { %5896 = vmatpush1.bf16.msra.mxu0 %v6972_v1  ;;  %5978 = vmatpush1.bf16.msra.mxu1 %v6974_v2  ;;  %v4266_v1 = vld [vmem:[%s8870_s15 + $0x30] sm:$0xff]  ;;  %v4263_v2 = vld [vmem:[%s8870_s15 + $0x18] sm:$0xff] }
 0xc85   :  { %5897 = vmatprep.subr.bf16.mxu0 %v6981_v3  ;;  %5979 = vmatprep.subr.bf16.mxu1 %v6983_v4  ;;  %v4267_v3 = vld [vmem:[%s8870_s15 + $0x38] sm:$0xff]  ;;  %v7028_v4 = vcombine.low %v4508_v48, %v4512_v51  ;;  %v6785_v31 = vcombine.high %v4262_v0, %v4266_v1 }
 0xc86   :  { %v6787_v7 = vcombine.high %v4263_v2, %v4267_v3  ;;  %v6786_v15 = vcombine.low %v4263_v2, %v4267_v3  ;;  %v4322_v2 = vld [vmem:[%s8870_s15 + $0x1f0] sm:$0xff]  ;;  %v4319_v3 = vld [vmem:[%s8870_s15 + $0x1d8] sm:$0xff] }
 0xc88   :  { %5898 = vmatpush1.bf16.msra.mxu0 %v6980_v9  ;;  %5980 = vmatpush1.bf16.msra.mxu1 %v6982_v10  ;;  %v4274_v9 = vld [vmem:[%s8870_s15 + $0x70] sm:$0xff]  ;;  %v4271_v10 = vld [vmem:[%s8870_s15 + $0x58] sm:$0xff] }
 0xc89   :  { %5899 = vmatprep.subr.bf16.mxu0 %v6989_v12  ;;  %5981 = vmatprep.subr.bf16.mxu1 %v6991_v13  ;;  %v4275_v12 = vld [vmem:[%s8870_s15 + $0x78] sm:$0xff]  ;;  %v6784_v13 = vcombine.low %v4262_v0, %v4266_v1  ;;  %v6793_v17 = vcombine.high %v4270_v8, %v4274_v9  ;;  %v6792_v20 = vcombine.low %v4270_v8, %v4274_v9  ;;  %v4318_v1 = vld [vmem:[%s8870_s15 + $0x1d0] sm:$0xff] }
 0xc8a   :  { %v6795_v18 = vcombine.high %v4271_v10, %v4275_v12  ;;  %v6794_v21 = vcombine.low %v4271_v10, %v4275_v12  ;;  %v4326_v8 = vld [vmem:[%s8870_s15 + $0x210] sm:$0xff]  ;;  %v4327_v10 = vld [vmem:[%s8870_s15 + $0x218] sm:$0xff] }
 0xc8b   :  { %v4330_v9 = vld [vmem:[%s8870_s15 + $0x230] sm:$0xff]  ;;  %v4331_v12 = vld [vmem:[%s8870_s15 + $0x238] sm:$0xff] }
 0xc8c   :  { %5900 = vmatpush1.bf16.msra.mxu0 %v6988_v19  ;;  %5982 = vmatpush1.bf16.msra.mxu1 %v6990_v16  ;;  %v4278_v19 = vld [vmem:[%s8870_s15 + $0x90] sm:$0xff] }
 0xc8d   :  { %5901 = vmatprep.subr.bf16.mxu0 %v6997_v63  ;;  %5983 = vmatprep.subr.bf16.mxu1 %v6999_v11  ;;  %v4282_v16 = vld [vmem:[%s8870_s15 + $0xb0] sm:$0xff]  ;;  %v4279_v63 = vld [vmem:[%s8870_s15 + $0x98] sm:$0xff] }
 0xc8e   :  { %v4283_v11 = vld [vmem:[%s8870_s15 + $0xb8] sm:$0xff]  ;;  %v6801_v22 = vcombine.high %v4278_v19, %v4282_v16  ;;  %v6800_v29 = vcombine.low %v4278_v19, %v4282_v16  ;;  %v4334_v19 = vld [vmem:[%s8870_s15 + $0x250] sm:$0xff] }
 0xc8f   :  { %v6803_v23 = vcombine.high %v4279_v63, %v4283_v11  ;;  %v6802_v30 = vcombine.low %v4279_v63, %v4283_v11  ;;  %v4338_v16 = vld [vmem:[%s8870_s15 + $0x270] sm:$0xff]  ;;  %v4335_v63 = vld [vmem:[%s8870_s15 + $0x258] sm:$0xff] }
 0xc90   :  { %5902 = vmatpush1.bf16.msra.mxu0 %v6996_v24  ;;  %5984 = vmatpush1.bf16.msra.mxu1 %v6998_v25  ;;  %v4286_v24 = vld [vmem:[%s8870_s15 + $0xd0] sm:$0xff]  ;;  %v4339_v11 = vld [vmem:[%s8870_s15 + $0x278] sm:$0xff] }
 0xc91   :  { %5903 = vmatprep.subr.bf16.mxu0 %v7005_v27  ;;  %5985 = vmatprep.subr.bf16.mxu1 %v7007_v28  ;;  %v4290_v25 = vld [vmem:[%s8870_s15 + $0xf0] sm:$0xff]  ;;  %v4287_v27 = vld [vmem:[%s8870_s15 + $0xd8] sm:$0xff] }
 0xc92   :  { %v4291_v28 = vld [vmem:[%s8870_s15 + $0xf8] sm:$0xff] }
 0xc93   :  { %v6811_v32 = vcombine.high %v4287_v27, %v4291_v28  ;;  %v6810_v38 = vcombine.low %v4287_v27, %v4291_v28  ;;  %v4343_v27 = vld [vmem:[%s8870_s15 + $0x298] sm:$0xff] }
 0xc94   :  { %5904 = vmatpush1.bf16.msra.mxu0 %v7004_v34  ;;  %5986 = vmatpush1.bf16.msra.mxu1 %v7006_v35  ;;  %v4298_v34 = vld [vmem:[%s8870_s15 + $0x130] sm:$0xff]  ;;  %v4295_v35 = vld [vmem:[%s8870_s15 + $0x118] sm:$0xff] }
 0xc95   :  { %5905 = vmatprep.subr.bf16.mxu0 %v7013_v36  ;;  %5987 = vmatprep.subr.bf16.mxu1 %v7015_v37  ;;  %v4299_v36 = vld [vmem:[%s8870_s15 + $0x138] sm:$0xff]  ;;  %v6808_v37 = vcombine.low %v4286_v24, %v4290_v25  ;;  %v6817_v39 = vcombine.high %v4294_v33, %v4298_v34 }
 0xc96   :  { %v6819_v40 = vcombine.high %v4295_v35, %v4299_v36  ;;  %v4347_v28 = vld [vmem:[%s8870_s15 + $0x2b8] sm:$0xff] }
 0xc98   :  { %5906 = vmatpush1.bf16.msra.mxu0 %v7012_v42  ;;  %5988 = vmatpush1.bf16.msra.mxu1 %v7014_v43  ;;  %v4306_v42 = vld [vmem:[%s8870_s15 + $0x170] sm:$0xff]  ;;  %v4303_v43 = vld [vmem:[%s8870_s15 + $0x158] sm:$0xff] }
 0xc99   :  { %5907 = vmatprep.subr.bf16.mxu0 %v7021_v46  ;;  %5989 = vmatprep.subr.bf16.mxu1 %v7023_v47  ;;  %v6816_v46 = vcombine.low %v4294_v33, %v4298_v34  ;;  %v6818_v47 = vcombine.low %v4295_v35, %v4299_v36  ;;  %v6825_v48 = vcombine.high %v4302_v41, %v4306_v42  ;;  %v4350_v33 = vld [vmem:[%s8870_s15 + $0x2d0] sm:$0xff]  ;;  %v4351_v35 = vld [vmem:[%s8870_s15 + $0x2d8] sm:$0xff] }
 0xc9a   :  { %v6827_v51 = vcombine.high %v4303_v43, %v4307_v45  ;;  %v6824_v56 = vcombine.low %v4302_v41, %v4306_v42  ;;  %v4354_v34 = vld [vmem:[%s8870_s15 + $0x2f0] sm:$0xff]  ;;  %v4355_v36 = vld [vmem:[%s8870_s15 + $0x2f8] sm:$0xff] }
 0xc9b   :  { %v4358_v41 = vld [vmem:[%s8870_s15 + $0x310] sm:$0xff] }
 0xc9c   :  { %5908 = vmatpush1.bf16.msra.mxu0 %v7020_v54  ;;  %5990 = vmatpush1.bf16.msra.mxu1 %v7022_v55  ;;  %v4311_v54 = vld [vmem:[%s8870_s15 + $0x198] sm:$0xff]  ;;  %v4362_v42 = vld [vmem:[%s8870_s15 + $0x330] sm:$0xff] }
 0xc9d   :  { %5909 = vmatprep.subr.bf16.mxu0 %v7029_v26  ;;  %5991 = vmatprep.subr.bf16.mxu1 %v7031_v60  ;;  %v4315_v55 = vld [vmem:[%s8870_s15 + $0x1b8] sm:$0xff]  ;;  %v6826_v26 = vcombine.low %v4303_v43, %v4307_v45  ;;  %v6833_v60 = vcombine.high %v4310_v52, %v4314_v53 }
 0xc9e   :  { %v6835_v0 = vcombine.high %v4311_v54, %v4315_v55  ;;  %v6834_v6 = vcombine.low %v4311_v54, %v4315_v55  ;;  %v4359_v43 = vld [vmem:[%s8870_s15 + $0x318] sm:$0xff] }
 0xc9f   :  { %v4363_v45 = vld [vmem:[%s8870_s15 + $0x338] sm:$0xff] }
 0xca0   :  { %5910 = vmatpush1.bf16.msra.mxu0 %v7028_v4  ;;  %5992 = vmatpush1.bf16.msra.mxu1 %v7030_v5  ;;  %v4323_v4 = vld [vmem:[%s8870_s15 + $0x1f8] sm:$0xff]  ;;  %v6832_v5 = vcombine.low %v4310_v52, %v4314_v53  ;;  %v4366_v52 = vld [vmem:[%s8870_s15 + $0x350] sm:$0xff] }
 0xca1   :  { %6002 = vmatprep.subr.bf16.mxu0 %v6785_v31  ;;  %6084 = vmatprep.subr.bf16.mxu1 %v6787_v7  ;;  %v6841_v31 = vcombine.high %v4318_v1, %v4322_v2  ;;  %v6843_v7 = vcombine.high %v4319_v3, %v4323_v4  ;;  %v4370_v53 = vld [vmem:[%s8870_s15 + $0x370] sm:$0xff]  ;;  %v4367_v54 = vld [vmem:[%s8870_s15 + $0x358] sm:$0xff] }
 0xca2   :  { %v4371_v55 = vld [vmem:[%s8870_s15 + $0x378] sm:$0xff] }
 0xca3   :  { %5912 = vmatmul.mubr.bf16.vlgmr.msra.gmra.mrb[24].mxu0 %v9041_v14  ;;  %5994 = vmatmul.mubr.bf16.vlgmr.msra.gmra.mrb[36].mxu1 %v9041_v14 }
 0xca4   :  { %6003 = vmatpush1.bf16.msra.mxu0 %v6784_v13  ;;  %6034 = vmatprep.mubr.bf16.mxu0 %v8962_v49  ;;  %v6840_v13 = vcombine.low %v4318_v1, %v4322_v2  ;;  %v4374_v1 = vld [vmem:[%s8870_s15 + $0x390] sm:$0xff] }
 0xca5   :  { %6085 = vmatpush1.bf16.msra.mxu1 %v6786_v15  ;;  %6116 = vmatprep.mubr.bf16.mxu1 %v8962_v49  ;;  %v6809_v49 = vcombine.high %v4286_v24, %v4290_v25  ;;  %v6842_v15 = vcombine.low %v4319_v3, %v4323_v4  ;;  %v4342_v24 = vld [vmem:[%s8870_s15 + $0x290] sm:$0xff]  ;;  %v4375_v3 = vld [vmem:[%s8870_s15 + $0x398] sm:$0xff] }
 0xca6   :  { %6004 = vmatprep.subr.bf16.mxu0 %v6793_v17  ;;  %6086 = vmatprep.subr.bf16.mxu1 %v6795_v18  ;;  %v6849_v17 = vcombine.high %v4326_v8, %v4330_v9  ;;  %v6851_v18 = vcombine.high %v4327_v10, %v4331_v12  ;;  %v4346_v25 = vld [vmem:[%s8870_s15 + $0x2b0] sm:$0xff]  ;;  %v4379_v4 = vld [vmem:[%s8870_s15 + $0x3b8] sm:$0xff] }
 0xca7   :  { %v4378_v2 = vld [vmem:[%s8870_s15 + $0x3b0] sm:$0xff] }
 0xca8   :  { %6005 = vmatpush1.bf16.msra.mxu0 %v6792_v20  ;;  %v6848_v20 = vcombine.low %v4326_v8, %v4330_v9  ;;  %v4382_v8 = vld [vmem:[%s8870_s15 + $0x3d0] sm:$0xff] }
 0xca9   :  { %6087 = vmatpush1.bf16.msra.mxu1 %v6794_v21  ;;  %6006 = vmatprep.subr.bf16.mxu0 %v6801_v22  ;;  %v6850_v21 = vcombine.low %v4327_v10, %v4331_v12  ;;  %v6857_v22 = vcombine.high %v4334_v19, %v4338_v16  ;;  %v4386_v9 = vld [vmem:[%s8870_s15 + $0x3f0] sm:$0xff]  ;;  %v4383_v10 = vld [vmem:[%s8870_s15 + $0x3d8] sm:$0xff] }
 0xcaa   :  { %6088 = vmatprep.subr.bf16.mxu1 %v6803_v23  ;;  %v6859_v23 = vcombine.high %v4335_v63, %v4339_v11  ;;  %v4387_v12 = vld [vmem:[%s8870_s15 + $0x3f8] sm:$0xff] }
 0xcac   :  { %6007 = vmatpush1.bf16.msra.mxu0 %v6800_v29  ;;  %v6856_v29 = vcombine.low %v4334_v19, %v4338_v16  ;;  %v4390_v19 = vld [vmem:[%s8870_s15 + $0x410] sm:$0xff] }
 0xcad   :  { %6089 = vmatpush1.bf16.msra.mxu1 %v6802_v30  ;;  %6008 = vmatprep.subr.bf16.mxu0 %v6809_v49  ;;  %v6858_v30 = vcombine.low %v4335_v63, %v4339_v11  ;;  %v6865_v49 = vcombine.high %v4342_v24, %v4346_v25  ;;  %v4394_v16 = vld [vmem:[%s8870_s15 + $0x430] sm:$0xff]  ;;  %v4391_v63 = vld [vmem:[%s8870_s15 + $0x418] sm:$0xff] }
 0xcae   :  { %6090 = vmatprep.subr.bf16.mxu1 %v6811_v32  ;;  %v6867_v32 = vcombine.high %v4343_v27, %v4347_v28  ;;  %v4395_v11 = vld [vmem:[%s8870_s15 + $0x438] sm:$0xff] }
 0xcb0   :  { %6009 = vmatpush1.bf16.msra.mxu0 %v6808_v37  ;;  %v6864_v37 = vcombine.low %v4342_v24, %v4346_v25  ;;  %v4398_v24 = vld [vmem:[%s8870_s15 + $0x450] sm:$0xff] }
 0xcb1   :  { %6091 = vmatpush1.bf16.msra.mxu1 %v6810_v38  ;;  %6010 = vmatprep.subr.bf16.mxu0 %v6817_v39  ;;  %v6866_v38 = vcombine.low %v4343_v27, %v4347_v28  ;;  %v6873_v39 = vcombine.high %v4350_v33, %v4354_v34  ;;  %v4402_v25 = vld [vmem:[%s8870_s15 + $0x470] sm:$0xff]  ;;  %v6912_v27 = vcombine.low %v4390_v19, %v4394_v16  ;;  %v4399_v28 = vld [vmem:[%s8870_s15 + $0x458] sm:$0xff] }
 0xcb2   :  { %6092 = vmatprep.subr.bf16.mxu1 %v6819_v40  ;;  %v6875_v40 = vcombine.high %v4351_v35, %v4355_v36 }
 0xcb4   :  { %6011 = vmatpush1.bf16.msra.mxu0 %v6816_v46  ;;  %v6872_v46 = vcombine.low %v4350_v33, %v4354_v34  ;;  %v4410_v33 = vld [vmem:[%s8870_s15 + $0x4b0] sm:$0xff] }
 0xcb5   :  { %6093 = vmatpush1.bf16.msra.mxu1 %v6818_v47  ;;  %6012 = vmatprep.subr.bf16.mxu0 %v6825_v48  ;;  %v6874_v47 = vcombine.low %v4351_v35, %v4355_v36  ;;  %v6881_v48 = vcombine.high %v4358_v41, %v4362_v42  ;;  %v4407_v35 = vld [vmem:[%s8870_s15 + $0x498] sm:$0xff] }
 0xcb6   :  { %6094 = vmatprep.subr.bf16.mxu1 %v6827_v51  ;;  %v6883_v51 = vcombine.high %v4359_v43, %v4363_v45  ;;  %v4411_v36 = vld [vmem:[%s8870_s15 + $0x4b8] sm:$0xff] }
 0xcb8   :  { %6013 = vmatpush1.bf16.msra.mxu0 %v6824_v56  ;;  %v6880_v56 = vcombine.low %v4358_v41, %v4362_v42  ;;  %v4414_v41 = vld [vmem:[%s8870_s15 + $0x4d0] sm:$0xff] }
 0xcb9   :  { %6095 = vmatpush1.bf16.msra.mxu1 %v6826_v26  ;;  %6014 = vmatprep.subr.bf16.mxu0 %v6833_v60  ;;  %v6882_v26 = vcombine.low %v4359_v43, %v4363_v45  ;;  %v6889_v60 = vcombine.high %v4366_v52, %v4370_v53  ;;  %v4418_v42 = vld [vmem:[%s8870_s15 + $0x4f0] sm:$0xff]  ;;  %v4415_v43 = vld [vmem:[%s8870_s15 + $0x4d8] sm:$0xff] }
 0xcba   :  { %6096 = vmatprep.subr.bf16.mxu1 %v6835_v0  ;;  %v6891_v0 = vcombine.high %v4367_v54, %v4371_v55 }
 0xcbc   :  { %6015 = vmatpush1.bf16.msra.mxu0 %v6832_v5  ;;  %v6888_v5 = vcombine.low %v4366_v52, %v4370_v53  ;;  %v4423_v52 = vld [vmem:[%s8870_s15 + $0x518] sm:$0xff] }
 0xcbd   :  { %6097 = vmatpush1.bf16.msra.mxu1 %v6834_v6  ;;  %6016 = vmatprep.subr.bf16.mxu0 %v6841_v31  ;;  %v6890_v6 = vcombine.low %v4367_v54, %v4371_v55  ;;  %v6897_v31 = vcombine.high %v4374_v1, %v4378_v2  ;;  %v4427_v53 = vld [vmem:[%s8870_s15 + $0x538] sm:$0xff]  ;;  %v6936_v54 = vcombine.low %v4414_v41, %v4418_v42 }
 0xcbe   :  { %6098 = vmatprep.subr.bf16.mxu1 %v6843_v7  ;;  %v6899_v7 = vcombine.high %v4375_v3, %v4379_v4 }
 0xcc0   :  { %6017 = vmatpush1.bf16.msra.mxu0 %v6840_v13  ;;  %v6896_v13 = vcombine.low %v4374_v1, %v4378_v2  ;;  %v4431_v1 = vld [vmem:[%s8870_s15 + $0x558] sm:$0xff] }
 0xcc1   :  { %6099 = vmatpush1.bf16.msra.mxu1 %v6842_v15  ;;  %6018 = vmatprep.subr.bf16.mxu0 %v6849_v17  ;;  %v6898_v15 = vcombine.low %v4375_v3, %v4379_v4  ;;  %v6905_v17 = vcombine.high %v4382_v8, %v4386_v9  ;;  %v4435_v2 = vld [vmem:[%s8870_s15 + $0x578] sm:$0xff]  ;;  %v6946_v4 = vcombine.low %v4423_v52, %v4427_v53 }
 0xcc2   :  { %6100 = vmatprep.subr.bf16.mxu1 %v6851_v18  ;;  %v6907_v18 = vcombine.high %v4383_v10, %v4387_v12 }
 0xcc4   :  { %6019 = vmatpush1.bf16.msra.mxu0 %v6848_v20  ;;  %v6904_v20 = vcombine.low %v4382_v8, %v4386_v9  ;;  %v4439_v8 = vld [vmem:[%s8870_s15 + $0x598] sm:$0xff] }
 0xcc5   :  { %6101 = vmatpush1.bf16.msra.mxu1 %v6850_v21  ;;  %6020 = vmatprep.subr.bf16.mxu0 %v6857_v22  ;;  %v6906_v21 = vcombine.low %v4383_v10, %v4387_v12  ;;  %v6913_v22 = vcombine.high %v4390_v19, %v4394_v16  ;;  %v4443_v9 = vld [vmem:[%s8870_s15 + $0x5b8] sm:$0xff]  ;;  %v6954_v12 = vcombine.low %v4431_v1, %v4435_v2 }
 0xcc6   :  { %6102 = vmatprep.subr.bf16.mxu1 %v6859_v23  ;;  %v6915_v23 = vcombine.high %v4391_v63, %v4395_v11  ;;  %v4447_v19 = vld [vmem:[%s8870_s15 + $0x5d8] sm:$0xff] }
 0xcc7   :  { %v4451_v16 = vld [vmem:[%s8870_s15 + $0x5f8] sm:$0xff] }
 0xcc8   :  { %6021 = vmatpush1.bf16.msra.mxu0 %v6856_v29  ;;  %v4403_v29 = vld [vmem:[%s8870_s15 + $0x478] sm:$0xff] }
 0xcc9   :  { %6103 = vmatpush1.bf16.msra.mxu1 %v6858_v30  ;;  %6022 = vmatprep.subr.bf16.mxu0 %v6865_v49  ;;  %v6914_v30 = vcombine.low %v4391_v63, %v4395_v11  ;;  %v6921_v49 = vcombine.high %v4398_v24, %v4402_v25  ;;  %v6923_v34 = vcombine.high %v4399_v28, %v4403_v29 }
 0xcca   :  { %6104 = vmatprep.subr.bf16.mxu1 %v6867_v32  ;;  %v4406_v32 = vld [vmem:[%s8870_s15 + $0x490] sm:$0xff]  ;;  %v6962_v11 = vcombine.low %v4439_v8, %v4443_v9 }
 0xccb   :  { %v6928_v45 = vcombine.low %v4406_v32, %v4410_v33 }
 0xccc   :  { %6023 = vmatpush1.bf16.msra.mxu0 %v6864_v37  ;;  %v6920_v37 = vcombine.low %v4398_v24, %v4402_v25  ;;  %v4455_v24 = vld [vmem:[%s8870_s15 + $0x618] sm:$0xff] }
 0xccd   :  { %6105 = vmatpush1.bf16.msra.mxu1 %v6866_v38  ;;  %6024 = vmatprep.subr.bf16.mxu0 %v6873_v39  ;;  %v6922_v38 = vcombine.low %v4399_v28, %v4403_v29  ;;  %v6929_v39 = vcombine.high %v4406_v32, %v4410_v33  ;;  %v4459_v25 = vld [vmem:[%s8870_s15 + $0x638] sm:$0xff]  ;;  %v6970_v28 = vcombine.low %v4447_v19, %v4451_v16  ;;  %v4466_v32 = vld [vmem:[%s8870_s15 + $0x670] sm:$0xff] }
 0xcce   :  { %6106 = vmatprep.subr.bf16.mxu1 %v6875_v40  ;;  %v6931_v40 = vcombine.high %v4407_v35, %v4411_v36  ;;  %v4463_v33 = vld [vmem:[%s8870_s15 + $0x658] sm:$0xff] }
 0xcd0   :  { %6025 = vmatpush1.bf16.msra.mxu0 %v6872_v46  ;;  %v6930_v46 = vcombine.low %v4407_v35, %v4411_v36  ;;  %v6978_v36 = vcombine.low %v4455_v24, %v4459_v25 }
 0xcd1   :  { %6107 = vmatpush1.bf16.msra.mxu1 %v6874_v47  ;;  %6026 = vmatprep.subr.bf16.mxu0 %v6881_v48  ;;  %v6937_v47 = vcombine.high %v4414_v41, %v4418_v42  ;;  %v4422_v48 = vld [vmem:[%s8870_s15 + $0x510] sm:$0xff]  ;;  %v4471_v41 = vld [vmem:[%s8870_s15 + $0x698] sm:$0xff] }
 0xcd2   :  { %6108 = vmatprep.subr.bf16.mxu1 %v6883_v51  ;;  %v4426_v51 = vld [vmem:[%s8870_s15 + $0x530] sm:$0xff]  ;;  %v4475_v42 = vld [vmem:[%s8870_s15 + $0x6b8] sm:$0xff] }
 0xcd3   :  { %v6944_v3 = vcombine.low %v4422_v48, %v4426_v51 }
 0xcd4   :  { %6027 = vmatpush1.bf16.msra.mxu0 %v6880_v56  ;;  %v6945_v56 = vcombine.high %v4422_v48, %v4426_v51  ;;  %v4479_v48 = vld [vmem:[%s8870_s15 + $0x6d8] sm:$0xff] }
 0xcd5   :  { %6109 = vmatpush1.bf16.msra.mxu1 %v6882_v26  ;;  %6028 = vmatprep.subr.bf16.mxu0 %v6889_v60  ;;  %v6947_v26 = vcombine.high %v4423_v52, %v4427_v53  ;;  %v4430_v60 = vld [vmem:[%s8870_s15 + $0x550] sm:$0xff]  ;;  %v4483_v51 = vld [vmem:[%s8870_s15 + $0x6f8] sm:$0xff]  ;;  %v6994_v53 = vcombine.low %v4471_v41, %v4475_v42 }
 0xcd6   :  { %6110 = vmatprep.subr.bf16.mxu1 %v6891_v0  ;;  %v4434_v0 = vld [vmem:[%s8870_s15 + $0x570] sm:$0xff] }
 0xcd7   :  { %v6952_v10 = vcombine.low %v4430_v60, %v4434_v0 }
 0xcd8   :  { %6029 = vmatpush1.bf16.msra.mxu0 %v6888_v5  ;;  %v6953_v5 = vcombine.high %v4430_v60, %v4434_v0  ;;  %v4487_v60 = vld [vmem:[%s8870_s15 + $0x718] sm:$0xff] }
 0xcd9   :  { %6111 = vmatpush1.bf16.msra.mxu1 %v6890_v6  ;;  %6030 = vmatprep.subr.bf16.mxu0 %v6897_v31  ;;  %v6955_v6 = vcombine.high %v4431_v1, %v4435_v2  ;;  %v4438_v31 = vld [vmem:[%s8870_s15 + $0x590] sm:$0xff]  ;;  %v4491_v0 = vld [vmem:[%s8870_s15 + $0x738] sm:$0xff]  ;;  %v7002_v2 = vcombine.low %v4479_v48, %v4483_v51 }
 0xcda   :  { %6112 = vmatprep.subr.bf16.mxu1 %v6899_v7  ;;  %v4442_v7 = vld [vmem:[%s8870_s15 + $0x5b0] sm:$0xff] }
 0xcdb   :  { %v6960_v63 = vcombine.low %v4438_v31, %v4442_v7 }
 0xcdc   :  { %6031 = vmatpush1.bf16.msra.mxu0 %v6896_v13  ;;  %v6961_v13 = vcombine.high %v4438_v31, %v4442_v7  ;;  %v4495_v31 = vld [vmem:[%s8870_s15 + $0x758] sm:$0xff] }
 0xcdd   :  { %6113 = vmatpush1.bf16.msra.mxu1 %v6898_v15  ;;  %6032 = vmatprep.subr.bf16.mxu0 %v6905_v17  ;;  %v6963_v15 = vcombine.high %v4439_v8, %v4443_v9  ;;  %v4446_v17 = vld [vmem:[%s8870_s15 + $0x5d0] sm:$0xff]  ;;  %v4499_v7 = vld [vmem:[%s8870_s15 + $0x778] sm:$0xff]  ;;  %v7010_v9 = vcombine.low %v4487_v60, %v4491_v0 }
 0xcde   :  { %6114 = vmatprep.subr.bf16.mxu1 %v6907_v18  ;;  %v4450_v18 = vld [vmem:[%s8870_s15 + $0x5f0] sm:$0xff] }
 0xce0   :  { %6033 = vmatpush1.bf16.msra.mxu0 %v6904_v20  ;;  %v6969_v20 = vcombine.high %v4446_v17, %v4450_v18 }
 0xce1   :  { %6115 = vmatpush1.bf16.msra.mxu1 %v6906_v21  ;;  %6043 = vmatprep.subr.bf16.mxu0 %v6913_v22  ;;  %v6971_v21 = vcombine.high %v4447_v19, %v4451_v16  ;;  %v4454_v22 = vld [vmem:[%s8870_s15 + $0x610] sm:$0xff]  ;;  %v7018_v16 = vcombine.low %v4495_v31, %v4499_v7 }
 0xce2   :  { %6125 = vmatprep.subr.bf16.mxu1 %v6915_v23  ;;  %v4458_v23 = vld [vmem:[%s8870_s15 + $0x630] sm:$0xff] }
 0xce3   :  { %6035 = vmatmul.mubr.bf16.vlgmr.msra.gmra.mrb[28].mxu0 %v8964_v50  ;;  %v6977_v29 = vcombine.high %v4454_v22, %v4458_v23  ;;  %v6976_v35 = vcombine.low %v4454_v22, %v4458_v23  ;;  %v4511_v22 = vld [vmem:[%s8870_s15 + $0x7d8] sm:$0xff] }
 0xce4   :  { %6117 = vmatmul.mubr.bf16.vlgmr.msra.gmra.mrb[40].mxu1 %v8964_v50  ;;  %6044 = vmatpush1.bf16.msra.mxu0 %v6912_v27  ;;  %v4419_v50 = vld [vmem:[%s8870_s15 + $0x4f8] sm:$0xff]  ;;  %v6968_v27 = vcombine.low %v4446_v17, %v4450_v18 }
 0xce5   :  { %6075 = vmatprep.mubr.bf16.mxu0 %v8972_v57  ;;  %6126 = vmatpush1.bf16.msra.mxu1 %v6914_v30  ;;  %v6938_v55 = vcombine.low %v4415_v43, %v4419_v50  ;;  %v6979_v30 = vcombine.high %v4455_v24, %v4459_v25  ;;  %v4503_v17 = vld [vmem:[%s8870_s15 + $0x798] sm:$0xff] }
 0xce6   :  { %6157 = vmatprep.mubr.bf16.mxu1 %v8972_v57  ;;  %6045 = vmatprep.subr.bf16.mxu0 %v6921_v49  ;;  %v6939_v57 = vcombine.high %v4415_v43, %v4419_v50  ;;  %v4462_v49 = vld [vmem:[%s8870_s15 + $0x650] sm:$0xff]  ;;  %v4507_v18 = vld [vmem:[%s8870_s15 + $0x7b8] sm:$0xff] }
 0xce7   :  { %6127 = vmatprep.subr.bf16.mxu1 %v6923_v34  ;;  %v4467_v34 = vld [vmem:[%s8870_s15 + $0x678] sm:$0xff]  ;;  %v6984_v43 = vcombine.low %v4462_v49, %v4466_v32  ;;  %v7026_v25 = vcombine.low %v4503_v17, %v4507_v18 }
 0xce8   :  { %6046 = vmatpush1.bf16.msra.mxu0 %v6920_v37  ;;  %v6985_v37 = vcombine.high %v4462_v49, %v4466_v32  ;;  %v6986_v50 = vcombine.low %v4463_v33, %v4467_v34  ;;  %v4515_v23 = vld [vmem:[%s8870_s15 + $0x7f8] sm:$0xff]  ;;  %v4516_v49 = vld [vmem:[%s6281_s27] sm:$0xff] }
 0xce9   :  { %6128 = vmatpush1.bf16.msra.mxu1 %v6922_v38  ;;  %6047 = vmatprep.subr.bf16.mxu0 %v6929_v39  ;;  %v6987_v38 = vcombine.high %v4463_v33, %v4467_v34  ;;  %v4470_v39 = vld [vmem:[%s8870_s15 + $0x690] sm:$0xff]  ;;  %v4521_v32 = vrot.slane %v4516_v49, %v8502_v59  ;;  %v4529_v33 = vrot.slane %v4516_v49, %v8546_v44 }
 0xcea   :  { %6129 = vmatprep.subr.bf16.mxu1 %v6931_v40  ;;  %v4474_v40 = vld [vmem:[%s8870_s15 + $0x6b0] sm:$0xff]  ;;  %v4525_v34 = vrot.slane %v4516_v49, %v8507_v61 }
 0xceb   :  { %v6992_v52 = vcombine.low %v4470_v39, %v4474_v40 }
 0xcec   :  { %6048 = vmatpush1.bf16.msra.mxu0 %v6928_v45  ;;  %v6993_v45 = vcombine.high %v4470_v39, %v4474_v40 }
 0xced   :  { %6130 = vmatpush1.bf16.msra.mxu1 %v6930_v46  ;;  %6049 = vmatprep.subr.bf16.mxu0 %v6937_v47  ;;  %v6995_v46 = vcombine.high %v4471_v41, %v4475_v42  ;;  %v4478_v47 = vld [vmem:[%s8870_s15 + $0x6d0] sm:$0xff] }
 0xcee   :  { %6131 = vmatprep.subr.bf16.mxu1 %v6939_v57  ;;  %v4482_v57 = vld [vmem:[%s8870_s15 + $0x6f0] sm:$0xff] }
 0xcef   :  { %v7000_v1 = vcombine.low %v4478_v47, %v4482_v57 }
 0xcf0   :  { %6050 = vmatpush1.bf16.msra.mxu0 %v6936_v54  ;;  %v7001_v54 = vcombine.high %v4478_v47, %v4482_v57 }
 0xcf1   :  { %6132 = vmatpush1.bf16.msra.mxu1 %v6938_v55  ;;  %6051 = vmatprep.subr.bf16.mxu0 %v6945_v56  ;;  %v7003_v55 = vcombine.high %v4479_v48, %v4483_v51  ;;  %v4486_v56 = vld [vmem:[%s8870_s15 + $0x710] sm:$0xff] }
 0xcf2   :  { %6133 = vmatprep.subr.bf16.mxu1 %v6947_v26  ;;  %v4490_v26 = vld [vmem:[%s8870_s15 + $0x730] sm:$0xff] }
 0xcf3   :  { %v7008_v8 = vcombine.low %v4486_v56, %v4490_v26 }
 0xcf4   :  { %6052 = vmatpush1.bf16.msra.mxu0 %v6944_v3  ;;  %v7009_v3 = vcombine.high %v4486_v56, %v4490_v26 }
 0xcf5   :  { %6134 = vmatpush1.bf16.msra.mxu1 %v6946_v4  ;;  %6053 = vmatprep.subr.bf16.mxu0 %v6953_v5  ;;  %v7011_v4 = vcombine.high %v4487_v60, %v4491_v0  ;;  %v4494_v5 = vld [vmem:[%s8870_s15 + $0x750] sm:$0xff] }
 0xcf6   :  { %6135 = vmatprep.subr.bf16.mxu1 %v6955_v6  ;;  %v4498_v6 = vld [vmem:[%s8870_s15 + $0x770] sm:$0xff] }
 0xcf7   :  { %v7016_v19 = vcombine.low %v4494_v5, %v4498_v6 }
 0xcf8   :  { %6054 = vmatpush1.bf16.msra.mxu0 %v6952_v10  ;;  %v7017_v10 = vcombine.high %v4494_v5, %v4498_v6  ;;  %v4540_v5 = vsub.s32 5, %v8499_v58  ;;  %v4548_v6 = vsub.s32 7, %v8499_v58 }
 0xcf9   :  { %6136 = vmatpush1.bf16.msra.mxu1 %v6954_v12  ;;  %6055 = vmatprep.subr.bf16.mxu0 %v6961_v13  ;;  %v7019_v12 = vcombine.high %v4495_v31, %v4499_v7  ;;  %v4502_v13 = vld [vmem:[%s8870_s15 + $0x790] sm:$0xff] }
 0xcfa   :  { %6137 = vmatprep.subr.bf16.mxu1 %v6963_v15  ;;  %v4506_v15 = vld [vmem:[%s8870_s15 + $0x7b0] sm:$0xff] }
 0xcfb   :  { %v7024_v24 = vcombine.low %v4502_v13, %v4506_v15 }
 0xcfc   :  { %6056 = vmatpush1.bf16.msra.mxu0 %v6960_v63  ;;  %v7025_v63 = vcombine.high %v4502_v13, %v4506_v15 }
 0xcfd   :  { %6138 = vmatpush1.bf16.msra.mxu1 %v6962_v11  ;;  %6057 = vmatprep.subr.bf16.mxu0 %v6969_v20  ;;  %v7027_v11 = vcombine.high %v4503_v17, %v4507_v18  ;;  %v4510_v20 = vld [vmem:[%s8870_s15 + $0x7d0] sm:$0xff] }
 0xcfe   :  { %6139 = vmatprep.subr.bf16.mxu1 %v6971_v21  ;;  %v4514_v21 = vld [vmem:[%s8870_s15 + $0x7f0] sm:$0xff] }
 0xd00   :  { %6058 = vmatpush1.bf16.msra.mxu0 %v6968_v27  ;;  %v7033_v27 = vcombine.high %v4510_v20, %v4514_v21 }
 0xd01   :  { %6140 = vmatpush1.bf16.msra.mxu1 %v6970_v28  ;;  %6059 = vmatprep.subr.bf16.mxu0 %v6977_v29  ;;  %v7035_v28 = vcombine.high %v4511_v22, %v4515_v23  ;;  %v7032_v29 = vcombine.low %v4510_v20, %v4514_v21 }
 0xd02   :  { %6141 = vmatprep.subr.bf16.mxu1 %v6979_v30  ;;  %v7034_v30 = vcombine.low %v4511_v22, %v4515_v23 }
 0xd04   :  { %6060 = vmatpush1.bf16.msra.mxu0 %v6976_v35  ;;  %v4533_v35 = vrot.slane %v4516_v49, %v8510_v62 }
 0xd05   :  { %6142 = vmatpush1.bf16.msra.mxu1 %v6978_v36  ;;  %6061 = vmatprep.subr.bf16.mxu0 %v6985_v37 }
 0xd06   :  { %6143 = vmatprep.subr.bf16.mxu1 %v6987_v38 }
 0xd08   :  { %6062 = vmatpush1.bf16.msra.mxu0 %v6984_v43 }
 0xd09   :  { %6144 = vmatpush1.bf16.msra.mxu1 %v6986_v50  ;;  %6063 = vmatprep.subr.bf16.mxu0 %v6993_v45 }
 0xd0a   :  { %6145 = vmatprep.subr.bf16.mxu1 %v6995_v46 }
 0xd0c   :  { %6064 = vmatpush1.bf16.msra.mxu0 %v6992_v52 }
 0xd0d   :  { %6146 = vmatpush1.bf16.msra.mxu1 %v6994_v53  ;;  %6065 = vmatprep.subr.bf16.mxu0 %v7001_v54 }
 0xd0e   :  { %6147 = vmatprep.subr.bf16.mxu1 %v7003_v55 }
 0xd10   :  { %6066 = vmatpush1.bf16.msra.mxu0 %v7000_v1 }
 0xd11   :  { %6148 = vmatpush1.bf16.msra.mxu1 %v7002_v2  ;;  %6067 = vmatprep.subr.bf16.mxu0 %v7009_v3  ;;  %v4536_v3 = vsub.s32 4, %v8499_v58 }
 0xd12   :  { %6149 = vmatprep.subr.bf16.mxu1 %v7011_v4  ;;  %v4544_v4 = vsub.s32 6, %v8499_v58 }
 0xd13   :  { %v4537_v31 = vrot.slane %v4516_v49, %v4536_v3 }
 0xd14   :  { %6068 = vmatpush1.bf16.msra.mxu0 %v7008_v8  ;;  %v4545_v7 = vrot.slane %v4516_v49, %v4544_v4  ;;  %v4541_v8 = vrot.slane %v4516_v49, %v4540_v5 }
 0xd15   :  { %6150 = vmatpush1.bf16.msra.mxu1 %v7010_v9  ;;  %6069 = vmatprep.subr.bf16.mxu0 %v7017_v10  ;;  %v4549_v9 = vrot.slane %v4516_v49, %v4548_v6 }
 0xd16   :  { %6151 = vmatprep.subr.bf16.mxu1 %v7019_v12 }
 0xd18   :  { %6070 = vmatpush1.bf16.msra.mxu0 %v7016_v19 }
 0xd19   :  { %6152 = vmatpush1.bf16.msra.mxu1 %v7018_v16  ;;  %6071 = vmatprep.subr.bf16.mxu0 %v7025_v63 }
 0xd1a   :  { %6153 = vmatprep.subr.bf16.mxu1 %v7027_v11 }
 0xd1c   :  { %6072 = vmatpush1.bf16.msra.mxu0 %v7024_v24 }
 0xd1d   :  { %6154 = vmatpush1.bf16.msra.mxu1 %v7026_v25  ;;  %6073 = vmatprep.subr.bf16.mxu0 %v7033_v27 }
 0xd1e   :  { %6155 = vmatprep.subr.bf16.mxu1 %v7035_v28 }
 0xd20   :  { %6074 = vmatpush1.bf16.msra.mxu0 %v7032_v29 }
 0xd21   :  { %6156 = vmatpush1.bf16.msra.mxu1 %v7034_v30 }
 0xd23   :  { %6076 = vmatmul.mubr.bf16.vlgmr.msra.gmra.mrb[28].mxu0 %v9041_v14 }
 0xd24   :  { %6158 = vmatmul.mubr.bf16.vlgmr.msra.gmra.mrb[40].mxu1 %v9041_v14 }
 0xd76   :  { %v5913_v36 = vpop.f32.mrb[24].mxu0  ;;  %v5995_v37 = vpop.f32.mrb[36].mxu1 }
 0xd77   :  { %v7312_v38 = vadd.f32 %v5913_v36, %v4521_v32  ;;  %v7314_v39 = vadd.f32 %v5995_v37, %v4529_v33  ;;  %v5915_v40 = vpop.f32.mrb[25].mxu0  ;;  %v5997_v14 = vpop.f32.mrb[37].mxu1 }
 0xd78   :  { %v7313_v41 = vadd.f32 %v5915_v40, %v4525_v34  ;;  %v7315_v42 = vadd.f32 %v5997_v14, %v4533_v35  ;;  %v5917_v43 = vpop.f32.mrb[26].mxu0  ;;  %v5999_v50 = vpop.f32.mrb[38].mxu1 }
 0xd79   :  { %v7036_v45 = vmul.f32 -1.442695, %v7312_v38  ;;  %v7038_v46 = vmul.f32 -1.442695, %v7314_v39  ;;  %v5918_v47 = vpop.f32.mrb[27].mxu0  ;;  %v6000_v59 = vpop.f32.mrb[39].mxu1 }
 0xd7a   :  { %v7037_v57 = vmul.f32 -1.442695, %v7313_v41  ;;  %v7039_v44 = vmul.f32 -1.442695, %v7315_v42 }
 0xd7b   :  { %8084 = vpow2.f32 %v7036_v45 }
 0xd7c   :  { %8086 = vpow2.f32 %v7038_v46 }
 0xd7d   :  { %8088 = vpow2.f32 %v7037_v57 }
 0xd7e   :  { %8090 = vpow2.f32 %v7039_v44 }
 0xd85   :  { %v8085_v61 = vpop.eup %8084 }
 0xd86   :  { %v8087_v62 = vpop.eup %8086  ;;  %v6190_v48 = vadd.f32 1.0, %v8085_v61 }
 0xd87   :  { %v8089_v51 = vpop.eup %8088  ;;  %v6192_v52 = vadd.f32 1.0, %v8087_v62 }
 0xd88   :  { %v8091_v53 = vpop.eup %8090  ;;  %8092 = vrcp.f32 %v6190_v48  ;;  %v6191_v54 = vadd.f32 1.0, %v8089_v51 }
 0xd89   :  { %8094 = vrcp.f32 %v6192_v52  ;;  %v6193_v55 = vadd.f32 1.0, %v8091_v53 }
 0xd8a   :  { %8096 = vrcp.f32 %v6191_v54 }
 0xd8b   :  { %8098 = vrcp.f32 %v6193_v55 }
 0xd92   :  { %v8093_v56 = vpop.eup %8092 }
 0xd93   :  { %v8095_v26 = vpop.eup %8094 }
 0xd94   :  { %v8097_v60 = vpop.eup %8096 }
 0xd95   :  { %v8099_v0 = vpop.eup %8098  ;;  %v7048_v1 = vpack.c.bf16 %v8097_v60, %v8093_v56 }
 0xd96   :  { %v7049_v2 = vpack.c.bf16 %v8099_v0, %v8095_v26 }
 0xd97   :  { %6246 = vst [vmem:[%s9183_s1] sm:$0xff] %v7048_v1 }
 0xd98   :  { %6247 = vst [vmem:[%s9183_s1 + $0x8] sm:$0xff] %v7049_v2 }
 0xdf6   :  { %v6077_v10 = vpop.f32.mrb[28].mxu0 }
 0xdf7   :  { %v7316_v12 = vadd.f32 %v6077_v10, %v4537_v31  ;;  %v6159_v13 = vpop.f32.mrb[40].mxu1  ;;  %v6079_v15 = vpop.f32.mrb[29].mxu0 }
 0xdf8   :  { %v7318_v17 = vadd.f32 %v6159_v13, %v4545_v7  ;;  %v7317_v18 = vadd.f32 %v6079_v15, %v4541_v8  ;;  %v6161_v19 = vpop.f32.mrb[41].mxu1  ;;  %v6081_v16 = vpop.f32.mrb[30].mxu0 }
 0xdf9   :  { %v7040_v63 = vmul.f32 -1.442695, %v7316_v12  ;;  %v7319_v11 = vadd.f32 %v6161_v19, %v4549_v9  ;;  %v6163_v20 = vpop.f32.mrb[42].mxu1  ;;  %v6082_v21 = vpop.f32.mrb[31].mxu0 }
 0xdfa   :  { %v7042_v22 = vmul.f32 -1.442695, %v7318_v17  ;;  %v7041_v23 = vmul.f32 -1.442695, %v7317_v18  ;;  %v6164_v24 = vpop.f32.mrb[43].mxu1 }
 0xdfb   :  { %8100 = vpow2.f32 %v7040_v63  ;;  %v7043_v58 = vmul.f32 -1.442695, %v7319_v11 }
 0xdfc   :  { %8102 = vpow2.f32 %v7042_v22 }
 0xdfd   :  { %8104 = vpow2.f32 %v7041_v23 }
 0xdfe   :  { %8106 = vpow2.f32 %v7043_v58 }
 0xe05   :  { %v8101_v25 = vpop.eup %8100 }
 0xe06   :  { %v8103_v27 = vpop.eup %8102  ;;  %v6194_v28 = vadd.f32 1.0, %v8101_v25 }
 0xe07   :  { %v8105_v29 = vpop.eup %8104  ;;  %v6196_v30 = vadd.f32 1.0, %v8103_v27 }
 0xe08   :  { %v8107_v49 = vpop.eup %8106  ;;  %8108 = vrcp.f32 %v6194_v28  ;;  %v6195_v32 = vadd.f32 1.0, %v8105_v29 }
 0xe09   :  { %8110 = vrcp.f32 %v6196_v30  ;;  %v6197_v33 = vadd.f32 1.0, %v8107_v49 }
 0xe0a   :  { %8112 = vrcp.f32 %v6195_v32 }
 0xe0b   :  { %8114 = vrcp.f32 %v6197_v33 }
 0xe12   :  { %v8109_v34 = vpop.eup %8108 }
 0xe13   :  { %v8111_v35 = vpop.eup %8110 }
 0xe14   :  { %v8113_v36 = vpop.eup %8112 }
 0xe15   :  { %v8115_v37 = vpop.eup %8114  ;;  %v7050_v38 = vpack.c.bf16 %v8113_v36, %v8109_v34 }
 0xe16   :  { %v7051_v39 = vpack.c.bf16 %v8115_v37, %v8111_v35 }
 0xe17   :  { %6248 = vst [vmem:[%s9183_s1 + $0x10] sm:$0xff] %v7050_v38 }
 0xe18   :  { %6249 = vst [vmem:[%s9183_s1 + $0x18] sm:$0xff] %v7051_v39 }

</bundles_post_ra>
